<compile_context>
chip_gen: v5e
topology: v5e:2x2
jax: 0.10.0
libtpu: 0.0.40
codegen_flags: <defaults>
</compile_context>

<pallas_src>
import jax
import jax.numpy as jnp
import numpy as np
from jax import lax
from jax.experimental import pallas as pl
from jax.experimental.pallas import tpu as pltpu


def _vmem_limit_bytes():
    # Generation-aware scoped-VMEM limit: 128 MiB physical on v5e/v6e, only 64 MiB on v7x.
    try:
        kind = jax.devices()[0].device_kind.lower()
    except Exception:
        return 48 * 1024 * 1024
    if "v5" in kind or "v6" in kind:
        return 100 * 1024 * 1024
    return 48 * 1024 * 1024


def _pool_select(in_len, out_len):
    """(in_len, out_len) 0/1 matrix implementing a k=3, stride=2, pad=1 windowed sum."""
    m = np.zeros((in_len, out_len), np.float32)
    for o in range(out_len):
        for k in range(3):
            i = 2 * o - 1 + k
            if 0 <= i < in_len:
                m[i, o] = 1.0
    return m


def high_enhancer(x_ncdhw, w_t, bias):
    """x_ncdhw: (N, C, D, H, W) f32; w_t: (Cin, Cout, 3, 3, 3); bias: (Cout,)."""
    N, C, D, H, W = x_ncdhw.shape
    # TODO(synk): odd spatial sizes diverge from ConvTranspose3d output_padding semantics;
    #             even sizes (the stride-2 round trip case) are supported.
    assert D % 2 == 0 and H % 2 == 0 and W % 2 == 0, "even spatial dims required"
    Do, Ho, Wo = D // 2, H // 2, W // 2
    C8 = 8 * C
    Wp = Wo + 1                       # right-padded plane width
    P = (Ho + 1) * Wp                 # flattened right-padded (H, W) plane
    Rv = (Ho - 1) * Wp + Wo           # rows actually needed by the sub-pixel matmul

    vmem = _vmem_limit_bytes()
    params_pool = pltpu.CompilerParams(
        dimension_semantics=("parallel",), vmem_limit_bytes=vmem)
    params_deconv = pltpu.CompilerParams(
        dimension_semantics=("parallel", "parallel"), vmem_limit_bytes=vmem)

    # ---------------- fused AvgPool3d(k=3, s=2, p=1): one Pallas kernel ----------------
    sel_w = jnp.asarray(_pool_select(W, Wo))         # (W, Wo)
    sel_ht = jnp.asarray(_pool_select(H, Ho).T)      # (Ho, H)

    def _pool_kernel(x_ref, sw_ref, sht_ref, out_ref, hw_ref):
        # x_ref: (1, D, H, W) f32 -- one (n, c) volume.  W/H 3-tap stride-2 sums are tiny
        # selection matmuls on the MXU; the D taps are adds through the VMEM scratch.
        for d in range(D):
            t = jnp.dot(x_ref[0, d], sw_ref[...],
                        preferred_element_type=jnp.float32)            # (H, Wo)
            hw_ref[d] = jnp.dot(sht_ref[...], t,
                                preferred_element_type=jnp.float32)    # (Ho, Wo)
        for i in range(Do):
            acc = hw_ref[2 * i] + hw_ref[2 * i + 1]
            if i > 0:                 # the only out-of-range depth tap (d = -1) is at i == 0
                acc = acc + hw_ref[2 * i - 1]
            out_ref[0, i] = (acc * (1.0 / 27.0)).astype(out_ref.dtype)

    NC = N * C
    xf = x_ncdhw.reshape(NC, D, H, W)
    pooled_cf = pl.pallas_call(
        _pool_kernel,
        out_shape=jax.ShapeDtypeStruct((NC, Do, Ho, Wo), jnp.bfloat16),
        grid=(NC,),
        in_specs=[pl.BlockSpec((1, D, H, W), lambda j: (j, 0, 0, 0)),
                  pl.BlockSpec((W, Wo), lambda j: (0, 0)),
                  pl.BlockSpec((Ho, H), lambda j: (0, 0))],
        out_specs=pl.BlockSpec((1, Do, Ho, Wo), lambda j: (j, 0, 0, 0)),
        scratch_shapes=[pltpu.VMEM((D, Ho, Wo), jnp.float32)],
        compiler_params=params_pool,
    )(xf, sel_w, sel_ht)

    # Channel-by-plane layout + zero right pad (tiny tensor, ~x/16 bytes; XLA fuses this).
    pooled = pooled_cf.reshape(N, C, Do, Ho, Wo)
    pooled = jnp.transpose(pooled, (0, 2, 1, 3, 4))                   # (N, Do, C, Ho, Wo)
    pp = jnp.pad(pooled, ((0, 0), (0, 1), (0, 0), (0, 1), (0, 1)))    # (N, Do+1, C, Ho+1, Wp)
    pp = pp.reshape(N, Do + 1, C, P)                                  # bf16

    # ---------------- ConvTranspose3d(k=3, s=2, p=1, op=1): sub-pixel decomposition ------
    # Per output parity p and pooled offset delta in {0,1}, the contributing kernel tap is
    # KSEL[p][delta]:  p=0 -> (k=1, -) ; p=1 -> (k=2, k=0).
    sel = np.zeros((2, 2, 3), np.float32)
    sel[0, 0, 1] = 1.0
    sel[1, 0, 2] = 1.0
    sel[1, 1, 0] = 1.0
    # Wt[(pd,ph,pw,co), (dh,dw,dd,ci)] -- one vectorized einsum, no traced scatter chain.
    w_mat = jnp.einsum('pak,qbl,rcm,ioklm->pqrobcai', sel, sel, sel, w_t)
    w_mat = w_mat.reshape(C8, C8).astype(jnp.bfloat16)
    bias_col = jnp.tile(bias, 8).reshape(C8, 1).astype(jnp.float32)

    def _deconv_kernel(p0_ref, p1_ref, w_ref, b_ref, y_ref):
        # p*_ref: (1, 1, C, P) bf16 pooled planes at depths q and q+1 (plane Do is all-zero
        # padding).  Build the (8C, Rv) sub-pixel operand with sublane concats + static lane
        # slices (no HBM im2col), then a single K=8C MXU matmul with f32 accumulation.
        pcat = jnp.concatenate([p0_ref[0, 0], p1_ref[0, 0]], axis=0)         # (2C, P)
        pieces = [pcat[:, s:s + Rv] for s in (0, 1, Wp, Wp + 1)]             # (dh, dw) shifts
        pat = jnp.concatenate(pieces, axis=0)                                # (8C, Rv)
        y = jnp.dot(w_ref[...], pat, preferred_element_type=jnp.float32)     # (8C, Rv) f32
        y_ref[0, 0] = y + b_ref[...]

    y_t = pl.pallas_call(
        _deconv_kernel,
        out_shape=jax.ShapeDtypeStruct((N, Do, C8, Rv), jnp.float32),
        grid=(N, Do),
        in_specs=[pl.BlockSpec((1, 1, C, P), lambda n, q: (n, q, 0, 0)),
                  pl.BlockSpec((1, 1, C, P), lambda n, q: (n, q + 1, 0, 0)),
                  pl.BlockSpec((C8, C8), lambda n, q: (0, 0)),
                  pl.BlockSpec((C8, 1), lambda n, q: (0, 0))],
        out_specs=pl.BlockSpec((1, 1, C8, Rv), lambda n, q: (n, q, 0, 0)),
        compiler_params=params_deconv,
    )(pp, pp, w_mat, bias_col)

    # ---------------- fused residual / de-parity / NCDHW restore (one XLA pass) ----------
    y = jnp.pad(y_t, ((0, 0), (0, 0), (0, 0), (0, Wp - Wo)))         # rows back to Ho*Wp
    y = y.reshape(N, Do, 2, 2, 2, C, Ho, Wp)[..., :Wo]               # (N,Do,pd,ph,pw,C,Ho,Wo)
    y = jnp.transpose(y, (0, 5, 1, 2, 6, 3, 7, 4)).reshape(N, C, D, H, W)
    return x_ncdhw - y


# ------------------------- pure-JAX reference -------------------------

def reference(x_ncdhw, w_t, bias):
    x = jnp.transpose(x_ncdhw, (0, 2, 3, 4, 1)).astype(jnp.float32)
    s = lax.reduce_window(x, 0.0, lax.add,
                          (1, 3, 3, 3, 1), (1, 2, 2, 2, 1),
                          [(0, 0), (1, 1), (1, 1), (1, 1), (0, 0)])
    pooled = s / 27.0
    w_flip = jnp.transpose(w_t[:, :, ::-1, ::-1, ::-1], (2, 3, 4, 0, 1))  # DHWIO
    y = lax.conv_general_dilated(
        pooled, w_flip, window_strides=(1, 1, 1),
        padding=[(1, 2), (1, 2), (1, 2)], lhs_dilation=(2, 2, 2),
        dimension_numbers=('NDHWC', 'DHWIO', 'NDHWC'),
        precision=lax.Precision.HIGHEST)
    out = x - (y + bias)
    return jnp.transpose(out, (0, 4, 1, 2, 3))


# ------------------------- main -------------------------

if __name__ == "__main__":
    N, C, D, H, W = 2, 32, 8, 8, 8   # channels=32 matches the module default; small spatial
    key = jax.random.PRNGKey(0)
    kx, kw, kb = jax.random.split(key, 3)

    x = jax.random.normal(kx, (N, C, D, H, W), dtype=jnp.float32)
    bound = 1.0 / (C * 27) ** 0.5
    w_t = jax.random.uniform(kw, (C, C, 3, 3, 3), jnp.float32, -bound, bound)
    bias = jax.random.uniform(kb, (C,), jnp.float32, -bound, bound)

    out = jax.block_until_ready(jax.jit(high_enhancer)(x, w_t, bias))
    ref = jax.block_until_ready(reference(x, w_t, bias))

    assert out.shape == (N, C, D, H, W)
    # bf16 MXU operands -> slightly looser tolerance than full-f32.
    err = float(jnp.max(jnp.abs(out - ref)))
    assert jnp.allclose(out, ref, atol=2e-3, rtol=2e-3), err

    print("KERNEL_OK")
</pallas_src>

<mosaic_0001>
module attributes {stable_mosaic.version = 11 : i64} {
  func.func @_pool_kernel(%arg0: i32, %arg1: memref<1x8x8x8xf32, #tpu.memory_space<vmem>>, %arg2: memref<8x4xf32, #tpu.memory_space<vmem>>, %arg3: memref<4x8xf32, #tpu.memory_space<vmem>>, %arg4: memref<1x4x4x4xbf16, #tpu.memory_space<vmem>>, %arg5: memref<8x4x4xf32, #tpu.memory_space<vmem>>) attributes {dimension_semantics = [#tpu.dimension_semantics<parallel>], iteration_bounds = array<i64: 64>, scalar_prefetch = 0 : i64, scratch_operands = 1 : i64, tpu.core_type = #tpu.core_type<tc>, window_params = [{transform_indices = @transform_0, window_bounds = array<i64: 1, 8, 8, 8>}, {pipeline_mode = #tpu.pipeline_mode<synchronous>, transform_indices = @transform_1, window_bounds = array<i64: 8, 4>}, {pipeline_mode = #tpu.pipeline_mode<synchronous>, transform_indices = @transform_2, window_bounds = array<i64: 4, 8>}, {transform_indices = @transform_3, window_bounds = array<i64: 1, 4, 4, 4>}]} {
    %c0 = arith.constant 0 : index
    %c0_0 = arith.constant 0 : index
    %c0_1 = arith.constant 0 : index
    %c0_2 = arith.constant 0 : index
    %0 = vector.load %arg1[%c0, %c0_0, %c0_1, %c0_2] : memref<1x8x8x8xf32, #tpu.memory_space<vmem>>, vector<1x1x8x8xf32>
    %1 = vector.shape_cast %0 : vector<1x1x8x8xf32> to vector<8x8xf32>
    %c0_3 = arith.constant 0 : index
    %c0_4 = arith.constant 0 : index
    %2 = vector.load %arg2[%c0_3, %c0_4] : memref<8x4xf32, #tpu.memory_space<vmem>>, vector<8x4xf32>
    %cst = arith.constant dense<0.000000e+00> : vector<8x4xf32>
    %3 = tpu.matmul %1, %2, %cst {dimension_numbers = #tpu.dot_dimension_numbers<[1], [0], [0], [1], [0, 0, 1, 1], [], []>} : vector<8x8xf32>, vector<8x4xf32>, vector<8x4xf32> -> vector<8x4xf32>
    %c0_5 = arith.constant 0 : index
    %c0_6 = arith.constant 0 : index
    %4 = vector.load %arg3[%c0_5, %c0_6] : memref<4x8xf32, #tpu.memory_space<vmem>>, vector<4x8xf32>
    %cst_7 = arith.constant dense<0.000000e+00> : vector<4x4xf32>
    %5 = tpu.matmul %4, %3, %cst_7 {dimension_numbers = #tpu.dot_dimension_numbers<[1], [0], [0], [1], [0, 0, 1, 1], [], []>} : vector<4x8xf32>, vector<8x4xf32>, vector<4x4xf32> -> vector<4x4xf32>
    %c0_8 = arith.constant 0 : index
    %c0_9 = arith.constant 0 : index
    %c0_10 = arith.constant 0 : index
    %6 = vector.load %arg5[%c0_8, %c0_9, %c0_10] : memref<8x4x4xf32, #tpu.memory_space<vmem>>, vector<1x4x4xf32>
    %7 = vector.shape_cast %6 : vector<1x4x4xf32> to vector<4x4xf32>
    %8 = vector.shape_cast %5 : vector<4x4xf32> to vector<1x4x4xf32>
    tpu.vector_store %arg5[%c0_8, %c0_9, %c0_10], %8 {strides = array<i32>} : memref<8x4x4xf32, #tpu.memory_space<vmem>>, vector<1x4x4xf32>,
    %c0_11 = arith.constant 0 : index
    %c1 = arith.constant 1 : index
    %c0_12 = arith.constant 0 : index
    %c0_13 = arith.constant 0 : index
    %9 = vector.load %arg1[%c0_11, %c1, %c0_12, %c0_13] : memref<1x8x8x8xf32, #tpu.memory_space<vmem>>, vector<1x1x8x8xf32>
    %10 = vector.shape_cast %9 : vector<1x1x8x8xf32> to vector<8x8xf32>
    %c0_14 = arith.constant 0 : index
    %c0_15 = arith.constant 0 : index
    %11 = vector.load %arg2[%c0_14, %c0_15] : memref<8x4xf32, #tpu.memory_space<vmem>>, vector<8x4xf32>
    %cst_16 = arith.constant dense<0.000000e+00> : vector<8x4xf32>
    %12 = tpu.matmul %10, %11, %cst_16 {dimension_numbers = #tpu.dot_dimension_numbers<[1], [0], [0], [1], [0, 0, 1, 1], [], []>} : vector<8x8xf32>, vector<8x4xf32>, vector<8x4xf32> -> vector<8x4xf32>
    %c0_17 = arith.constant 0 : index
    %c0_18 = arith.constant 0 : index
    %13 = vector.load %arg3[%c0_17, %c0_18] : memref<4x8xf32, #tpu.memory_space<vmem>>, vector<4x8xf32>
    %cst_19 = arith.constant dense<0.000000e+00> : vector<4x4xf32>
    %14 = tpu.matmul %13, %12, %cst_19 {dimension_numbers = #tpu.dot_dimension_numbers<[1], [0], [0], [1], [0, 0, 1, 1], [], []>} : vector<4x8xf32>, vector<8x4xf32>, vector<4x4xf32> -> vector<4x4xf32>
    %c1_20 = arith.constant 1 : index
    %c0_21 = arith.constant 0 : index
    %c0_22 = arith.constant 0 : index
    %15 = vector.load %arg5[%c1_20, %c0_21, %c0_22] : memref<8x4x4xf32, #tpu.memory_space<vmem>>, vector<1x4x4xf32>
    %16 = vector.shape_cast %15 : vector<1x4x4xf32> to vector<4x4xf32>
    %17 = vector.shape_cast %14 : vector<4x4xf32> to vector<1x4x4xf32>
    tpu.vector_store %arg5[%c1_20, %c0_21, %c0_22], %17 {strides = array<i32>} : memref<8x4x4xf32, #tpu.memory_space<vmem>>, vector<1x4x4xf32>,
    %c0_23 = arith.constant 0 : index
    %c2 = arith.constant 2 : index
    %c0_24 = arith.constant 0 : index
    %c0_25 = arith.constant 0 : index
    %18 = vector.load %arg1[%c0_23, %c2, %c0_24, %c0_25] : memref<1x8x8x8xf32, #tpu.memory_space<vmem>>, vector<1x1x8x8xf32>
    %19 = vector.shape_cast %18 : vector<1x1x8x8xf32> to vector<8x8xf32>
    %c0_26 = arith.constant 0 : index
    %c0_27 = arith.constant 0 : index
    %20 = vector.load %arg2[%c0_26, %c0_27] : memref<8x4xf32, #tpu.memory_space<vmem>>, vector<8x4xf32>
    %cst_28 = arith.constant dense<0.000000e+00> : vector<8x4xf32>
    %21 = tpu.matmul %19, %20, %cst_28 {dimension_numbers = #tpu.dot_dimension_numbers<[1], [0], [0], [1], [0, 0, 1, 1], [], []>} : vector<8x8xf32>, vector<8x4xf32>, vector<8x4xf32> -> vector<8x4xf32>
    %c0_29 = arith.constant 0 : index
    %c0_30 = arith.constant 0 : index
    %22 = vector.load %arg3[%c0_29, %c0_30] : memref<4x8xf32, #tpu.memory_space<vmem>>, vector<4x8xf32>
    %cst_31 = arith.constant dense<0.000000e+00> : vector<4x4xf32>
    %23 = tpu.matmul %22, %21, %cst_31 {dimension_numbers = #tpu.dot_dimension_numbers<[1], [0], [0], [1], [0, 0, 1, 1], [], []>} : vector<4x8xf32>, vector<8x4xf32>, vector<4x4xf32> -> vector<4x4xf32>
    %c2_32 = arith.constant 2 : index
    %c0_33 = arith.constant 0 : index
    %c0_34 = arith.constant 0 : index
    %24 = vector.load %arg5[%c2_32, %c0_33, %c0_34] : memref<8x4x4xf32, #tpu.memory_space<vmem>>, vector<1x4x4xf32>
    %25 = vector.shape_cast %24 : vector<1x4x4xf32> to vector<4x4xf32>
    %26 = vector.shape_cast %23 : vector<4x4xf32> to vector<1x4x4xf32>
    tpu.vector_store %arg5[%c2_32, %c0_33, %c0_34], %26 {strides = array<i32>} : memref<8x4x4xf32, #tpu.memory_space<vmem>>, vector<1x4x4xf32>,
    %c0_35 = arith.constant 0 : index
    %c3 = arith.constant 3 : index
    %c0_36 = arith.constant 0 : index
    %c0_37 = arith.constant 0 : index
    %27 = vector.load %arg1[%c0_35, %c3, %c0_36, %c0_37] : memref<1x8x8x8xf32, #tpu.memory_space<vmem>>, vector<1x1x8x8xf32>
    %28 = vector.shape_cast %27 : vector<1x1x8x8xf32> to vector<8x8xf32>
    %c0_38 = arith.constant 0 : index
    %c0_39 = arith.constant 0 : index
    %29 = vector.load %arg2[%c0_38, %c0_39] : memref<8x4xf32, #tpu.memory_space<vmem>>, vector<8x4xf32>
    %cst_40 = arith.constant dense<0.000000e+00> : vector<8x4xf32>
    %30 = tpu.matmul %28, %29, %cst_40 {dimension_numbers = #tpu.dot_dimension_numbers<[1], [0], [0], [1], [0, 0, 1, 1], [], []>} : vector<8x8xf32>, vector<8x4xf32>, vector<8x4xf32> -> vector<8x4xf32>
    %c0_41 = arith.constant 0 : index
    %c0_42 = arith.constant 0 : index
    %31 = vector.load %arg3[%c0_41, %c0_42] : memref<4x8xf32, #tpu.memory_space<vmem>>, vector<4x8xf32>
    %cst_43 = arith.constant dense<0.000000e+00> : vector<4x4xf32>
    %32 = tpu.matmul %31, %30, %cst_43 {dimension_numbers = #tpu.dot_dimension_numbers<[1], [0], [0], [1], [0, 0, 1, 1], [], []>} : vector<4x8xf32>, vector<8x4xf32>, vector<4x4xf32> -> vector<4x4xf32>
    %c3_44 = arith.constant 3 : index
    %c0_45 = arith.constant 0 : index
    %c0_46 = arith.constant 0 : index
    %33 = vector.load %arg5[%c3_44, %c0_45, %c0_46] : memref<8x4x4xf32, #tpu.memory_space<vmem>>, vector<1x4x4xf32>
    %34 = vector.shape_cast %33 : vector<1x4x4xf32> to vector<4x4xf32>
    %35 = vector.shape_cast %32 : vector<4x4xf32> to vector<1x4x4xf32>
    tpu.vector_store %arg5[%c3_44, %c0_45, %c0_46], %35 {strides = array<i32>} : memref<8x4x4xf32, #tpu.memory_space<vmem>>, vector<1x4x4xf32>,
    %c0_47 = arith.constant 0 : index
    %c4 = arith.constant 4 : index
    %c0_48 = arith.constant 0 : index
    %c0_49 = arith.constant 0 : index
    %36 = vector.load %arg1[%c0_47, %c4, %c0_48, %c0_49] : memref<1x8x8x8xf32, #tpu.memory_space<vmem>>, vector<1x1x8x8xf32>
    %37 = vector.shape_cast %36 : vector<1x1x8x8xf32> to vector<8x8xf32>
    %c0_50 = arith.constant 0 : index
    %c0_51 = arith.constant 0 : index
    %38 = vector.load %arg2[%c0_50, %c0_51] : memref<8x4xf32, #tpu.memory_space<vmem>>, vector<8x4xf32>
    %cst_52 = arith.constant dense<0.000000e+00> : vector<8x4xf32>
    %39 = tpu.matmul %37, %38, %cst_52 {dimension_numbers = #tpu.dot_dimension_numbers<[1], [0], [0], [1], [0, 0, 1, 1], [], []>} : vector<8x8xf32>, vector<8x4xf32>, vector<8x4xf32> -> vector<8x4xf32>
    %c0_53 = arith.constant 0 : index
    %c0_54 = arith.constant 0 : index
    %40 = vector.load %arg3[%c0_53, %c0_54] : memref<4x8xf32, #tpu.memory_space<vmem>>, vector<4x8xf32>
    %cst_55 = arith.constant dense<0.000000e+00> : vector<4x4xf32>
    %41 = tpu.matmul %40, %39, %cst_55 {dimension_numbers = #tpu.dot_dimension_numbers<[1], [0], [0], [1], [0, 0, 1, 1], [], []>} : vector<4x8xf32>, vector<8x4xf32>, vector<4x4xf32> -> vector<4x4xf32>
    %c4_56 = arith.constant 4 : index
    %c0_57 = arith.constant 0 : index
    %c0_58 = arith.constant 0 : index
    %42 = vector.load %arg5[%c4_56, %c0_57, %c0_58] : memref<8x4x4xf32, #tpu.memory_space<vmem>>, vector<1x4x4xf32>
    %43 = vector.shape_cast %42 : vector<1x4x4xf32> to vector<4x4xf32>
    %44 = vector.shape_cast %41 : vector<4x4xf32> to vector<1x4x4xf32>
    tpu.vector_store %arg5[%c4_56, %c0_57, %c0_58], %44 {strides = array<i32>} : memref<8x4x4xf32, #tpu.memory_space<vmem>>, vector<1x4x4xf32>,
    %c0_59 = arith.constant 0 : index
    %c5 = arith.constant 5 : index
    %c0_60 = arith.constant 0 : index
    %c0_61 = arith.constant 0 : index
    %45 = vector.load %arg1[%c0_59, %c5, %c0_60, %c0_61] : memref<1x8x8x8xf32, #tpu.memory_space<vmem>>, vector<1x1x8x8xf32>
    %46 = vector.shape_cast %45 : vector<1x1x8x8xf32> to vector<8x8xf32>
    %c0_62 = arith.constant 0 : index
    %c0_63 = arith.constant 0 : index
    %47 = vector.load %arg2[%c0_62, %c0_63] : memref<8x4xf32, #tpu.memory_space<vmem>>, vector<8x4xf32>
    %cst_64 = arith.constant dense<0.000000e+00> : vector<8x4xf32>
    %48 = tpu.matmul %46, %47, %cst_64 {dimension_numbers = #tpu.dot_dimension_numbers<[1], [0], [0], [1], [0, 0, 1, 1], [], []>} : vector<8x8xf32>, vector<8x4xf32>, vector<8x4xf32> -> vector<8x4xf32>
    %c0_65 = arith.constant 0 : index
    %c0_66 = arith.constant 0 : index
    %49 = vector.load %arg3[%c0_65, %c0_66] : memref<4x8xf32, #tpu.memory_space<vmem>>, vector<4x8xf32>
    %cst_67 = arith.constant dense<0.000000e+00> : vector<4x4xf32>
    %50 = tpu.matmul %49, %48, %cst_67 {dimension_numbers = #tpu.dot_dimension_numbers<[1], [0], [0], [1], [0, 0, 1, 1], [], []>} : vector<4x8xf32>, vector<8x4xf32>, vector<4x4xf32> -> vector<4x4xf32>
    %c5_68 = arith.constant 5 : index
    %c0_69 = arith.constant 0 : index
    %c0_70 = arith.constant 0 : index
    %51 = vector.load %arg5[%c5_68, %c0_69, %c0_70] : memref<8x4x4xf32, #tpu.memory_space<vmem>>, vector<1x4x4xf32>
    %52 = vector.shape_cast %51 : vector<1x4x4xf32> to vector<4x4xf32>
    %53 = vector.shape_cast %50 : vector<4x4xf32> to vector<1x4x4xf32>
    tpu.vector_store %arg5[%c5_68, %c0_69, %c0_70], %53 {strides = array<i32>} : memref<8x4x4xf32, #tpu.memory_space<vmem>>, vector<1x4x4xf32>,
    %c0_71 = arith.constant 0 : index
    %c6 = arith.constant 6 : index
    %c0_72 = arith.constant 0 : index
    %c0_73 = arith.constant 0 : index
    %54 = vector.load %arg1[%c0_71, %c6, %c0_72, %c0_73] : memref<1x8x8x8xf32, #tpu.memory_space<vmem>>, vector<1x1x8x8xf32>
    %55 = vector.shape_cast %54 : vector<1x1x8x8xf32> to vector<8x8xf32>
    %c0_74 = arith.constant 0 : index
    %c0_75 = arith.constant 0 : index
    %56 = vector.load %arg2[%c0_74, %c0_75] : memref<8x4xf32, #tpu.memory_space<vmem>>, vector<8x4xf32>
    %cst_76 = arith.constant dense<0.000000e+00> : vector<8x4xf32>
    %57 = tpu.matmul %55, %56, %cst_76 {dimension_numbers = #tpu.dot_dimension_numbers<[1], [0], [0], [1], [0, 0, 1, 1], [], []>} : vector<8x8xf32>, vector<8x4xf32>, vector<8x4xf32> -> vector<8x4xf32>
    %c0_77 = arith.constant 0 : index
    %c0_78 = arith.constant 0 : index
    %58 = vector.load %arg3[%c0_77, %c0_78] : memref<4x8xf32, #tpu.memory_space<vmem>>, vector<4x8xf32>
    %cst_79 = arith.constant dense<0.000000e+00> : vector<4x4xf32>
    %59 = tpu.matmul %58, %57, %cst_79 {dimension_numbers = #tpu.dot_dimension_numbers<[1], [0], [0], [1], [0, 0, 1, 1], [], []>} : vector<4x8xf32>, vector<8x4xf32>, vector<4x4xf32> -> vector<4x4xf32>
    %c6_80 = arith.constant 6 : index
    %c0_81 = arith.constant 0 : index
    %c0_82 = arith.constant 0 : index
    %60 = vector.load %arg5[%c6_80, %c0_81, %c0_82] : memref<8x4x4xf32, #tpu.memory_space<vmem>>, vector<1x4x4xf32>
    %61 = vector.shape_cast %60 : vector<1x4x4xf32> to vector<4x4xf32>
    %62 = vector.shape_cast %59 : vector<4x4xf32> to vector<1x4x4xf32>
    tpu.vector_store %arg5[%c6_80, %c0_81, %c0_82], %62 {strides = array<i32>} : memref<8x4x4xf32, #tpu.memory_space<vmem>>, vector<1x4x4xf32>,
    %c0_83 = arith.constant 0 : index
    %c7 = arith.constant 7 : index
    %c0_84 = arith.constant 0 : index
    %c0_85 = arith.constant 0 : index
    %63 = vector.load %arg1[%c0_83, %c7, %c0_84, %c0_85] : memref<1x8x8x8xf32, #tpu.memory_space<vmem>>, vector<1x1x8x8xf32>
    %64 = vector.shape_cast %63 : vector<1x1x8x8xf32> to vector<8x8xf32>
    %c0_86 = arith.constant 0 : index
    %c0_87 = arith.constant 0 : index
    %65 = vector.load %arg2[%c0_86, %c0_87] : memref<8x4xf32, #tpu.memory_space<vmem>>, vector<8x4xf32>
    %cst_88 = arith.constant dense<0.000000e+00> : vector<8x4xf32>
    %66 = tpu.matmul %64, %65, %cst_88 {dimension_numbers = #tpu.dot_dimension_numbers<[1], [0], [0], [1], [0, 0, 1, 1], [], []>} : vector<8x8xf32>, vector<8x4xf32>, vector<8x4xf32> -> vector<8x4xf32>
    %c0_89 = arith.constant 0 : index
    %c0_90 = arith.constant 0 : index
    %67 = vector.load %arg3[%c0_89, %c0_90] : memref<4x8xf32, #tpu.memory_space<vmem>>, vector<4x8xf32>
    %cst_91 = arith.constant dense<0.000000e+00> : vector<4x4xf32>
    %68 = tpu.matmul %67, %66, %cst_91 {dimension_numbers = #tpu.dot_dimension_numbers<[1], [0], [0], [1], [0, 0, 1, 1], [], []>} : vector<4x8xf32>, vector<8x4xf32>, vector<4x4xf32> -> vector<4x4xf32>
    %c7_92 = arith.constant 7 : index
    %c0_93 = arith.constant 0 : index
    %c0_94 = arith.constant 0 : index
    %69 = vector.load %arg5[%c7_92, %c0_93, %c0_94] : memref<8x4x4xf32, #tpu.memory_space<vmem>>, vector<1x4x4xf32>
    %70 = vector.shape_cast %69 : vector<1x4x4xf32> to vector<4x4xf32>
    %71 = vector.shape_cast %68 : vector<4x4xf32> to vector<1x4x4xf32>
    tpu.vector_store %arg5[%c7_92, %c0_93, %c0_94], %71 {strides = array<i32>} : memref<8x4x4xf32, #tpu.memory_space<vmem>>, vector<1x4x4xf32>,
    %c0_95 = arith.constant 0 : index
    %c0_96 = arith.constant 0 : index
    %c0_97 = arith.constant 0 : index
    %72 = vector.load %arg5[%c0_95, %c0_96, %c0_97] : memref<8x4x4xf32, #tpu.memory_space<vmem>>, vector<1x4x4xf32>
    %73 = vector.shape_cast %72 : vector<1x4x4xf32> to vector<4x4xf32>
    %c1_98 = arith.constant 1 : index
    %c0_99 = arith.constant 0 : index
    %c0_100 = arith.constant 0 : index
    %74 = vector.load %arg5[%c1_98, %c0_99, %c0_100] : memref<8x4x4xf32, #tpu.memory_space<vmem>>, vector<1x4x4xf32>
    %75 = vector.shape_cast %74 : vector<1x4x4xf32> to vector<4x4xf32>
    %76 = arith.addf %73, %75 : vector<4x4xf32>
    %cst_101 = arith.constant 0.0370370373 : f32
    %77 = vector.broadcast %cst_101 : f32 to vector<4x4xf32>
    %78 = arith.mulf %76, %77 : vector<4x4xf32>
    %79 = arith.truncf %78 : vector<4x4xf32> to vector<4x4xbf16>
    %c0_102 = arith.constant 0 : index
    %c0_103 = arith.constant 0 : index
    %c0_104 = arith.constant 0 : index
    %c0_105 = arith.constant 0 : index
    %80 = vector.load %arg4[%c0_102, %c0_103, %c0_104, %c0_105] : memref<1x4x4x4xbf16, #tpu.memory_space<vmem>>, vector<1x1x4x4xbf16>
    %81 = vector.shape_cast %80 : vector<1x1x4x4xbf16> to vector<4x4xbf16>
    %82 = vector.shape_cast %79 : vector<4x4xbf16> to vector<1x1x4x4xbf16>
    tpu.vector_store %arg4[%c0_102, %c0_103, %c0_104, %c0_105], %82 {strides = array<i32>} : memref<1x4x4x4xbf16, #tpu.memory_space<vmem>>, vector<1x1x4x4xbf16>,
    %c2_106 = arith.constant 2 : index
    %c0_107 = arith.constant 0 : index
    %c0_108 = arith.constant 0 : index
    %83 = vector.load %arg5[%c2_106, %c0_107, %c0_108] : memref<8x4x4xf32, #tpu.memory_space<vmem>>, vector<1x4x4xf32>
    %84 = vector.shape_cast %83 : vector<1x4x4xf32> to vector<4x4xf32>
    %c3_109 = arith.constant 3 : index
    %c0_110 = arith.constant 0 : index
    %c0_111 = arith.constant 0 : index
    %85 = vector.load %arg5[%c3_109, %c0_110, %c0_111] : memref<8x4x4xf32, #tpu.memory_space<vmem>>, vector<1x4x4xf32>
    %86 = vector.shape_cast %85 : vector<1x4x4xf32> to vector<4x4xf32>
    %87 = arith.addf %84, %86 : vector<4x4xf32>
    %c1_112 = arith.constant 1 : index
    %c0_113 = arith.constant 0 : index
    %c0_114 = arith.constant 0 : index
    %88 = vector.load %arg5[%c1_112, %c0_113, %c0_114] : memref<8x4x4xf32, #tpu.memory_space<vmem>>, vector<1x4x4xf32>
    %89 = vector.shape_cast %88 : vector<1x4x4xf32> to vector<4x4xf32>
    %90 = arith.addf %87, %89 : vector<4x4xf32>
    %cst_115 = arith.constant 0.0370370373 : f32
    %91 = vector.broadcast %cst_115 : f32 to vector<4x4xf32>
    %92 = arith.mulf %90, %91 : vector<4x4xf32>
    %93 = arith.truncf %92 : vector<4x4xf32> to vector<4x4xbf16>
    %c0_116 = arith.constant 0 : index
    %c1_117 = arith.constant 1 : index
    %c0_118 = arith.constant 0 : index
    %c0_119 = arith.constant 0 : index
    %94 = vector.load %arg4[%c0_116, %c1_117, %c0_118, %c0_119] : memref<1x4x4x4xbf16, #tpu.memory_space<vmem>>, vector<1x1x4x4xbf16>
    %95 = vector.shape_cast %94 : vector<1x1x4x4xbf16> to vector<4x4xbf16>
    %96 = vector.shape_cast %93 : vector<4x4xbf16> to vector<1x1x4x4xbf16>
    tpu.vector_store %arg4[%c0_116, %c1_117, %c0_118, %c0_119], %96 {strides = array<i32>} : memref<1x4x4x4xbf16, #tpu.memory_space<vmem>>, vector<1x1x4x4xbf16>,
    %c4_120 = arith.constant 4 : index
    %c0_121 = arith.constant 0 : index
    %c0_122 = arith.constant 0 : index
    %97 = vector.load %arg5[%c4_120, %c0_121, %c0_122] : memref<8x4x4xf32, #tpu.memory_space<vmem>>, vector<1x4x4xf32>
    %98 = vector.shape_cast %97 : vector<1x4x4xf32> to vector<4x4xf32>
    %c5_123 = arith.constant 5 : index
    %c0_124 = arith.constant 0 : index
    %c0_125 = arith.constant 0 : index
    %99 = vector.load %arg5[%c5_123, %c0_124, %c0_125] : memref<8x4x4xf32, #tpu.memory_space<vmem>>, vector<1x4x4xf32>
    %100 = vector.shape_cast %99 : vector<1x4x4xf32> to vector<4x4xf32>
    %101 = arith.addf %98, %100 : vector<4x4xf32>
    %c3_126 = arith.constant 3 : index
    %c0_127 = arith.constant 0 : index
    %c0_128 = arith.constant 0 : index
    %102 = vector.load %arg5[%c3_126, %c0_127, %c0_128] : memref<8x4x4xf32, #tpu.memory_space<vmem>>, vector<1x4x4xf32>
    %103 = vector.shape_cast %102 : vector<1x4x4xf32> to vector<4x4xf32>
    %104 = arith.addf %101, %103 : vector<4x4xf32>
    %cst_129 = arith.constant 0.0370370373 : f32
    %105 = vector.broadcast %cst_129 : f32 to vector<4x4xf32>
    %106 = arith.mulf %104, %105 : vector<4x4xf32>
    %107 = arith.truncf %106 : vector<4x4xf32> to vector<4x4xbf16>
    %c0_130 = arith.constant 0 : index
    %c2_131 = arith.constant 2 : index
    %c0_132 = arith.constant 0 : index
    %c0_133 = arith.constant 0 : index
    %108 = vector.load %arg4[%c0_130, %c2_131, %c0_132, %c0_133] : memref<1x4x4x4xbf16, #tpu.memory_space<vmem>>, vector<1x1x4x4xbf16>
    %109 = vector.shape_cast %108 : vector<1x1x4x4xbf16> to vector<4x4xbf16>
    %110 = vector.shape_cast %107 : vector<4x4xbf16> to vector<1x1x4x4xbf16>
    tpu.vector_store %arg4[%c0_130, %c2_131, %c0_132, %c0_133], %110 {strides = array<i32>} : memref<1x4x4x4xbf16, #tpu.memory_space<vmem>>, vector<1x1x4x4xbf16>,
    %c6_134 = arith.constant 6 : index
    %c0_135 = arith.constant 0 : index
    %c0_136 = arith.constant 0 : index
    %111 = vector.load %arg5[%c6_134, %c0_135, %c0_136] : memref<8x4x4xf32, #tpu.memory_space<vmem>>, vector<1x4x4xf32>
    %112 = vector.shape_cast %111 : vector<1x4x4xf32> to vector<4x4xf32>
    %c7_137 = arith.constant 7 : index
    %c0_138 = arith.constant 0 : index
    %c0_139 = arith.constant 0 : index
    %113 = vector.load %arg5[%c7_137, %c0_138, %c0_139] : memref<8x4x4xf32, #tpu.memory_space<vmem>>, vector<1x4x4xf32>
    %114 = vector.shape_cast %113 : vector<1x4x4xf32> to vector<4x4xf32>
    %115 = arith.addf %112, %114 : vector<4x4xf32>
    %c5_140 = arith.constant 5 : index
    %c0_141 = arith.constant 0 : index
    %c0_142 = arith.constant 0 : index
    %116 = vector.load %arg5[%c5_140, %c0_141, %c0_142] : memref<8x4x4xf32, #tpu.memory_space<vmem>>, vector<1x4x4xf32>
    %117 = vector.shape_cast %116 : vector<1x4x4xf32> to vector<4x4xf32>
    %118 = arith.addf %115, %117 : vector<4x4xf32>
    %cst_143 = arith.constant 0.0370370373 : f32
    %119 = vector.broadcast %cst_143 : f32 to vector<4x4xf32>
    %120 = arith.mulf %118, %119 : vector<4x4xf32>
    %121 = arith.truncf %120 : vector<4x4xf32> to vector<4x4xbf16>
    %c0_144 = arith.constant 0 : index
    %c3_145 = arith.constant 3 : index
    %c0_146 = arith.constant 0 : index
    %c0_147 = arith.constant 0 : index
    %122 = vector.load %arg4[%c0_144, %c3_145, %c0_146, %c0_147] : memref<1x4x4x4xbf16, #tpu.memory_space<vmem>>, vector<1x1x4x4xbf16>
    %123 = vector.shape_cast %122 : vector<1x1x4x4xbf16> to vector<4x4xbf16>
    %124 = vector.shape_cast %121 : vector<4x4xbf16> to vector<1x1x4x4xbf16>
    tpu.vector_store %arg4[%c0_144, %c3_145, %c0_146, %c0_147], %124 {strides = array<i32>} : memref<1x4x4x4xbf16, #tpu.memory_space<vmem>>, vector<1x1x4x4xbf16>,
    return
  }
  func.func @transform_0(%arg0: i32) -> (i32, i32, i32, i32) {
    %c0_i32 = arith.constant 0 : i32
    %c0_i32_0 = arith.constant 0 : i32
    %c0_i32_1 = arith.constant 0 : i32
    %c0_i32_2 = arith.constant 0 : i32
    return %arg0, %c0_i32, %c0_i32_0, %c0_i32_1 : i32, i32, i32, i32
  }
  func.func @transform_1(%arg0: i32) -> (i32, i32) {
    %c0_i32 = arith.constant 0 : i32
    %c0_i32_0 = arith.constant 0 : i32
    %c0_i32_1 = arith.constant 0 : i32
    return %c0_i32, %c0_i32_0 : i32, i32
  }
  func.func @transform_2(%arg0: i32) -> (i32, i32) {
    %c0_i32 = arith.constant 0 : i32
    %c0_i32_0 = arith.constant 0 : i32
    %c0_i32_1 = arith.constant 0 : i32
    return %c0_i32, %c0_i32_0 : i32, i32
  }
  func.func @transform_3(%arg0: i32) -> (i32, i32, i32, i32) {
    %c0_i32 = arith.constant 0 : i32
    %c0_i32_0 = arith.constant 0 : i32
    %c0_i32_1 = arith.constant 0 : i32
    %c0_i32_2 = arith.constant 0 : i32
    return %arg0, %c0_i32, %c0_i32_0, %c0_i32_1 : i32, i32, i32, i32
  }
}

module attributes {stable_mosaic.version = 11 : i64} {
  func.func @_deconv_kernel(%arg0: i32, %arg1: i32, %arg2: memref<1x1x32x25xbf16, #tpu.memory_space<vmem>>, %arg3: memref<1x1x32x25xbf16, #tpu.memory_space<vmem>>, %arg4: memref<256x256xbf16, #tpu.memory_space<vmem>>, %arg5: memref<256x1xf32, #tpu.memory_space<vmem>>, %arg6: memref<1x1x256x19xf32, #tpu.memory_space<vmem>>) attributes {dimension_semantics = [#tpu.dimension_semantics<parallel>, #tpu.dimension_semantics<parallel>], iteration_bounds = array<i64: 2, 4>, scalar_prefetch = 0 : i64, scratch_operands = 0 : i64, tpu.core_type = #tpu.core_type<tc>, window_params = [{transform_indices = @transform_0, window_bounds = array<i64: 1, 1, 32, 25>}, {transform_indices = @transform_1, window_bounds = array<i64: 1, 1, 32, 25>}, {pipeline_mode = #tpu.pipeline_mode<synchronous>, transform_indices = @transform_2, window_bounds = array<i64: 256, 256>}, {pipeline_mode = #tpu.pipeline_mode<synchronous>, transform_indices = @transform_3, window_bounds = array<i64: 256, 1>}, {transform_indices = @transform_4, window_bounds = array<i64: 1, 1, 256, 19>}]} {
    %c0 = arith.constant 0 : index
    %c0_0 = arith.constant 0 : index
    %c0_1 = arith.constant 0 : index
    %c0_2 = arith.constant 0 : index
    %0 = vector.load %arg2[%c0, %c0_0, %c0_1, %c0_2] : memref<1x1x32x25xbf16, #tpu.memory_space<vmem>>, vector<1x1x32x25xbf16>
    %1 = vector.shape_cast %0 : vector<1x1x32x25xbf16> to vector<32x25xbf16>
    %c0_3 = arith.constant 0 : index
    %c0_4 = arith.constant 0 : index
    %c0_5 = arith.constant 0 : index
    %c0_6 = arith.constant 0 : index
    %2 = vector.load %arg3[%c0_3, %c0_4, %c0_5, %c0_6] : memref<1x1x32x25xbf16, #tpu.memory_space<vmem>>, vector<1x1x32x25xbf16>
    %3 = vector.shape_cast %2 : vector<1x1x32x25xbf16> to vector<32x25xbf16>
    %4 = tpu.concatenate %1, %3 in 0 : vector<32x25xbf16>, vector<32x25xbf16> -> vector<64x25xbf16>
    %5 = vector.extract_strided_slice %4 {offsets = [0, 0], sizes = [64, 19], strides = [1, 1]} : vector<64x25xbf16> to vector<64x19xbf16>
    %6 = vector.extract_strided_slice %4 {offsets = [0, 1], sizes = [64, 19], strides = [1, 1]} : vector<64x25xbf16> to vector<64x19xbf16>
    %7 = vector.extract_strided_slice %4 {offsets = [0, 5], sizes = [64, 19], strides = [1, 1]} : vector<64x25xbf16> to vector<64x19xbf16>
    %8 = vector.extract_strided_slice %4 {offsets = [0, 6], sizes = [64, 19], strides = [1, 1]} : vector<64x25xbf16> to vector<64x19xbf16>
    %9 = tpu.concatenate %5, %6, %7, %8 in 0 : vector<64x19xbf16>, vector<64x19xbf16>, vector<64x19xbf16>, vector<64x19xbf16> -> vector<256x19xbf16>
    %c0_7 = arith.constant 0 : index
    %c0_8 = arith.constant 0 : index
    %10 = vector.load %arg4[%c0_7, %c0_8] : memref<256x256xbf16, #tpu.memory_space<vmem>>, vector<256x256xbf16>
    %cst = arith.constant dense<0.000000e+00> : vector<256x19xf32>
    %11 = tpu.matmul %10, %9, %cst {dimension_numbers = #tpu.dot_dimension_numbers<[1], [0], [0], [1], [0, 0, 1, 1], [], []>} : vector<256x256xbf16>, vector<256x19xbf16>, vector<256x19xf32> -> vector<256x19xf32>
    %c0_9 = arith.constant 0 : index
    %c0_10 = arith.constant 0 : index
    %12 = vector.load %arg5[%c0_9, %c0_10] : memref<256x1xf32, #tpu.memory_space<vmem>>, vector<256x1xf32>
    %13 = vector.broadcast %12 : vector<256x1xf32> to vector<256x19xf32>
    %14 = arith.addf %11, %13 : vector<256x19xf32>
    %c0_11 = arith.constant 0 : index
    %c0_12 = arith.constant 0 : index
    %c0_13 = arith.constant 0 : index
    %c0_14 = arith.constant 0 : index
    %15 = vector.load %arg6[%c0_11, %c0_12, %c0_13, %c0_14] : memref<1x1x256x19xf32, #tpu.memory_space<vmem>>, vector<1x1x256x19xf32>
    %16 = vector.shape_cast %15 : vector<1x1x256x19xf32> to vector<256x19xf32>
    %17 = vector.shape_cast %14 : vector<256x19xf32> to vector<1x1x256x19xf32>
    tpu.vector_store %arg6[%c0_11, %c0_12, %c0_13, %c0_14], %17 {strides = array<i32>} : memref<1x1x256x19xf32, #tpu.memory_space<vmem>>, vector<1x1x256x19xf32>,
    return
  }
  func.func @transform_0(%arg0: i32, %arg1: i32) -> (i32, i32, i32, i32) {
    %c0_i32 = arith.constant 0 : i32
    %c0_i32_0 = arith.constant 0 : i32
    %c0_i32_1 = arith.constant 0 : i32
    return %arg0, %arg1, %c0_i32, %c0_i32_0 : i32, i32, i32, i32
  }
  func.func @transform_1(%arg0: i32, %arg1: i32) -> (i32, i32, i32, i32) {
    %c1_i32 = arith.constant 1 : i32
    %0 = arith.addi %arg1, %c1_i32 : i32
    %c0_i32 = arith.constant 0 : i32
    %c0_i32_0 = arith.constant 0 : i32
    %c0_i32_1 = arith.constant 0 : i32
    return %arg0, %0, %c0_i32, %c0_i32_0 : i32, i32, i32, i32
  }
  func.func @transform_2(%arg0: i32, %arg1: i32) -> (i32, i32) {
    %c0_i32 = arith.constant 0 : i32
    %c0_i32_0 = arith.constant 0 : i32
    %c0_i32_1 = arith.constant 0 : i32
    return %c0_i32, %c0_i32_0 : i32, i32
  }
  func.func @transform_3(%arg0: i32, %arg1: i32) -> (i32, i32) {
    %c0_i32 = arith.constant 0 : i32
    %c0_i32_0 = arith.constant 0 : i32
    %c0_i32_1 = arith.constant 0 : i32
    return %c0_i32, %c0_i32_0 : i32, i32
  }
  func.func @transform_4(%arg0: i32, %arg1: i32) -> (i32, i32, i32, i32) {
    %c0_i32 = arith.constant 0 : i32
    %c0_i32_0 = arith.constant 0 : i32
    %c0_i32_1 = arith.constant 0 : i32
    return %arg0, %arg1, %c0_i32, %c0_i32_0 : i32, i32, i32, i32
  }
}

</mosaic_0001>

<bundles_post_ra>
// kernel: high_enhancer.2
= control target key start
LH: loop header
LB: loop body
LE: loop exit
PB: predicated region body
PF: predicated region fallthrough
CT: control target
= control target key end

     0   :  { %s751_s12 = smov 0   ;;  %s833_s0 = inlined_call_operand.vmem [shape: f32[64,8,8,8], index: 0, kind: input, shape index: {}]   ;;  %s834_s1 = inlined_call_operand.vmem [shape: f32[8,4], index: 1, kind: input, shape index: {}]   ;;  %s835_s2 = inlined_call_operand.vmem [shape: f32[4,8], index: 2, kind: input, shape index: {}]   ;;  %s836_s3 = inlined_call_operand.vmem [shape: bf16[64,4,4,4], index: 3, kind: output, shape index: {}]  }
   0x1 LB: > { %s676_s13 = sadd.s32 4294967295, %s729_s12   ;;  %p680_p0 = scmp.ge.s32.totalorder %s729_s12, 1  ;;  %s729_s12 = sphi %s751_s12, %s13_s12  }
   0x2   : > { %p137_p1 = scmp.lt.s32.totalorder %s729_s12, 65 }
   0x4   : > { %p138_p2 = pnand %p680_p0, %p137_p1 }
   0x5   : > { %p161_p3 = scmp.lt.s32.totalorder (!%p138_p2), %s676_s13, 63 }
   0x6   : > { %141 = sbr.rel (%p138_p2) target bundleno = 322 (0x142), region = 32 }
   0xb   : > { %v225_v0 = vld [vmem:[%s834_s1] sm:$0xff]  ;;  %s838_s13 = smov (!%p161_p3, %s676_s13), 63  ;;  %vm173_vm0 = vcmask 64512   ;;  %vm221_vm1 = vcmask 27648   ;;  %vm592_vm2 = vcmask 25600  }
   0xc   : > { %244 = vmatpush.msra.mxu2 %v225_v0  ;;  %192 = vmatpush.msra.mxu0 %v225_v0  ;;  %s713_s16 = sshll.u32 %s838_s13, 6  ;;  %v197_v9 = vld [vmem:[%s835_s2] sm:$0xf]  ;;  %s714_s9 = sshll.u32 %s838_s13, 3 }
   0xd   : > { %s165_s19 = scalar_lea.vmem %s833_s0, %s713_s16  ;;  %v249_v11 = vld [vmem:[%s835_s2] sm:$0xf]  ;;  %s817_s14 = scalar_lea.vmem %s836_s3, %s714_s9 }
   0xe   : > { %348 = vmatpush.msrb.mxu2 %v225_v0  ;;  %296 = vmatpush.msrb.mxu0 %v225_v0  ;;  %v687_v1 = vld [vmem:[%s165_s19 + $0x8] sm:$0xff]  ;;  %v171_v2 = vld [vmem:[%s165_s19] sm:$0xff]  ;;  %v693_v3 = vld [vmem:[%s165_s19 + $0x18] sm:$0xff] }
   0xf   : > { %688 = vmatmul.msk.f32.vlgmr.msra.gmra.mxu2 %vm173_vm0, %v687_v1  ;;  %685 = vmatmul.msk.f32.vlgmr.msra.gmra.mxu0 %vm173_vm0, %v171_v2  ;;  %v690_v4 = vld [vmem:[%s165_s19 + $0x10] sm:$0xff]  ;;  %v699_v5 = vld [vmem:[%s165_s19 + $0x28] sm:$0xff]  ;;  %v696_v6 = vld [vmem:[%s165_s19 + $0x20] sm:$0xff] }
  0x10   : > { %452 = vmatpush.msra.mxu2 %v225_v0  ;;  %400 = vmatpush.msra.mxu0 %v225_v0  ;;  %v705_v7 = vld [vmem:[%s165_s19 + $0x38] sm:$0xff]  ;;  %v702_v8 = vld [vmem:[%s165_s19 + $0x30] sm:$0xff]  ;;  %v301_v13 = vld [vmem:[%s835_s2] sm:$0xf] }
  0x11   : > { %v353_v15 = vld [vmem:[%s835_s2] sm:$0xf] }
  0x12   : > { %v405_v17 = vld [vmem:[%s835_s2] sm:$0xf] }
  0x13   : > { %v457_v19 = vld [vmem:[%s835_s2] sm:$0xf] }
  0x14   : > { %v509_v21 = vld [vmem:[%s835_s2] sm:$0xf] }
  0x15   : > { %v561_v23 = vld [vmem:[%s835_s2] sm:$0xf] }
  0x17   : > { %694 = vmatmul.msk.f32.vlgmr.msrb.gmra.mxu2 %vm173_vm0, %v693_v3  ;;  %691 = vmatmul.msk.f32.vlgmr.msrb.gmra.mxu0 %vm173_vm0, %v690_v4 }
  0x18   : > { %556 = vmatpush.msrb.mxu2 %v225_v0  ;;  %504 = vmatpush.msrb.mxu0 %v225_v0 }
  0x1f   : > { %700 = vmatmul.msk.f32.vlgmr.msra.gmra.mxu2 %vm173_vm0, %v699_v5  ;;  %697 = vmatmul.msk.f32.vlgmr.msra.gmra.mxu0 %vm173_vm0, %v696_v6 }
  0x27   : > { %706 = vmatmul.msk.f32.vlgmr.msrb.gmra.mxu2 %vm173_vm0, %v705_v7  ;;  %703 = vmatmul.msk.f32.vlgmr.msrb.gmra.mxu0 %vm173_vm0, %v702_v8 }
  0x8c   : > { %v194_v10 = vpop.f32.mrf.mxu0 }
  0x8d   : > { %216 = vmatpush.msra.mxu1 %v194_v10 }
  0x8e   : > { %686 = vmatmul.msk.f32.vlgmr.msra.gmra.mxu1 %vm173_vm0, %v197_v9 }
  0x92   : > { %v246_v12 = vpop.f32.mrf.mxu2 }
  0x93   : > { %268 = vmatpush.msra.mxu3 %v246_v12 }
  0x94   : > { %689 = vmatmul.msk.f32.vlgmr.msra.gmra.mxu3 %vm173_vm0, %v249_v11  ;;  %v298_v14 = vpop.f32.mrf.mxu0 }
  0x95   : > { %320 = vmatpush.msrb.mxu1 %v298_v14 }
  0x96   : > { %692 = vmatmul.msk.f32.vlgmr.msrb.gmra.mxu1 %vm173_vm0, %v301_v13 }
  0x9a   : > { %v350_v16 = vpop.f32.mrf.mxu2 }
  0x9b   : > { %372 = vmatpush.msrb.mxu3 %v350_v16 }
  0x9c   : > { %695 = vmatmul.msk.f32.vlgmr.msrb.gmra.mxu3 %vm173_vm0, %v353_v15  ;;  %v402_v18 = vpop.f32.mrf.mxu0 }
  0x9d   : > { %424 = vmatpush.msra.mxu1 %v402_v18 }
  0x9e   : > { %698 = vmatmul.msk.f32.vlgmr.msra.gmra.mxu1 %vm173_vm0, %v405_v17 }
  0xa2   : > { %v454_v20 = vpop.f32.mrf.mxu2 }
  0xa3   : > { %476 = vmatpush.msra.mxu3 %v454_v20 }
  0xa4   : > { %701 = vmatmul.msk.f32.vlgmr.msra.gmra.mxu3 %vm173_vm0, %v457_v19  ;;  %v506_v22 = vpop.f32.mrf.mxu0 }
  0xa5   : > { %528 = vmatpush.msrb.mxu1 %v506_v22 }
  0xa6   : > { %704 = vmatmul.msk.f32.vlgmr.msrb.gmra.mxu1 %vm173_vm0, %v509_v21 }
  0xaa   : > { %v558_v24 = vpop.f32.mrf.mxu2 }
  0xab   : > { %580 = vmatpush.msrb.mxu3 %v558_v24 }
  0xac   : > { %707 = vmatmul.msk.f32.vlgmr.msrb.gmra.mxu3 %vm173_vm0, %v561_v23 }
 0x10b   : > { %v218_v25 = vpop.f32.mrf.mxu1 }
 0x10c   : > { %222 = vst.msk [vmem:[#allocation2] sm:$0xf] %vm221_vm1, %v218_v25 }
 0x113   : > { %v322_v26 = vpop.f32.mrf.mxu1  ;;  %v587_v29 = vld [vmem:[#allocation2] sm:$0xf] }
 0x114   : > { %326 = vst.msk [vmem:[#allocation2 + $0x8] sm:$0xf] %vm221_vm1, %v322_v26 }
 0x117   : > { %v270_v27 = vpop.f32.mrf.mxu3 }
 0x118   : > { %274 = vst.msk [vmem:[#allocation2 + $0x4] sm:$0xf] %vm221_vm1, %v270_v27 }
 0x11b   : > { %v426_v28 = vpop.f32.mrf.mxu1  ;;  %v594_v36 = vld [vmem:[#allocation2 + $0x8] sm:$0xf] }
 0x11c   : > { %430 = vst.msk [vmem:[#allocation2 + $0x10] sm:$0xf] %vm221_vm1, %v426_v28 }
 0x11f   : > { %v588_v30 = vld [vmem:[#allocation2 + $0x4] sm:$0xf]  ;;  %v374_v31 = vpop.f32.mrf.mxu3 }
 0x120   : > { %v589_v32 = vadd.f32 %v588_v30, %v587_v29  ;;  %378 = vst.msk [vmem:[#allocation2 + $0xc] sm:$0xf] %vm221_vm1, %v374_v31  ;;  %v597_v40 = vld [vmem:[#allocation2 + $0x4] sm:$0xf] }
 0x122   : > { %v590_v33 = vmul.f32 0.037037037, %v589_v32 }
 0x123   : > { %v530_v34 = vpop.f32.mrf.mxu1  ;;  %v603_v43 = vld [vmem:[#allocation2 + $0x10] sm:$0xf] }
 0x124   : > { %v591_v35 = vpack.c.bf16 %v590_v33, %v590_v33  ;;  %534 = vst.msk [vmem:[#allocation2 + $0x18] sm:$0xf] %vm221_vm1, %v530_v34 }
 0x126   : > { %593 = vst.msk [vmem:[%s817_s14] sm:$0x3] %vm592_vm2, %v591_v35 }
 0x127   : > { %v595_v37 = vld [vmem:[#allocation2 + $0xc] sm:$0xf]  ;;  %v478_v38 = vpop.f32.mrf.mxu3 }
 0x128   : > { %v596_v39 = vadd.f32 %v595_v37, %v594_v36  ;;  %482 = vst.msk [vmem:[#allocation2 + $0x14] sm:$0xf] %vm221_vm1, %v478_v38  ;;  %v606_v48 = vld [vmem:[#allocation2 + $0xc] sm:$0xf] }
 0x12a   : > { %v598_v41 = vadd.f32 %v597_v40, %v596_v39 }
 0x12b   : > { %v612_v52 = vld [vmem:[#allocation2 + $0x18] sm:$0xf] }
 0x12c   : > { %v599_v42 = vmul.f32 0.037037037, %v598_v41 }
 0x12e   : > { %v600_v44 = vpack.c.bf16 %v599_v42, %v599_v42 }
 0x12f   : > { %v604_v45 = vld [vmem:[#allocation2 + $0x14] sm:$0xf]  ;;  %v582_v46 = vpop.f32.mrf.mxu3 }
 0x130   : > { %708 = vst.msk [vmem:[%s817_s14 + $0x2] sm:$0x3] %vm592_vm2, %v600_v44  ;;  %v605_v47 = vadd.f32 %v604_v45, %v603_v43  ;;  %v615_v55 = vld [vmem:[#allocation2 + $0x14] sm:$0xf] }
 0x131   : > { %586 = vst.msk [vmem:[#allocation2 + $0x1c] sm:$0xf] %vm221_vm1, %v582_v46 }
 0x132   : > { %v607_v49 = vadd.f32 %v606_v48, %v605_v47 }
 0x134   : > { %v608_v50 = vmul.f32 0.037037037, %v607_v49 }
 0x136   : > { %v609_v51 = vpack.c.bf16 %v608_v50, %v608_v50 }
 0x138   : > { %709 = vst.msk [vmem:[%s817_s14 + $0x4] sm:$0x3] %vm592_vm2, %v609_v51  ;;  %v613_v53 = vld [vmem:[#allocation2 + $0x1c] sm:$0xf] }
 0x139   : > { %v614_v54 = vadd.f32 %v613_v53, %v612_v52 }
 0x13b   : > { %v616_v56 = vadd.f32 %v615_v55, %v614_v54 }
 0x13d   : > { %v617_v57 = vmul.f32 0.037037037, %v616_v56 }
 0x13f   : > { %v618_v58 = vpack.c.bf16 %v617_v57, %v617_v57 }
 0x141   : > { %710 = vst.msk [vmem:[%s817_s14 + $0x6] sm:$0x3] %vm592_vm2, %v618_v58 }
 0x142 PF: > { %s13_s12 = sadd.s32 1, %s729_s12  }
 0x143   : > { %p10_p4 = scmp.ge.s32.totalorder %s13_s12, 66  }
 0x145   :  { %12 = sbr.rel (!%p10_p4) target bundleno = 1 (0x1), region = 79 }

// kernel: tile.8
= control target key start
LH: loop header
LB: loop body
LE: loop exit
PB: predicated region body
PF: predicated region fallthrough
CT: control target
= control target key end

     0   :  { %s22_s0 = inlined_call_operand.vmem [shape: f32[32], index: 0, kind: input, shape index: {}]   ;;  %s23_s1 = inlined_call_operand.vmem [shape: f32[8,32], index: 1, kind: output, shape index: {}]  }
   0x1   :  { %v4_v0 = vld [vmem:[%s22_s0] ss:$0 sm:$0xff] }
   0x2   :  { %5 = vst [vmem:[%s23_s1] sm:$0xff] %v4_v0 }

// kernel: tile.0
= control target key start
LH: loop header
LB: loop body
LE: loop exit
PB: predicated region body
PF: predicated region fallthrough
CT: control target
= control target key end

     0   :  { %s926_s8 = smov 125   ;;  %s927_s9 = smov 123   ;;  %vm3_vm0 = vcmask 7168   ;;  %s2034_s0 = inlined_call_operand.vmem [shape: f32[8,32], index: 0, kind: input, shape index: {}]   ;;  %s2035_s1 = inlined_call_operand.vmem [shape: f32[256,1], index: 1, kind: output, shape index: {}]  }
   0x1   :  { %v969_v0 = vld [vmem:[%s2034_s0] sm:$0xff]   ;;  %s925_s0 = smov 127   ;;  %s928_s10 = smov 126  }
   0x2   :  { %20 = vrot.lane.b32.xlu0 %v969_v0, %s925_s0  ;;  %60 = vrot.lane.b32.xlu1 %v969_v0, %s926_s8  ;;  %s929_s11 = smov 124   ;;  %s930_s12 = smov 122   ;;  %4 = vst.msk [vmem:[%s2035_s1] sm:$0x1] %vm3_vm0, %v969_v0  }
   0x3   :  { %100 = vrot.lane.b32.xlu2 %v969_v0, %s927_s9  ;;  %s931_s13 = smov 121   ;;  %s932_s14 = smov 120   ;;  %639 = vst.msk [vmem:[%s2035_s1 + $0x1f] sm:$0x2] %vm3_vm0, %v969_v0  }
   0x4   :  { %s933_s15 = smov 119   ;;  %s934_s16 = smov 118   ;;  %640 = vst.msk [vmem:[%s2035_s1 + $0x3e] sm:$0x4] %vm3_vm0, %v969_v0  }
   0x5   :  { %s935_s17 = smov 117   ;;  %s936_s18 = smov 116   ;;  %641 = vst.msk [vmem:[%s2035_s1 + $0x5d] sm:$0x8] %vm3_vm0, %v969_v0  }
   0x6   :  { %s937_s19 = smov 115   ;;  %s938_s20 = smov 114   ;;  %642 = vst.msk [vmem:[%s2035_s1 + $0x7c] sm:$0x10] %vm3_vm0, %v969_v0  }
   0x7   :  { %s939_s21 = smov 113   ;;  %s940_s22 = smov 112   ;;  %643 = vst.msk [vmem:[%s2035_s1 + $0x9b] sm:$0x20] %vm3_vm0, %v969_v0  }
   0x8   :  { %s941_s23 = smov 111   ;;  %s942_s24 = smov 110   ;;  %644 = vst.msk [vmem:[%s2035_s1 + $0xba] sm:$0x40] %vm3_vm0, %v969_v0  }
   0x9   :  { %s943_s25 = smov 109   ;;  %s944_s26 = smov 108   ;;  %645 = vst.msk [vmem:[%s2035_s1 + $0xd9] sm:$0x80] %vm3_vm0, %v969_v0  }
   0xa   :  { %40 = vrot.lane.b32.xlu0 %v969_v0, %s928_s10  ;;  %80 = vrot.lane.b32.xlu1 %v969_v0, %s929_s11  ;;  %s945_s29 = smov 107  }
   0xb   :  { %120 = vrot.lane.b32.xlu2 %v969_v0, %s930_s12  ;;  %s946_s12 = smov 106  }
  0x12   :  { %140 = vrot.lane.b32.xlu0 %v969_v0, %s931_s13  ;;  %160 = vrot.lane.b32.xlu1 %v969_v0, %s932_s14  ;;  %s947_s13 = smov 105  }
  0x13   :  { %180 = vrot.lane.b32.xlu2 %v969_v0, %s933_s15 }
  0x1a   :  { %200 = vrot.lane.b32.xlu0 %v969_v0, %s934_s16  ;;  %220 = vrot.lane.b32.xlu1 %v969_v0, %s935_s17  ;;  %s948_s16 = smov 104   ;;  %s949_s17 = smov 103  }
  0x1b   :  { %240 = vrot.lane.b32.xlu2 %v969_v0, %s936_s18  ;;  %s950_s18 = smov 102  }
  0x22   :  { %260 = vrot.lane.b32.xlu0 %v969_v0, %s937_s19  ;;  %280 = vrot.lane.b32.xlu1 %v969_v0, %s938_s20  ;;  %s951_s19 = smov 101   ;;  %s952_s20 = smov 100  }
  0x23   :  { %300 = vrot.lane.b32.xlu2 %v969_v0, %s939_s21  ;;  %s953_s21 = smov 99  }
  0x2a   :  { %320 = vrot.lane.b32.xlu0 %v969_v0, %s940_s22  ;;  %340 = vrot.lane.b32.xlu1 %v969_v0, %s941_s23  ;;  %s954_s22 = smov 98   ;;  %s955_s23 = smov 97  }
  0x2b   :  { %360 = vrot.lane.b32.xlu2 %v969_v0, %s942_s24 }
  0x32   :  { %380 = vrot.lane.b32.xlu0 %v969_v0, %s943_s25  ;;  %400 = vrot.lane.b32.xlu1 %v969_v0, %s944_s26 }
  0x33   :  { %420 = vrot.lane.b32.xlu2 %v969_v0, %s945_s29 }
  0x3a   :  { %440 = vrot.lane.b32.xlu0 %v969_v0, %s946_s12  ;;  %460 = vrot.lane.b32.xlu1 %v969_v0, %s947_s13 }
  0x3b   :  { %480 = vrot.lane.b32.xlu2 %v969_v0, %s948_s16 }
  0x42   :  { %500 = vrot.lane.b32.xlu0 %v969_v0, %s949_s17  ;;  %520 = vrot.lane.b32.xlu1 %v969_v0, %s950_s18 }
  0x43   :  { %540 = vrot.lane.b32.xlu2 %v969_v0, %s951_s19 }
  0x4a   :  { %560 = vrot.lane.b32.xlu0 %v969_v0, %s952_s20  ;;  %580 = vrot.lane.b32.xlu1 %v969_v0, %s953_s21 }
  0x4b   :  { %600 = vrot.lane.b32.xlu2 %v969_v0, %s954_s22 }
  0x52   :  { %620 = vrot.lane.b32.xlu0 %v969_v0, %s955_s23 }
  0x5d   :  { %v101_v1 = vpop.permute.xlu2 %100  }
  0x5e   :  { %678 = vst.msk [vmem:[%s2035_s1 + $0x5] sm:$0x1] %vm3_vm0, %v101_v1  }
  0x5f   :  { %679 = vst.msk [vmem:[%s2035_s1 + $0x24] sm:$0x2] %vm3_vm0, %v101_v1  }
  0x60   :  { %680 = vst.msk [vmem:[%s2035_s1 + $0x43] sm:$0x4] %vm3_vm0, %v101_v1  }
  0x61   :  { %681 = vst.msk [vmem:[%s2035_s1 + $0x62] sm:$0x8] %vm3_vm0, %v101_v1  }
  0x62   :  { %682 = vst.msk [vmem:[%s2035_s1 + $0x81] sm:$0x10] %vm3_vm0, %v101_v1  }
  0x63   :  { %683 = vst.msk [vmem:[%s2035_s1 + $0xa0] sm:$0x20] %vm3_vm0, %v101_v1  }
  0x64   :  { %684 = vst.msk [vmem:[%s2035_s1 + $0xbf] sm:$0x40] %vm3_vm0, %v101_v1  }
  0x65   :  { %685 = vst.msk [vmem:[%s2035_s1 + $0xde] sm:$0x80] %vm3_vm0, %v101_v1   ;;  %v121_v2 = vpop.permute.xlu2 %120  }
  0x66   :  { %686 = vst.msk [vmem:[%s2035_s1 + $0x6] sm:$0x1] %vm3_vm0, %v121_v2  }
  0x67   :  { %687 = vst.msk [vmem:[%s2035_s1 + $0x25] sm:$0x2] %vm3_vm0, %v121_v2  }
  0x68   :  { %688 = vst.msk [vmem:[%s2035_s1 + $0x44] sm:$0x4] %vm3_vm0, %v121_v2  }
  0x69   :  { %689 = vst.msk [vmem:[%s2035_s1 + $0x63] sm:$0x8] %vm3_vm0, %v121_v2  }
  0x6a   :  { %690 = vst.msk [vmem:[%s2035_s1 + $0x82] sm:$0x10] %vm3_vm0, %v121_v2  }
  0x6b   :  { %691 = vst.msk [vmem:[%s2035_s1 + $0xa1] sm:$0x20] %vm3_vm0, %v121_v2  }
  0x6c   :  { %692 = vst.msk [vmem:[%s2035_s1 + $0xc0] sm:$0x40] %vm3_vm0, %v121_v2  }
  0x6d   :  { %693 = vst.msk [vmem:[%s2035_s1 + $0xdf] sm:$0x80] %vm3_vm0, %v121_v2   ;;  %v181_v7 = vpop.permute.xlu2 %180  }
  0x6e   :  { %710 = vst.msk [vmem:[%s2035_s1 + $0x9] sm:$0x1] %vm3_vm0, %v181_v7  }
  0x6f   :  { %711 = vst.msk [vmem:[%s2035_s1 + $0x28] sm:$0x2] %vm3_vm0, %v181_v7  }
  0x70   :  { %712 = vst.msk [vmem:[%s2035_s1 + $0x47] sm:$0x4] %vm3_vm0, %v181_v7  }
  0x71   :  { %713 = vst.msk [vmem:[%s2035_s1 + $0x66] sm:$0x8] %vm3_vm0, %v181_v7  }
  0x72   :  { %714 = vst.msk [vmem:[%s2035_s1 + $0x85] sm:$0x10] %vm3_vm0, %v181_v7  }
  0x73   :  { %715 = vst.msk [vmem:[%s2035_s1 + $0xa4] sm:$0x20] %vm3_vm0, %v181_v7  }
  0x74   :  { %v21_v3 = vpop.permute.xlu0 %20   ;;  %v61_v4 = vpop.permute.xlu1 %60   ;;  %716 = vst.msk [vmem:[%s2035_s1 + $0xc3] sm:$0x40] %vm3_vm0, %v181_v7  }
  0x75   :  { %646 = vst.msk [vmem:[%s2035_s1 + $0x1] sm:$0x1] %vm3_vm0, %v21_v3   ;;  %v241_v11 = vpop.permute.xlu2 %240  }
  0x76   :  { %647 = vst.msk [vmem:[%s2035_s1 + $0x20] sm:$0x2] %vm3_vm0, %v21_v3  }
  0x77   :  { %648 = vst.msk [vmem:[%s2035_s1 + $0x3f] sm:$0x4] %vm3_vm0, %v21_v3  }
  0x78   :  { %649 = vst.msk [vmem:[%s2035_s1 + $0x5e] sm:$0x8] %vm3_vm0, %v21_v3  }
  0x79   :  { %650 = vst.msk [vmem:[%s2035_s1 + $0x7d] sm:$0x10] %vm3_vm0, %v21_v3  }
  0x7a   :  { %651 = vst.msk [vmem:[%s2035_s1 + $0x9c] sm:$0x20] %vm3_vm0, %v21_v3  }
  0x7b   :  { %652 = vst.msk [vmem:[%s2035_s1 + $0xbb] sm:$0x40] %vm3_vm0, %v21_v3  }
  0x7c   :  { %653 = vst.msk [vmem:[%s2035_s1 + $0xda] sm:$0x80] %vm3_vm0, %v21_v3   ;;  %v41_v5 = vpop.permute.xlu0 %40   ;;  %v81_v6 = vpop.permute.xlu1 %80  }
  0x7d   :  { %662 = vst.msk [vmem:[%s2035_s1 + $0x3] sm:$0x1] %vm3_vm0, %v61_v4   ;;  %v301_v14 = vpop.permute.xlu2 %300  }
  0x7e   :  { %663 = vst.msk [vmem:[%s2035_s1 + $0x22] sm:$0x2] %vm3_vm0, %v61_v4  }
  0x7f   :  { %664 = vst.msk [vmem:[%s2035_s1 + $0x41] sm:$0x4] %vm3_vm0, %v61_v4  }
  0x80   :  { %665 = vst.msk [vmem:[%s2035_s1 + $0x60] sm:$0x8] %vm3_vm0, %v61_v4  }
  0x81   :  { %666 = vst.msk [vmem:[%s2035_s1 + $0x7f] sm:$0x10] %vm3_vm0, %v61_v4  }
  0x82   :  { %667 = vst.msk [vmem:[%s2035_s1 + $0x9e] sm:$0x20] %vm3_vm0, %v61_v4  }
  0x83   :  { %668 = vst.msk [vmem:[%s2035_s1 + $0xbd] sm:$0x40] %vm3_vm0, %v61_v4  }
  0x84   :  { %669 = vst.msk [vmem:[%s2035_s1 + $0xdc] sm:$0x80] %vm3_vm0, %v61_v4   ;;  %v141_v8 = vpop.permute.xlu0 %140   ;;  %v161_v9 = vpop.permute.xlu1 %160  }
  0x85   :  { %654 = vst.msk [vmem:[%s2035_s1 + $0x2] sm:$0x1] %vm3_vm0, %v41_v5   ;;  %v361_v17 = vpop.permute.xlu2 %360  }
  0x86   :  { %655 = vst.msk [vmem:[%s2035_s1 + $0x21] sm:$0x2] %vm3_vm0, %v41_v5  }
  0x87   :  { %656 = vst.msk [vmem:[%s2035_s1 + $0x40] sm:$0x4] %vm3_vm0, %v41_v5  }
  0x88   :  { %657 = vst.msk [vmem:[%s2035_s1 + $0x5f] sm:$0x8] %vm3_vm0, %v41_v5  }
  0x89   :  { %658 = vst.msk [vmem:[%s2035_s1 + $0x7e] sm:$0x10] %vm3_vm0, %v41_v5  }
  0x8a   :  { %659 = vst.msk [vmem:[%s2035_s1 + $0x9d] sm:$0x20] %vm3_vm0, %v41_v5  }
  0x8b   :  { %660 = vst.msk [vmem:[%s2035_s1 + $0xbc] sm:$0x40] %vm3_vm0, %v41_v5  }
  0x8c   :  { %661 = vst.msk [vmem:[%s2035_s1 + $0xdb] sm:$0x80] %vm3_vm0, %v41_v5   ;;  %v201_v10 = vpop.permute.xlu0 %200   ;;  %v221_v12 = vpop.permute.xlu1 %220  }
  0x8d   :  { %670 = vst.msk [vmem:[%s2035_s1 + $0x4] sm:$0x1] %vm3_vm0, %v81_v6   ;;  %v421_v20 = vpop.permute.xlu2 %420  }
  0x8e   :  { %671 = vst.msk [vmem:[%s2035_s1 + $0x23] sm:$0x2] %vm3_vm0, %v81_v6  }
  0x8f   :  { %672 = vst.msk [vmem:[%s2035_s1 + $0x42] sm:$0x4] %vm3_vm0, %v81_v6  }
  0x90   :  { %673 = vst.msk [vmem:[%s2035_s1 + $0x61] sm:$0x8] %vm3_vm0, %v81_v6  }
  0x91   :  { %674 = vst.msk [vmem:[%s2035_s1 + $0x80] sm:$0x10] %vm3_vm0, %v81_v6  }
  0x92   :  { %675 = vst.msk [vmem:[%s2035_s1 + $0x9f] sm:$0x20] %vm3_vm0, %v81_v6  }
  0x93   :  { %676 = vst.msk [vmem:[%s2035_s1 + $0xbe] sm:$0x40] %vm3_vm0, %v81_v6  }
  0x94   :  { %677 = vst.msk [vmem:[%s2035_s1 + $0xdd] sm:$0x80] %vm3_vm0, %v81_v6   ;;  %v261_v13 = vpop.permute.xlu0 %260   ;;  %v281_v15 = vpop.permute.xlu1 %280  }
  0x95   :  { %694 = vst.msk [vmem:[%s2035_s1 + $0x7] sm:$0x1] %vm3_vm0, %v141_v8   ;;  %v481_v23 = vpop.permute.xlu2 %480  }
  0x96   :  { %695 = vst.msk [vmem:[%s2035_s1 + $0x26] sm:$0x2] %vm3_vm0, %v141_v8  }
  0x97   :  { %696 = vst.msk [vmem:[%s2035_s1 + $0x45] sm:$0x4] %vm3_vm0, %v141_v8  }
  0x98   :  { %697 = vst.msk [vmem:[%s2035_s1 + $0x64] sm:$0x8] %vm3_vm0, %v141_v8  }
  0x99   :  { %698 = vst.msk [vmem:[%s2035_s1 + $0x83] sm:$0x10] %vm3_vm0, %v141_v8  }
  0x9a   :  { %699 = vst.msk [vmem:[%s2035_s1 + $0xa2] sm:$0x20] %vm3_vm0, %v141_v8  }
  0x9b   :  { %700 = vst.msk [vmem:[%s2035_s1 + $0xc1] sm:$0x40] %vm3_vm0, %v141_v8  }
  0x9c   :  { %701 = vst.msk [vmem:[%s2035_s1 + $0xe0] sm:$0x80] %vm3_vm0, %v141_v8   ;;  %v321_v16 = vpop.permute.xlu0 %320   ;;  %v341_v18 = vpop.permute.xlu1 %340  }
  0x9d   :  { %717 = vst.msk [vmem:[%s2035_s1 + $0xe2] sm:$0x80] %vm3_vm0, %v181_v7   ;;  %v541_v26 = vpop.permute.xlu2 %540  }
  0x9e   :  { %702 = vst.msk [vmem:[%s2035_s1 + $0x8] sm:$0x1] %vm3_vm0, %v161_v9  }
  0x9f   :  { %703 = vst.msk [vmem:[%s2035_s1 + $0x27] sm:$0x2] %vm3_vm0, %v161_v9  }
  0xa0   :  { %704 = vst.msk [vmem:[%s2035_s1 + $0x46] sm:$0x4] %vm3_vm0, %v161_v9  }
  0xa1   :  { %705 = vst.msk [vmem:[%s2035_s1 + $0x65] sm:$0x8] %vm3_vm0, %v161_v9  }
  0xa2   :  { %706 = vst.msk [vmem:[%s2035_s1 + $0x84] sm:$0x10] %vm3_vm0, %v161_v9  }
  0xa3   :  { %707 = vst.msk [vmem:[%s2035_s1 + $0xa3] sm:$0x20] %vm3_vm0, %v161_v9  }
  0xa4   :  { %708 = vst.msk [vmem:[%s2035_s1 + $0xc2] sm:$0x40] %vm3_vm0, %v161_v9   ;;  %v381_v19 = vpop.permute.xlu0 %380   ;;  %v401_v21 = vpop.permute.xlu1 %400  }
  0xa5   :  { %709 = vst.msk [vmem:[%s2035_s1 + $0xe1] sm:$0x80] %vm3_vm0, %v161_v9   ;;  %v601_v29 = vpop.permute.xlu2 %600  }
  0xa6   :  { %718 = vst.msk [vmem:[%s2035_s1 + $0xa] sm:$0x1] %vm3_vm0, %v201_v10  }
  0xa7   :  { %719 = vst.msk [vmem:[%s2035_s1 + $0x29] sm:$0x2] %vm3_vm0, %v201_v10  }
  0xa8   :  { %720 = vst.msk [vmem:[%s2035_s1 + $0x48] sm:$0x4] %vm3_vm0, %v201_v10  }
  0xa9   :  { %721 = vst.msk [vmem:[%s2035_s1 + $0x67] sm:$0x8] %vm3_vm0, %v201_v10  }
  0xaa   :  { %722 = vst.msk [vmem:[%s2035_s1 + $0x86] sm:$0x10] %vm3_vm0, %v201_v10  }
  0xab   :  { %723 = vst.msk [vmem:[%s2035_s1 + $0xa5] sm:$0x20] %vm3_vm0, %v201_v10  }
  0xac   :  { %724 = vst.msk [vmem:[%s2035_s1 + $0xc4] sm:$0x40] %vm3_vm0, %v201_v10   ;;  %v441_v22 = vpop.permute.xlu0 %440   ;;  %v461_v24 = vpop.permute.xlu1 %460  }
  0xad   :  { %725 = vst.msk [vmem:[%s2035_s1 + $0xe3] sm:$0x80] %vm3_vm0, %v201_v10  }
  0xae   :  { %734 = vst.msk [vmem:[%s2035_s1 + $0xc] sm:$0x1] %vm3_vm0, %v241_v11  }
  0xaf   :  { %735 = vst.msk [vmem:[%s2035_s1 + $0x2b] sm:$0x2] %vm3_vm0, %v241_v11  }
  0xb0   :  { %736 = vst.msk [vmem:[%s2035_s1 + $0x4a] sm:$0x4] %vm3_vm0, %v241_v11  }
  0xb1   :  { %737 = vst.msk [vmem:[%s2035_s1 + $0x69] sm:$0x8] %vm3_vm0, %v241_v11  }
  0xb2   :  { %738 = vst.msk [vmem:[%s2035_s1 + $0x88] sm:$0x10] %vm3_vm0, %v241_v11  }
  0xb3   :  { %739 = vst.msk [vmem:[%s2035_s1 + $0xa7] sm:$0x20] %vm3_vm0, %v241_v11  }
  0xb4   :  { %740 = vst.msk [vmem:[%s2035_s1 + $0xc6] sm:$0x40] %vm3_vm0, %v241_v11   ;;  %v501_v25 = vpop.permute.xlu0 %500   ;;  %v521_v27 = vpop.permute.xlu1 %520  }
  0xb5   :  { %741 = vst.msk [vmem:[%s2035_s1 + $0xe5] sm:$0x80] %vm3_vm0, %v241_v11  }
  0xb6   :  { %726 = vst.msk [vmem:[%s2035_s1 + $0xb] sm:$0x1] %vm3_vm0, %v221_v12  }
  0xb7   :  { %727 = vst.msk [vmem:[%s2035_s1 + $0x2a] sm:$0x2] %vm3_vm0, %v221_v12  }
  0xb8   :  { %728 = vst.msk [vmem:[%s2035_s1 + $0x49] sm:$0x4] %vm3_vm0, %v221_v12  }
  0xb9   :  { %729 = vst.msk [vmem:[%s2035_s1 + $0x68] sm:$0x8] %vm3_vm0, %v221_v12  }
  0xba   :  { %730 = vst.msk [vmem:[%s2035_s1 + $0x87] sm:$0x10] %vm3_vm0, %v221_v12  }
  0xbb   :  { %731 = vst.msk [vmem:[%s2035_s1 + $0xa6] sm:$0x20] %vm3_vm0, %v221_v12  }
  0xbc   :  { %732 = vst.msk [vmem:[%s2035_s1 + $0xc5] sm:$0x40] %vm3_vm0, %v221_v12   ;;  %v561_v28 = vpop.permute.xlu0 %560   ;;  %v581_v30 = vpop.permute.xlu1 %580  }
  0xbd   :  { %733 = vst.msk [vmem:[%s2035_s1 + $0xe4] sm:$0x80] %vm3_vm0, %v221_v12  }
  0xbe   :  { %742 = vst.msk [vmem:[%s2035_s1 + $0xd] sm:$0x1] %vm3_vm0, %v261_v13  }
  0xbf   :  { %743 = vst.msk [vmem:[%s2035_s1 + $0x2c] sm:$0x2] %vm3_vm0, %v261_v13  }
  0xc0   :  { %744 = vst.msk [vmem:[%s2035_s1 + $0x4b] sm:$0x4] %vm3_vm0, %v261_v13  }
  0xc1   :  { %745 = vst.msk [vmem:[%s2035_s1 + $0x6a] sm:$0x8] %vm3_vm0, %v261_v13  }
  0xc2   :  { %746 = vst.msk [vmem:[%s2035_s1 + $0x89] sm:$0x10] %vm3_vm0, %v261_v13  }
  0xc3   :  { %747 = vst.msk [vmem:[%s2035_s1 + $0xa8] sm:$0x20] %vm3_vm0, %v261_v13  }
  0xc4   :  { %748 = vst.msk [vmem:[%s2035_s1 + $0xc7] sm:$0x40] %vm3_vm0, %v261_v13   ;;  %v621_v31 = vpop.permute.xlu0 %620  }
  0xc5   :  { %749 = vst.msk [vmem:[%s2035_s1 + $0xe6] sm:$0x80] %vm3_vm0, %v261_v13  }
  0xc6   :  { %758 = vst.msk [vmem:[%s2035_s1 + $0xf] sm:$0x1] %vm3_vm0, %v301_v14  }
  0xc7   :  { %759 = vst.msk [vmem:[%s2035_s1 + $0x2e] sm:$0x2] %vm3_vm0, %v301_v14  }
  0xc8   :  { %760 = vst.msk [vmem:[%s2035_s1 + $0x4d] sm:$0x4] %vm3_vm0, %v301_v14  }
  0xc9   :  { %761 = vst.msk [vmem:[%s2035_s1 + $0x6c] sm:$0x8] %vm3_vm0, %v301_v14  }
  0xca   :  { %762 = vst.msk [vmem:[%s2035_s1 + $0x8b] sm:$0x10] %vm3_vm0, %v301_v14  }
  0xcb   :  { %763 = vst.msk [vmem:[%s2035_s1 + $0xaa] sm:$0x20] %vm3_vm0, %v301_v14  }
  0xcc   :  { %764 = vst.msk [vmem:[%s2035_s1 + $0xc9] sm:$0x40] %vm3_vm0, %v301_v14  }
  0xcd   :  { %765 = vst.msk [vmem:[%s2035_s1 + $0xe8] sm:$0x80] %vm3_vm0, %v301_v14  }
  0xce   :  { %750 = vst.msk [vmem:[%s2035_s1 + $0xe] sm:$0x1] %vm3_vm0, %v281_v15  }
  0xcf   :  { %751 = vst.msk [vmem:[%s2035_s1 + $0x2d] sm:$0x2] %vm3_vm0, %v281_v15  }
  0xd0   :  { %752 = vst.msk [vmem:[%s2035_s1 + $0x4c] sm:$0x4] %vm3_vm0, %v281_v15  }
  0xd1   :  { %753 = vst.msk [vmem:[%s2035_s1 + $0x6b] sm:$0x8] %vm3_vm0, %v281_v15  }
  0xd2   :  { %754 = vst.msk [vmem:[%s2035_s1 + $0x8a] sm:$0x10] %vm3_vm0, %v281_v15  }
  0xd3   :  { %755 = vst.msk [vmem:[%s2035_s1 + $0xa9] sm:$0x20] %vm3_vm0, %v281_v15  }
  0xd4   :  { %756 = vst.msk [vmem:[%s2035_s1 + $0xc8] sm:$0x40] %vm3_vm0, %v281_v15  }
  0xd5   :  { %757 = vst.msk [vmem:[%s2035_s1 + $0xe7] sm:$0x80] %vm3_vm0, %v281_v15  }
  0xd6   :  { %766 = vst.msk [vmem:[%s2035_s1 + $0x10] sm:$0x1] %vm3_vm0, %v321_v16  }
  0xd7   :  { %767 = vst.msk [vmem:[%s2035_s1 + $0x2f] sm:$0x2] %vm3_vm0, %v321_v16  }
  0xd8   :  { %768 = vst.msk [vmem:[%s2035_s1 + $0x4e] sm:$0x4] %vm3_vm0, %v321_v16  }
  0xd9   :  { %769 = vst.msk [vmem:[%s2035_s1 + $0x6d] sm:$0x8] %vm3_vm0, %v321_v16  }
  0xda   :  { %770 = vst.msk [vmem:[%s2035_s1 + $0x8c] sm:$0x10] %vm3_vm0, %v321_v16  }
  0xdb   :  { %771 = vst.msk [vmem:[%s2035_s1 + $0xab] sm:$0x20] %vm3_vm0, %v321_v16  }
  0xdc   :  { %772 = vst.msk [vmem:[%s2035_s1 + $0xca] sm:$0x40] %vm3_vm0, %v321_v16  }
  0xdd   :  { %773 = vst.msk [vmem:[%s2035_s1 + $0xe9] sm:$0x80] %vm3_vm0, %v321_v16  }
  0xde   :  { %782 = vst.msk [vmem:[%s2035_s1 + $0x12] sm:$0x1] %vm3_vm0, %v361_v17  }
  0xdf   :  { %783 = vst.msk [vmem:[%s2035_s1 + $0x31] sm:$0x2] %vm3_vm0, %v361_v17  }
  0xe0   :  { %784 = vst.msk [vmem:[%s2035_s1 + $0x50] sm:$0x4] %vm3_vm0, %v361_v17  }
  0xe1   :  { %785 = vst.msk [vmem:[%s2035_s1 + $0x6f] sm:$0x8] %vm3_vm0, %v361_v17  }
  0xe2   :  { %786 = vst.msk [vmem:[%s2035_s1 + $0x8e] sm:$0x10] %vm3_vm0, %v361_v17  }
  0xe3   :  { %787 = vst.msk [vmem:[%s2035_s1 + $0xad] sm:$0x20] %vm3_vm0, %v361_v17  }
  0xe4   :  { %788 = vst.msk [vmem:[%s2035_s1 + $0xcc] sm:$0x40] %vm3_vm0, %v361_v17  }
  0xe5   :  { %789 = vst.msk [vmem:[%s2035_s1 + $0xeb] sm:$0x80] %vm3_vm0, %v361_v17  }
  0xe6   :  { %774 = vst.msk [vmem:[%s2035_s1 + $0x11] sm:$0x1] %vm3_vm0, %v341_v18  }
  0xe7   :  { %775 = vst.msk [vmem:[%s2035_s1 + $0x30] sm:$0x2] %vm3_vm0, %v341_v18  }
  0xe8   :  { %776 = vst.msk [vmem:[%s2035_s1 + $0x4f] sm:$0x4] %vm3_vm0, %v341_v18  }
  0xe9   :  { %777 = vst.msk [vmem:[%s2035_s1 + $0x6e] sm:$0x8] %vm3_vm0, %v341_v18  }
  0xea   :  { %778 = vst.msk [vmem:[%s2035_s1 + $0x8d] sm:$0x10] %vm3_vm0, %v341_v18  }
  0xeb   :  { %779 = vst.msk [vmem:[%s2035_s1 + $0xac] sm:$0x20] %vm3_vm0, %v341_v18  }
  0xec   :  { %780 = vst.msk [vmem:[%s2035_s1 + $0xcb] sm:$0x40] %vm3_vm0, %v341_v18  }
  0xed   :  { %781 = vst.msk [vmem:[%s2035_s1 + $0xea] sm:$0x80] %vm3_vm0, %v341_v18  }
  0xee   :  { %790 = vst.msk [vmem:[%s2035_s1 + $0x13] sm:$0x1] %vm3_vm0, %v381_v19  }
  0xef   :  { %791 = vst.msk [vmem:[%s2035_s1 + $0x32] sm:$0x2] %vm3_vm0, %v381_v19  }
  0xf0   :  { %792 = vst.msk [vmem:[%s2035_s1 + $0x51] sm:$0x4] %vm3_vm0, %v381_v19  }
  0xf1   :  { %793 = vst.msk [vmem:[%s2035_s1 + $0x70] sm:$0x8] %vm3_vm0, %v381_v19  }
  0xf2   :  { %794 = vst.msk [vmem:[%s2035_s1 + $0x8f] sm:$0x10] %vm3_vm0, %v381_v19  }
  0xf3   :  { %795 = vst.msk [vmem:[%s2035_s1 + $0xae] sm:$0x20] %vm3_vm0, %v381_v19  }
  0xf4   :  { %796 = vst.msk [vmem:[%s2035_s1 + $0xcd] sm:$0x40] %vm3_vm0, %v381_v19  }
  0xf5   :  { %797 = vst.msk [vmem:[%s2035_s1 + $0xec] sm:$0x80] %vm3_vm0, %v381_v19  }
  0xf6   :  { %806 = vst.msk [vmem:[%s2035_s1 + $0x15] sm:$0x1] %vm3_vm0, %v421_v20  }
  0xf7   :  { %807 = vst.msk [vmem:[%s2035_s1 + $0x34] sm:$0x2] %vm3_vm0, %v421_v20  }
  0xf8   :  { %808 = vst.msk [vmem:[%s2035_s1 + $0x53] sm:$0x4] %vm3_vm0, %v421_v20  }
  0xf9   :  { %809 = vst.msk [vmem:[%s2035_s1 + $0x72] sm:$0x8] %vm3_vm0, %v421_v20  }
  0xfa   :  { %810 = vst.msk [vmem:[%s2035_s1 + $0x91] sm:$0x10] %vm3_vm0, %v421_v20  }
  0xfb   :  { %811 = vst.msk [vmem:[%s2035_s1 + $0xb0] sm:$0x20] %vm3_vm0, %v421_v20  }
  0xfc   :  { %812 = vst.msk [vmem:[%s2035_s1 + $0xcf] sm:$0x40] %vm3_vm0, %v421_v20  }
  0xfd   :  { %813 = vst.msk [vmem:[%s2035_s1 + $0xee] sm:$0x80] %vm3_vm0, %v421_v20  }
  0xfe   :  { %798 = vst.msk [vmem:[%s2035_s1 + $0x14] sm:$0x1] %vm3_vm0, %v401_v21  }
  0xff   :  { %799 = vst.msk [vmem:[%s2035_s1 + $0x33] sm:$0x2] %vm3_vm0, %v401_v21  }
 0x100   :  { %800 = vst.msk [vmem:[%s2035_s1 + $0x52] sm:$0x4] %vm3_vm0, %v401_v21  }
 0x101   :  { %801 = vst.msk [vmem:[%s2035_s1 + $0x71] sm:$0x8] %vm3_vm0, %v401_v21  }
 0x102   :  { %802 = vst.msk [vmem:[%s2035_s1 + $0x90] sm:$0x10] %vm3_vm0, %v401_v21  }
 0x103   :  { %803 = vst.msk [vmem:[%s2035_s1 + $0xaf] sm:$0x20] %vm3_vm0, %v401_v21  }
 0x104   :  { %804 = vst.msk [vmem:[%s2035_s1 + $0xce] sm:$0x40] %vm3_vm0, %v401_v21  }
 0x105   :  { %805 = vst.msk [vmem:[%s2035_s1 + $0xed] sm:$0x80] %vm3_vm0, %v401_v21  }
 0x106   :  { %814 = vst.msk [vmem:[%s2035_s1 + $0x16] sm:$0x1] %vm3_vm0, %v441_v22  }
 0x107   :  { %815 = vst.msk [vmem:[%s2035_s1 + $0x35] sm:$0x2] %vm3_vm0, %v441_v22  }
 0x108   :  { %816 = vst.msk [vmem:[%s2035_s1 + $0x54] sm:$0x4] %vm3_vm0, %v441_v22  }
 0x109   :  { %817 = vst.msk [vmem:[%s2035_s1 + $0x73] sm:$0x8] %vm3_vm0, %v441_v22  }
 0x10a   :  { %818 = vst.msk [vmem:[%s2035_s1 + $0x92] sm:$0x10] %vm3_vm0, %v441_v22  }
 0x10b   :  { %819 = vst.msk [vmem:[%s2035_s1 + $0xb1] sm:$0x20] %vm3_vm0, %v441_v22  }
 0x10c   :  { %820 = vst.msk [vmem:[%s2035_s1 + $0xd0] sm:$0x40] %vm3_vm0, %v441_v22  }
 0x10d   :  { %821 = vst.msk [vmem:[%s2035_s1 + $0xef] sm:$0x80] %vm3_vm0, %v441_v22  }
 0x10e   :  { %830 = vst.msk [vmem:[%s2035_s1 + $0x18] sm:$0x1] %vm3_vm0, %v481_v23  }
 0x10f   :  { %831 = vst.msk [vmem:[%s2035_s1 + $0x37] sm:$0x2] %vm3_vm0, %v481_v23  }
 0x110   :  { %832 = vst.msk [vmem:[%s2035_s1 + $0x56] sm:$0x4] %vm3_vm0, %v481_v23  }
 0x111   :  { %833 = vst.msk [vmem:[%s2035_s1 + $0x75] sm:$0x8] %vm3_vm0, %v481_v23  }
 0x112   :  { %834 = vst.msk [vmem:[%s2035_s1 + $0x94] sm:$0x10] %vm3_vm0, %v481_v23  }
 0x113   :  { %835 = vst.msk [vmem:[%s2035_s1 + $0xb3] sm:$0x20] %vm3_vm0, %v481_v23  }
 0x114   :  { %836 = vst.msk [vmem:[%s2035_s1 + $0xd2] sm:$0x40] %vm3_vm0, %v481_v23  }
 0x115   :  { %837 = vst.msk [vmem:[%s2035_s1 + $0xf1] sm:$0x80] %vm3_vm0, %v481_v23  }
 0x116   :  { %822 = vst.msk [vmem:[%s2035_s1 + $0x17] sm:$0x1] %vm3_vm0, %v461_v24  }
 0x117   :  { %823 = vst.msk [vmem:[%s2035_s1 + $0x36] sm:$0x2] %vm3_vm0, %v461_v24  }
 0x118   :  { %824 = vst.msk [vmem:[%s2035_s1 + $0x55] sm:$0x4] %vm3_vm0, %v461_v24  }
 0x119   :  { %825 = vst.msk [vmem:[%s2035_s1 + $0x74] sm:$0x8] %vm3_vm0, %v461_v24  }
 0x11a   :  { %826 = vst.msk [vmem:[%s2035_s1 + $0x93] sm:$0x10] %vm3_vm0, %v461_v24  }
 0x11b   :  { %827 = vst.msk [vmem:[%s2035_s1 + $0xb2] sm:$0x20] %vm3_vm0, %v461_v24  }
 0x11c   :  { %828 = vst.msk [vmem:[%s2035_s1 + $0xd1] sm:$0x40] %vm3_vm0, %v461_v24  }
 0x11d   :  { %829 = vst.msk [vmem:[%s2035_s1 + $0xf0] sm:$0x80] %vm3_vm0, %v461_v24  }
 0x11e   :  { %838 = vst.msk [vmem:[%s2035_s1 + $0x19] sm:$0x1] %vm3_vm0, %v501_v25  }
 0x11f   :  { %839 = vst.msk [vmem:[%s2035_s1 + $0x38] sm:$0x2] %vm3_vm0, %v501_v25  }
 0x120   :  { %840 = vst.msk [vmem:[%s2035_s1 + $0x57] sm:$0x4] %vm3_vm0, %v501_v25  }
 0x121   :  { %841 = vst.msk [vmem:[%s2035_s1 + $0x76] sm:$0x8] %vm3_vm0, %v501_v25  }
 0x122   :  { %842 = vst.msk [vmem:[%s2035_s1 + $0x95] sm:$0x10] %vm3_vm0, %v501_v25  }
 0x123   :  { %843 = vst.msk [vmem:[%s2035_s1 + $0xb4] sm:$0x20] %vm3_vm0, %v501_v25  }
 0x124   :  { %844 = vst.msk [vmem:[%s2035_s1 + $0xd3] sm:$0x40] %vm3_vm0, %v501_v25  }
 0x125   :  { %845 = vst.msk [vmem:[%s2035_s1 + $0xf2] sm:$0x80] %vm3_vm0, %v501_v25  }
 0x126   :  { %854 = vst.msk [vmem:[%s2035_s1 + $0x1b] sm:$0x1] %vm3_vm0, %v541_v26  }
 0x127   :  { %855 = vst.msk [vmem:[%s2035_s1 + $0x3a] sm:$0x2] %vm3_vm0, %v541_v26  }
 0x128   :  { %856 = vst.msk [vmem:[%s2035_s1 + $0x59] sm:$0x4] %vm3_vm0, %v541_v26  }
 0x129   :  { %857 = vst.msk [vmem:[%s2035_s1 + $0x78] sm:$0x8] %vm3_vm0, %v541_v26  }
 0x12a   :  { %858 = vst.msk [vmem:[%s2035_s1 + $0x97] sm:$0x10] %vm3_vm0, %v541_v26  }
 0x12b   :  { %859 = vst.msk [vmem:[%s2035_s1 + $0xb6] sm:$0x20] %vm3_vm0, %v541_v26  }
 0x12c   :  { %860 = vst.msk [vmem:[%s2035_s1 + $0xd5] sm:$0x40] %vm3_vm0, %v541_v26  }
 0x12d   :  { %861 = vst.msk [vmem:[%s2035_s1 + $0xf4] sm:$0x80] %vm3_vm0, %v541_v26  }
 0x12e   :  { %846 = vst.msk [vmem:[%s2035_s1 + $0x1a] sm:$0x1] %vm3_vm0, %v521_v27  }
 0x12f   :  { %847 = vst.msk [vmem:[%s2035_s1 + $0x39] sm:$0x2] %vm3_vm0, %v521_v27  }
 0x130   :  { %848 = vst.msk [vmem:[%s2035_s1 + $0x58] sm:$0x4] %vm3_vm0, %v521_v27  }
 0x131   :  { %849 = vst.msk [vmem:[%s2035_s1 + $0x77] sm:$0x8] %vm3_vm0, %v521_v27  }
 0x132   :  { %850 = vst.msk [vmem:[%s2035_s1 + $0x96] sm:$0x10] %vm3_vm0, %v521_v27  }
 0x133   :  { %851 = vst.msk [vmem:[%s2035_s1 + $0xb5] sm:$0x20] %vm3_vm0, %v521_v27  }
 0x134   :  { %852 = vst.msk [vmem:[%s2035_s1 + $0xd4] sm:$0x40] %vm3_vm0, %v521_v27  }
 0x135   :  { %853 = vst.msk [vmem:[%s2035_s1 + $0xf3] sm:$0x80] %vm3_vm0, %v521_v27  }
 0x136   :  { %862 = vst.msk [vmem:[%s2035_s1 + $0x1c] sm:$0x1] %vm3_vm0, %v561_v28  }
 0x137   :  { %863 = vst.msk [vmem:[%s2035_s1 + $0x3b] sm:$0x2] %vm3_vm0, %v561_v28  }
 0x138   :  { %864 = vst.msk [vmem:[%s2035_s1 + $0x5a] sm:$0x4] %vm3_vm0, %v561_v28  }
 0x139   :  { %865 = vst.msk [vmem:[%s2035_s1 + $0x79] sm:$0x8] %vm3_vm0, %v561_v28  }
 0x13a   :  { %866 = vst.msk [vmem:[%s2035_s1 + $0x98] sm:$0x10] %vm3_vm0, %v561_v28  }
 0x13b   :  { %867 = vst.msk [vmem:[%s2035_s1 + $0xb7] sm:$0x20] %vm3_vm0, %v561_v28  }
 0x13c   :  { %868 = vst.msk [vmem:[%s2035_s1 + $0xd6] sm:$0x40] %vm3_vm0, %v561_v28  }
 0x13d   :  { %869 = vst.msk [vmem:[%s2035_s1 + $0xf5] sm:$0x80] %vm3_vm0, %v561_v28  }
 0x13e   :  { %878 = vst.msk [vmem:[%s2035_s1 + $0x1e] sm:$0x1] %vm3_vm0, %v601_v29  }
 0x13f   :  { %879 = vst.msk [vmem:[%s2035_s1 + $0x3d] sm:$0x2] %vm3_vm0, %v601_v29  }
 0x140   :  { %880 = vst.msk [vmem:[%s2035_s1 + $0x5c] sm:$0x4] %vm3_vm0, %v601_v29  }
 0x141   :  { %881 = vst.msk [vmem:[%s2035_s1 + $0x7b] sm:$0x8] %vm3_vm0, %v601_v29  }
 0x142   :  { %882 = vst.msk [vmem:[%s2035_s1 + $0x9a] sm:$0x10] %vm3_vm0, %v601_v29  }
 0x143   :  { %883 = vst.msk [vmem:[%s2035_s1 + $0xb9] sm:$0x20] %vm3_vm0, %v601_v29  }
 0x144   :  { %884 = vst.msk [vmem:[%s2035_s1 + $0xd8] sm:$0x40] %vm3_vm0, %v601_v29  }
 0x145   :  { %885 = vst.msk [vmem:[%s2035_s1 + $0xf7] sm:$0x80] %vm3_vm0, %v601_v29  }
 0x146   :  { %870 = vst.msk [vmem:[%s2035_s1 + $0x1d] sm:$0x1] %vm3_vm0, %v581_v30  }
 0x147   :  { %871 = vst.msk [vmem:[%s2035_s1 + $0x3c] sm:$0x2] %vm3_vm0, %v581_v30  }
 0x148   :  { %872 = vst.msk [vmem:[%s2035_s1 + $0x5b] sm:$0x4] %vm3_vm0, %v581_v30  }
 0x149   :  { %873 = vst.msk [vmem:[%s2035_s1 + $0x7a] sm:$0x8] %vm3_vm0, %v581_v30  }
 0x14a   :  { %874 = vst.msk [vmem:[%s2035_s1 + $0x99] sm:$0x10] %vm3_vm0, %v581_v30  }
 0x14b   :  { %875 = vst.msk [vmem:[%s2035_s1 + $0xb8] sm:$0x20] %vm3_vm0, %v581_v30  }
 0x14c   :  { %876 = vst.msk [vmem:[%s2035_s1 + $0xd7] sm:$0x40] %vm3_vm0, %v581_v30  }
 0x14d   :  { %877 = vst.msk [vmem:[%s2035_s1 + $0xf6] sm:$0x80] %vm3_vm0, %v581_v30  }
 0x14e   :  { %886 = vst.msk [vmem:[%s2035_s1 + $0x1f] sm:$0x1] %vm3_vm0, %v621_v31  }
 0x14f   :  { %887 = vst.msk [vmem:[%s2035_s1 + $0x3e] sm:$0x2] %vm3_vm0, %v621_v31  }
 0x150   :  { %888 = vst.msk [vmem:[%s2035_s1 + $0x5d] sm:$0x4] %vm3_vm0, %v621_v31  }
 0x151   :  { %889 = vst.msk [vmem:[%s2035_s1 + $0x7c] sm:$0x8] %vm3_vm0, %v621_v31  }
 0x152   :  { %890 = vst.msk [vmem:[%s2035_s1 + $0x9b] sm:$0x10] %vm3_vm0, %v621_v31  }
 0x153   :  { %891 = vst.msk [vmem:[%s2035_s1 + $0xba] sm:$0x20] %vm3_vm0, %v621_v31  }
 0x154   :  { %892 = vst.msk [vmem:[%s2035_s1 + $0xd9] sm:$0x40] %vm3_vm0, %v621_v31  }
 0x155   :  { %893 = vst.msk [vmem:[%s2035_s1 + $0xf8] sm:$0x80] %vm3_vm0, %v621_v31  }

// kernel: high_enhancer.3
= control target key start
LH: loop header
LB: loop body
LE: loop exit
PB: predicated region body
PF: predicated region fallthrough
CT: control target
= control target key end

     0   :  { %s1381_s15 = smov 0   ;;  %s1383_s16 = smov 0   ;;  %s1873_s0 = inlined_call_operand.vmem [shape: bf16[2,5,32,25], index: 0, kind: input, shape index: {}, may-alias: {0,1}]   ;;  %s1874_s1 = inlined_call_operand.vmem [shape: bf16[2,5,32,25], index: 1, kind: input, shape index: {}, may-alias: {0,1}]   ;;  %s1875_s2 = inlined_call_operand.vmem [shape: bf16[256,256], index: 2, kind: input, shape index: {}]   ;;  %s1876_s3 = inlined_call_operand.vmem [shape: f32[256,1], index: 3, kind: input, shape index: {}]   ;;  %s1877_s4 = inlined_call_operand.vmem [shape: f32[2,4,256,19], index: 4, kind: output, shape index: {}]  }
   0x1   :  { %s1385_s17 = smov 0   ;;  %s1387_s18 = smov 0  }
   0x2   :  { %s1389_s19 = smov 0  }
   0x3 LB: > { %s23_s20 = sadd.s32 1, %s1342_s17  ;;  %s26_s21 = sadd.s32 1, %s1346_s18  ;;  %s1350_s19 = sphi %s1389_s19, %s14_s19   ;;  %s1346_s18 = sphi %s1387_s18, %s1881_s18   ;;  %s1342_s17 = sphi %s1385_s17, %s1880_s17   ;;  %s1338_s16 = sphi %s1383_s16, %s1879_s16   ;;  %s1334_s15 = sphi %s1381_s15, %s1878_s15  }
   0x4   : > { %p24_p0 = scmp.ge.s32.totalorder %s23_s20, 4  ;;  %p1058_p1 = scmp.ge.s32.totalorder %s1350_s19, 1 }
   0x5   : > { %p202_p2 = scmp.lt.s32.totalorder %s1350_s19, 9 }
   0x6   : > { %s1883_s20 = smov (%p24_p0, %s23_s20), 0  ;;  %s1885_s21 = smov (!%p24_p0, %s26_s21), %s1346_s18 }
   0x7   : > { %p203_p3 = pnand %p1058_p1, %p202_p2  ;;  %p28_p4 = scmp.ge.s32.totalorder %s1885_s21, 2 }
   0x8   : > { %p246_p5 = scmp.lt.s32.totalorder (!%p203_p3), %s1338_s16, 1  ;;  %s255_s22 = sadd.s32 (!%p203_p3), 1, %s1334_s15 }
   0x9   : > { %s1887_s21 = smov (%p28_p4, %s1885_s21), 0  ;;  %206 = sbr.rel (%p203_p3) target bundleno = 431 (0x1af), region = 36 }
   0xa   : > { %p258_p6 = scmp.lt.s32.totalorder (!%p203_p3), %s255_s22, 4  ;;  %p248_p7 = scmp.lt.s32.totalorder (!%p203_p3), %s1334_s15, 4 }
   0xb   : > { %s1352_s5 = smov (!%p203_p3), 127   ;;  %s1353_s12 = smov (!%p203_p3), 122  }
   0xc   : > { %s1354_s13 = smov (!%p203_p3), 123   ;;  %p268_p8 = scmp.lt.s32.totalorder (!%p203_p3), %s1334_s15, 3 }
   0xe   : > { %s1889_s16 = smov (!%p246_p5, %s1338_s16), 1  ;;  %s1891_s22 = smov (!%p258_p6, %s255_s22), 4  ;;  %v376_v4 = vld [vmem:[%s1876_s3 + $0x8] sm:$0xff]  ;;  %v1355_v5 = vmov 0   ;;  %v375_v6 = vld [vmem:[%s1876_s3] sm:$0xff]  ;;  %v378_v7 = vld [vmem:[%s1876_s3 + $0x18] sm:$0xff] }
   0xf   : > { %s1264_s23 = smul.u32 20, %s1889_s16  ;;  %s1061_s24 = sshll.u32 %s1891_s22, 2  ;;  %1310 = vset.pattern.permute.xlu1 %v1355_v5  ;;  %1309 = vset.pattern.permute.xlu0 %v1355_v5  ;;  %v380_v8 = vld [vmem:[%s1876_s3 + $0x28] sm:$0xff]  ;;  %v381_v9 = vld [vmem:[%s1876_s3 + $0x30] sm:$0xff]  ;;  %v383_v13 = vld [vmem:[%s1876_s3 + $0x40] sm:$0xff]  ;;  %vm905_vm0 = vcmask 154624  }
  0x10   : > { %s249_s30 = scalar_select %p248_p7, %s1334_s15, 4  ;;  %1311 = vset.pattern.permute.xlu2 %v1355_v5  ;;  %v377_v14 = vld [vmem:[%s1876_s3 + $0x10] sm:$0xff]  ;;  %v384_v15 = vld [vmem:[%s1876_s3 + $0x48] sm:$0xff]  ;;  %v386_v18 = vld [vmem:[%s1876_s3 + $0x58] sm:$0xff] }
  0x11   : > { %s262_s25 = sadd.s32 %s1264_s23, %s1061_s24  ;;  %v379_v19 = vld [vmem:[%s1876_s3 + $0x20] sm:$0xff]  ;;  %v389_v24 = vld [vmem:[%s1876_s3 + $0x70] sm:$0xff]  ;;  %v382_v25 = vld [vmem:[%s1876_s3 + $0x38] sm:$0xff]  ;;  %s1893_s15 = smov (!%p268_p8, %s1334_s15), 3 }
  0x12   : > { %s1062_s26 = sshll.u32 %s262_s25, 2  ;;  %s1059_s6 = sshll.u32 %s249_s30, 2  ;;  %v387_v21 = vld [vmem:[%s1876_s3 + $0x60] sm:$0xff]  ;;  %v390_v26 = vld [vmem:[%s1876_s3 + $0x78] sm:$0xff]  ;;  %v1217_v30 = vld [vmem:[%s1875_s2 + $0x4] sm:$0xf0] }
  0x13   : > { %s264_s29 = scalar_lea.vmem %s1874_s1, %s1062_s26  ;;  %s252_s7 = sadd.s32 %s1264_s23, %s1059_s6  ;;  %v1084_v29 = vld [vmem:[%s1875_s2] sm:$0xf]  ;;  %v392_v31 = vld [vmem:[%s1876_s3 + $0x88] sm:$0xff]  ;;  %v385_v32 = vld [vmem:[%s1876_s3 + $0x50] sm:$0xff] }
  0x14   : > { %v1421_v0 = vld [vmem:[%s264_s29 + $0x8] sm:$0xff]  ;;  %v1423_v1 = vld [vmem:[%s264_s29] sm:$0xff]  ;;  %s1060_s8 = sshll.u32 %s252_s7, 2  ;;  %v393_v35 = vld [vmem:[%s1876_s3 + $0x90] sm:$0xff]  ;;  %v1085_v37 = vor.u32 %v1217_v30, %v1084_v29  ;;  %s1063_s23 = sshll.u32 %s1893_s15, 5 }
  0x15   : > { %313 = vrot.lane.b32.xlu0 %v1421_v0, %s1352_s5  ;;  %311 = vrot.lane.b32.xlu1 %v1423_v1, %s1352_s5  ;;  %s254_s11 = scalar_lea.vmem %s1873_s0, %s1060_s8  ;;  %v1148_v33 = vld [vmem:[%s1875_s2 + $0x80] sm:$0xf]  ;;  %v1233_v34 = vld [vmem:[%s1875_s2 + $0x84] sm:$0xf0]  ;;  %s1064_s24 = sshll.u32 %s1889_s16, 7 }
  0x16   : > { %v1431_v2 = vld [vmem:[%s254_s11 + $0x8] sm:$0xff]  ;;  %v1436_v3 = vld [vmem:[%s254_s11] sm:$0xff]  ;;  %v1149_v38 = vor.u32 %v1233_v34, %v1148_v33  ;;  %v1092_v49 = vld [vmem:[%s1875_s2 + $0x10] sm:$0xf]  ;;  %s272_s25 = sadd.s32 %s1064_s24, %s1063_s23 }
  0x17   : > { %309 = vrot.lane.b32.xlu2 %v1431_v2, %s1352_s5  ;;  %v1216_v39 = vld [vmem:[%s1875_s2 + $0x4] sm:$0xf]  ;;  %v1086_v40 = vld [vmem:[%s1875_s2 + $0x8] sm:$0xf0]  ;;  %v1219_v50 = vld [vmem:[%s1875_s2 + $0x14] sm:$0xf0] }
  0x18   : > { %v1232_v41 = vld [vmem:[%s1875_s2 + $0x84] sm:$0xf]  ;;  %v1150_v42 = vld [vmem:[%s1875_s2 + $0x88] sm:$0xf0]  ;;  %v1089_v45 = vor.u32 %v1216_v39, %v1086_v40  ;;  %v1156_v52 = vld [vmem:[%s1875_s2 + $0x90] sm:$0xf]  ;;  %v1093_v55 = vor.u32 %v1219_v50, %v1092_v49 }
  0x19   : > { %v388_v44 = vld [vmem:[%s1876_s3 + $0x68] sm:$0xff]  ;;  %v1153_v46 = vor.u32 %v1232_v41, %v1150_v42  ;;  %v395_v48 = vld [vmem:[%s1876_s3 + $0xa0] sm:$0xff]  ;;  %v1235_v53 = vld [vmem:[%s1875_s2 + $0x94] sm:$0xf0]  ;;  %s1065_s26 = sshll.u32 %s272_s25, 3 }
  0x1a   : > { %v396_v47 = vld [vmem:[%s1876_s3 + $0xa8] sm:$0xff]  ;;  %v391_v51 = vld [vmem:[%s1876_s3 + $0x80] sm:$0xff]  ;;  %v1157_v56 = vor.u32 %v1235_v53, %v1156_v52  ;;  %v1218_v57 = vld [vmem:[%s1875_s2 + $0x14] sm:$0xf]  ;;  %s1775_s29 = scalar_lea.vmem %s1877_s4, %s1065_s26 }
  0x1b   : > { %v399_v54 = vld [vmem:[%s1876_s3 + $0xc0] sm:$0xff]  ;;  %v1094_v58 = vld [vmem:[%s1875_s2 + $0x18] sm:$0xf0]  ;;  %v1234_v59 = vld [vmem:[%s1875_s2 + $0x94] sm:$0xf] }
  0x1c   : > { %v1158_v60 = vld [vmem:[%s1875_s2 + $0x98] sm:$0xf0]  ;;  %v1097_v63 = vor.u32 %v1218_v57, %v1094_v58  ;;  %v397_v5 = vld [vmem:[%s1876_s3 + $0xb0] sm:$0xff]  ;;  %v1116_v33 = vld [vmem:[%s1875_s2 + $0x40] sm:$0xf] }
  0x1d   : > { %337 = vrot.lane.b32.xlu0 %v1421_v0, %s1353_s12  ;;  %335 = vrot.lane.b32.xlu1 %v1423_v1, %s1353_s12  ;;  %v394_v61 = vld [vmem:[%s1876_s3 + $0x98] sm:$0xff]  ;;  %v1225_v34 = vld [vmem:[%s1875_s2 + $0x44] sm:$0xf0] }
  0x1e   : > { %v398_v62 = vld [vmem:[%s1876_s3 + $0xb8] sm:$0xff]  ;;  %v1224_v39 = vld [vmem:[%s1875_s2 + $0x44] sm:$0xf]  ;;  %v1118_v40 = vld [vmem:[%s1875_s2 + $0x48] sm:$0xf0] }
  0x1f   : > { %333 = vrot.lane.b32.xlu2 %v1431_v2, %s1353_s12  ;;  %v1174_v29 = vld [vmem:[%s1875_s2 + $0xb8] sm:$0xf0]  ;;  %v1240_v41 = vld [vmem:[%s1875_s2 + $0xc4] sm:$0xf]  ;;  %v1182_v42 = vld [vmem:[%s1875_s2 + $0xc8] sm:$0xf0] }
  0x20   : > { %v406_v30 = vld [vmem:[%s1876_s3 + $0xf8] sm:$0xff]  ;;  %v1242_v53 = vld [vmem:[%s1875_s2 + $0xd4] sm:$0xf] }
  0x21   : > { %v1126_v52 = vld [vmem:[%s1875_s2 + $0x58] sm:$0xf0] }
  0x25   : > { %307 = vrot.lane.b32.xlu0 %v1436_v3, %s1352_s5  ;;  %331 = vrot.lane.b32.xlu1 %v1436_v3, %s1353_s12 }
  0x27   : > { %325 = vrot.lane.b32.xlu2 %v1421_v0, %s1354_s13 }
  0x2d   : > { %323 = vrot.lane.b32.xlu0 %v1423_v1, %s1354_s13  ;;  %321 = vrot.lane.b32.xlu1 %v1431_v2, %s1354_s13 }
  0x2f   : > { %319 = vrot.lane.b32.xlu2 %v1436_v3, %s1354_s13 }
  0x35   : > { %414 = vperm.xlu1 %1310, %v376_v4   ;;  %409 = vperm.xlu0 %1309, %v375_v6   ;;  %v1221_v4 = vld [vmem:[%s1875_s2 + $0x24] sm:$0xf0]  ;;  %v1164_v6 = vld [vmem:[%s1875_s2 + $0xa0] sm:$0xf] }
  0x37   : > { %419 = vperm.xlu2 %1311, %v377_v14   ;;  %v1166_v14 = vld [vmem:[%s1875_s2 + $0xa8] sm:$0xf0] }
  0x3d   : > { %424 = vperm.xlu1 %1310, %v378_v7   ;;  %434 = vperm.xlu0 %1309, %v380_v8   ;;  %v1237_v7 = vld [vmem:[%s1875_s2 + $0xa4] sm:$0xf0]  ;;  %v405_v8 = vld [vmem:[%s1876_s3 + $0xf0] sm:$0xff] }
  0x3f   : > { %429 = vperm.xlu2 %1311, %v379_v19   ;;  %v1108_v19 = vld [vmem:[%s1875_s2 + $0x30] sm:$0xf] }
  0x45   : > { %439 = vperm.xlu1 %1310, %v381_v9   ;;  %449 = vperm.xlu0 %1309, %v383_v13   ;;  %v1236_v13 = vld [vmem:[%s1875_s2 + $0xa4] sm:$0xf] }
  0x47   : > { %444 = vperm.xlu2 %1311, %v382_v25  }
  0x4d   : > { %454 = vperm.xlu1 %1310, %v384_v15   ;;  %464 = vperm.xlu0 %1309, %v386_v18   ;;  %v400_v15 = vld [vmem:[%s1876_s3 + $0xc8] sm:$0xff]  ;;  %v1169_v18 = vor.u32 %v1236_v13, %v1166_v14  ;;  %v1231_v13 = vld [vmem:[%s1875_s2 + $0x74] sm:$0xf0]  ;;  %v1204_v14 = vld [vmem:[%s1875_s2 + $0xf0] sm:$0xf] }
  0x4f   : > { %459 = vperm.xlu2 %1311, %v385_v32  }
  0x55   : > { %469 = vperm.xlu1 %1310, %v387_v21   ;;  %479 = vperm.xlu0 %1309, %v389_v24   ;;  %v1223_v21 = vld [vmem:[%s1875_s2 + $0x34] sm:$0xf0] }
  0x56   : > { %v1109_v24 = vor.u32 %v1223_v21, %v1108_v19  ;;  %v1142_v21 = vld [vmem:[%s1875_s2 + $0x78] sm:$0xf0] }
  0x57   : > { %474 = vperm.xlu2 %1311, %v388_v44   ;;  %v1185_v44 = vor.u32 %v1240_v41, %v1182_v42 }
  0x5d   : > { %484 = vperm.xlu1 %1310, %v390_v26   ;;  %494 = vperm.xlu0 %1309, %v392_v31   ;;  %v1222_v26 = vld [vmem:[%s1875_s2 + $0x34] sm:$0xf] }
  0x5f   : > { %489 = vperm.xlu2 %1311, %v391_v51   ;;  %v1226_v51 = vld [vmem:[%s1875_s2 + $0x54] sm:$0xf] }
  0x65   : > { %499 = vperm.xlu1 %1310, %v393_v35   ;;  %509 = vperm.xlu0 %1309, %v395_v48   ;;  %v1180_v35 = vld [vmem:[%s1875_s2 + $0xc0] sm:$0xf]  ;;  %v1243_v48 = vld [vmem:[%s1875_s2 + $0xd4] sm:$0xf0] }
  0x67   : > { %504 = vperm.xlu2 %1311, %v394_v61   ;;  %v1196_v61 = vld [vmem:[%s1875_s2 + $0xe0] sm:$0xf] }
  0x6d   : > { %514 = vperm.xlu1 %1310, %v396_v47   ;;  %524 = vperm.xlu0 %1309, %v398_v62   ;;  %v1188_v47 = vld [vmem:[%s1875_s2 + $0xd0] sm:$0xf]  ;;  %v1245_v62 = vld [vmem:[%s1875_s2 + $0xe4] sm:$0xf0] }
  0x6e   : > { %v1189_v50 = vor.u32 %v1243_v48, %v1188_v47 }
  0x6f   : > { %519 = vperm.xlu2 %1311, %v397_v5   ;;  %v1244_v5 = vld [vmem:[%s1875_s2 + $0xe4] sm:$0xf] }
  0x71   : > { %v310_v12 = vpop.permute.xlu2 %309 }
  0x75   : > { %529 = vperm.xlu1 %1310, %v399_v54   ;;  %v1190_v54 = vld [vmem:[%s1875_s2 + $0xd8] sm:$0xf0] }
  0x76   : > { %v1193_v57 = vor.u32 %v1242_v53, %v1190_v54 }
  0x77   : > { %534 = vperm.xlu2 %1311, %v400_v15   ;;  %v1247_v15 = vld [vmem:[%s1875_s2 + $0xf4] sm:$0xf0] }
  0x79   : > { %v334_v20 = vpop.permute.xlu2 %333 }
  0x81   : > { %v326_v27 = vpop.permute.xlu2 %325 }
  0x87   : > { %v314_v10 = vpop.permute.xlu0 %313  ;;  %v312_v11 = vpop.permute.xlu1 %311 }
  0x88   : > { %727 = vmatpush.bf16.msra.mxu0 %v314_v10  ;;  %1248 = vmatpush.bf16.msra.mxu2 %v314_v10  ;;  %v1165_v10 = vor.u32 %v1237_v7, %v1164_v6  ;;  %v1198_v6 = vld [vmem:[%s1875_s2 + $0xe8] sm:$0xf0] }
  0x89   : > { %v320_v43 = vpop.permute.xlu2 %319 }
  0x8c   : > { %728 = vmatpush.bf16.msra.mxu0 %v312_v11  ;;  %1249 = vmatpush.bf16.msra.mxu2 %v312_v11  ;;  %v1220_v11 = vld [vmem:[%s1875_s2 + $0x24] sm:$0xf] }
  0x8f   : > { %v338_v16 = vpop.permute.xlu0 %337  ;;  %v336_v17 = vpop.permute.xlu1 %335 }
  0x90   : > { %729 = vmatpush.bf16.msra.mxu0 %v310_v12  ;;  %1250 = vmatpush.bf16.msra.mxu2 %v310_v12  ;;  %v1102_v12 = vld [vmem:[%s1875_s2 + $0x28] sm:$0xf0] }
  0x91   : > { %816 = vmatpush.bf16.msra.mxu1 %v338_v16  ;;  %1256 = vmatpush.bf16.msra.mxu3 %v338_v16  ;;  %v404_v16 = vld [vmem:[%s1876_s3 + $0xe8] sm:$0xff] }
  0x95   : > { %817 = vmatpush.bf16.msra.mxu1 %v336_v17  ;;  %1257 = vmatpush.bf16.msra.mxu3 %v336_v17  ;;  %v1105_v17 = vor.u32 %v1220_v11, %v1102_v12  ;;  %v1140_v12 = vld [vmem:[%s1875_s2 + $0x70] sm:$0xf] }
  0x97   : > { %v308_v22 = vpop.permute.xlu0 %307  ;;  %v332_v23 = vpop.permute.xlu1 %331 }
  0x98   : > { %730 = vmatpush.bf16.msra.mxu0 %v308_v22  ;;  %1251 = vmatpush.bf16.msra.mxu2 %v308_v22  ;;  %v1172_v22 = vld [vmem:[%s1875_s2 + $0xb0] sm:$0xf] }
  0x99   : > { %818 = vmatpush.bf16.msra.mxu1 %v334_v20  ;;  %1258 = vmatpush.bf16.msra.mxu3 %v334_v20  ;;  %v403_v20 = vld [vmem:[%s1876_s3 + $0xe0] sm:$0xff] }
  0x9a   : > { %549 = vperm.xlu2 %1311, %v403_v20   ;;  %v1230_v20 = vld [vmem:[%s1875_s2 + $0x74] sm:$0xf] }
  0x9c   : > { %731 = vmatpush.bf16.msra.mxu0 %v1421_v0  ;;  %1252 = vmatpush.bf16.msra.mxu2 %v1421_v0  ;;  %v1161_v0 = vor.u32 %v1234_v59, %v1158_v60  ;;  %v1132_v59 = vld [vmem:[%s1875_s2 + $0x60] sm:$0xf]  ;;  %v1229_v60 = vld [vmem:[%s1875_s2 + $0x64] sm:$0xf0] }
  0x9d   : > { %819 = vmatpush.bf16.msra.mxu1 %v332_v23  ;;  %1259 = vmatpush.bf16.msra.mxu3 %v332_v23  ;;  %v1239_v23 = vld [vmem:[%s1875_s2 + $0xb4] sm:$0xf0] }
  0x9e   : > { %v1173_v25 = vor.u32 %v1239_v23, %v1172_v22  ;;  %v1246_v22 = vld [vmem:[%s1875_s2 + $0xf4] sm:$0xf]  ;;  %v1206_v23 = vld [vmem:[%s1875_s2 + $0xf8] sm:$0xf0] }
  0x9f   : > { %v324_v28 = vpop.permute.xlu0 %323  ;;  %v322_v36 = vpop.permute.xlu1 %321 }
  0xa0   : > { %732 = vmatpush.bf16.msra.mxu0 %v1423_v1  ;;  %1253 = vmatpush.bf16.msra.mxu2 %v1423_v1  ;;  %v402_v1 = vld [vmem:[%s1876_s3 + $0xd8] sm:$0xff] }
  0xa1   : > { %820 = vmatpush.bf16.msra.mxu1 %v326_v27  ;;  %1260 = vmatpush.bf16.msra.mxu3 %v326_v27  ;;  %v1110_v27 = vld [vmem:[%s1875_s2 + $0x38] sm:$0xf0] }
  0xa2   : > { %544 = vperm.xlu1 %1310, %v402_v1   ;;  %v1113_v31 = vor.u32 %v1222_v26, %v1110_v27  ;;  %564 = vperm.xlu2 %1311, %v406_v30   ;;  %v1133_v1 = vor.u32 %v1229_v60, %v1132_v59  ;;  %v1209_v26 = vor.u32 %v1246_v22, %v1206_v23 }
  0xa4   : > { %733 = vmatpush.bf16.msra.mxu0 %v1431_v2  ;;  %1254 = vmatpush.bf16.msra.mxu2 %v1431_v2  ;;  %v401_v2 = vld [vmem:[%s1876_s3 + $0xd0] sm:$0xff] }
  0xa5   : > { %821 = vmatpush.bf16.msra.mxu1 %v324_v28  ;;  %1261 = vmatpush.bf16.msra.mxu3 %v324_v28  ;;  %v1238_v28 = vld [vmem:[%s1875_s2 + $0xb4] sm:$0xf] }
  0xa6   : > { %539 = vperm.xlu0 %1309, %v401_v2   ;;  %v1177_v32 = vor.u32 %v1238_v28, %v1174_v29  ;;  %v1197_v2 = vor.u32 %v1245_v62, %v1196_v61 }
  0xa7   : > { %v1695_v58 = vpop.permute.xlu1 %414 }
  0xa8   : > { %734 = vmatpush.bf16.msra.mxu0 %v1436_v3  ;;  %1255 = vmatpush.bf16.msra.mxu2 %v1436_v3  ;;  %v1100_v3 = vld [vmem:[%s1875_s2 + $0x20] sm:$0xf] }
  0xa9   : > { %822 = vmatpush.bf16.msra.mxu1 %v322_v36  ;;  %1262 = vmatpush.bf16.msra.mxu3 %v322_v36  ;;  %v1101_v9 = vor.u32 %v1221_v4, %v1100_v3  ;;  %v1241_v36 = vld [vmem:[%s1875_s2 + $0xc4] sm:$0xf0]  ;;  %v1228_v3 = vld [vmem:[%s1875_s2 + $0x64] sm:$0xf]  ;;  %v1134_v4 = vld [vmem:[%s1875_s2 + $0x68] sm:$0xf0] }
  0xaa   : > { %559 = vperm.xlu1 %1310, %v405_v8   ;;  %v1137_v7 = vor.u32 %v1228_v3, %v1134_v4  ;;  %v1201_v8 = vor.u32 %v1244_v5, %v1198_v6 }
  0xab   : > { %735 = vmatmul.bf16.vlgmr.msra.gmra.mxu0 %v1085_v37  ;;  %775 = vmatmul.bf16.vlgmr.msra.gmra.mxu2 %v1149_v38  ;;  %v1117_v37 = vor.u32 %v1225_v34, %v1116_v33  ;;  %v1181_v38 = vor.u32 %v1241_v36, %v1180_v35 }
  0xad   : > { %823 = vmatpush.bf16.msra.mxu1 %v320_v43  ;;  %1263 = vmatpush.bf16.msra.mxu3 %v320_v43  ;;  %v1121_v43 = vor.u32 %v1224_v39, %v1118_v40 }
  0xae   : > { %554 = vperm.xlu0 %1309, %v404_v16  }
  0xb0   : > { %824 = vmatmul.bf16.vlgmr.msra.gmra.mxu1 %v1089_v45  ;;  %864 = vmatmul.bf16.vlgmr.msra.gmra.mxu3 %v1153_v46  ;;  %v1124_v45 = vld [vmem:[%s1875_s2 + $0x50] sm:$0xf]  ;;  %v1227_v46 = vld [vmem:[%s1875_s2 + $0x54] sm:$0xf0] }
  0xb1   : > { %v1125_v49 = vor.u32 %v1227_v46, %v1124_v45 }
  0xbb   : > { %740 = vmatmul.bf16.gmra.mxu0 %v1093_v55  ;;  %780 = vmatmul.bf16.gmra.mxu2 %v1157_v56  ;;  %v1693_v55 = vpop.permute.xlu2 %419  ;;  %v1129_v56 = vor.u32 %v1226_v51, %v1126_v52 }
  0xc0   : > { %829 = vmatmul.bf16.gmra.mxu1 %v1097_v63  ;;  %869 = vmatmul.bf16.gmra.mxu3 %v1161_v0  ;;  %v410_v63 = vpop.permute.xlu0 %409 }
  0xc3   : > { %v1709_v0 = vpop.permute.xlu2 %429 }
  0xcb   : > { %745 = vmatmul.bf16.gmra.mxu0 %v1101_v9  ;;  %785 = vmatmul.bf16.gmra.mxu2 %v1165_v10  ;;  %v1723_v9 = vpop.permute.xlu1 %424  ;;  %v1725_v10 = vpop.permute.xlu0 %434 }
  0xcc   : > { %v1727_v11 = vpop.permute.xlu2 %444 }
  0xd0   : > { %834 = vmatmul.bf16.gmra.mxu1 %v1105_v17  ;;  %874 = vmatmul.bf16.gmra.mxu3 %v1169_v18  ;;  %v1141_v17 = vor.u32 %v1231_v13, %v1140_v12  ;;  %v1205_v18 = vor.u32 %v1247_v15, %v1204_v14 }
  0xd3   : > { %v1741_v16 = vpop.permute.xlu1 %439  ;;  %v1743_v19 = vpop.permute.xlu0 %449 }
  0xdb   : > { %750 = vmatmul.bf16.gmra.mxu0 %v1109_v24  ;;  %790 = vmatmul.bf16.gmra.mxu2 %v1173_v25  ;;  %v1757_v24 = vpop.permute.xlu2 %459  ;;  %v1145_v25 = vor.u32 %v1230_v20, %v1142_v21  ;;  %v1761_v27 = vpop.permute.xlu1 %454 }
  0xdc   : > { %v1763_v28 = vpop.permute.xlu0 %464 }
  0xe0   : > { %839 = vmatmul.bf16.gmra.mxu1 %v1113_v31  ;;  %879 = vmatmul.bf16.gmra.mxu3 %v1177_v32 }
  0xe3   : > { %v1765_v29 = vpop.permute.xlu2 %474  ;;  %v1768_v32 = vpop.permute.xlu1 %469 }
  0xe4   : > { %v1770_v33 = vpop.permute.xlu0 %479 }
  0xeb   : > { %755 = vmatmul.bf16.gmra.mxu0 %v1117_v37  ;;  %795 = vmatmul.bf16.gmra.mxu2 %v1181_v38  ;;  %v490_v35 = vpop.permute.xlu2 %489 }
  0xec   : > { %v495_v47 = vpop.permute.xlu0 %494 }
  0xf0   : > { %844 = vmatmul.bf16.gmra.mxu1 %v1121_v43  ;;  %884 = vmatmul.bf16.gmra.mxu3 %v1185_v44  ;;  %v1780_v43 = vpop.permute.xlu1 %484 }
  0xf3   : > { %v505_v3 = vpop.permute.xlu2 %504 }
  0xf4   : > { %v510_v13 = vpop.permute.xlu0 %509 }
  0xfb   : > { %760 = vmatmul.bf16.gmra.mxu0 %v1125_v49  ;;  %800 = vmatmul.bf16.gmra.mxu2 %v1189_v50 }
 0x100   : > { %849 = vmatmul.bf16.gmra.mxu1 %v1129_v56  ;;  %889 = vmatmul.bf16.gmra.mxu3 %v1193_v57  ;;  %v500_v57 = vpop.permute.xlu1 %499 }
 0x10b   : > { %765 = vmatmul.bf16.gmra.mxu0 %v1133_v1  ;;  %805 = vmatmul.bf16.gmra.mxu2 %v1197_v2 }
 0x110   : > { %854 = vmatmul.bf16.gmra.mxu1 %v1137_v7  ;;  %894 = vmatmul.bf16.gmra.mxu3 %v1201_v8 }
 0x11b   : > { %770 = vmatmul.bf16.gmra.mxu0 %v1141_v17  ;;  %810 = vmatmul.bf16.gmra.mxu2 %v1205_v18 }
 0x120   : > { %859 = vmatmul.bf16.gmra.mxu1 %v1145_v25  ;;  %899 = vmatmul.bf16.gmra.mxu3 %v1209_v26  ;;  %v515_v25 = vpop.permute.xlu1 %514 }
 0x128   : > { %v736_v30 = vpop.f32.mrf.mxu0 }
 0x129   : > { %v737_v31 = vadd.f32 %v736_v30, %v410_v63 }
 0x12d   : > { %v825_v34 = vpop.f32.mrf.mxu1 }
 0x12e   : > { %v826_v36 = vadd.f32 %v825_v34, %v737_v31  ;;  %v776_v37 = vpop.f32.mrf.mxu2 }
 0x12f   : > { %v777_v38 = vadd.f32 %v776_v37, %v490_v35 }
 0x130   : > { %906 = vst.msk [vmem:[%s1775_s29] sm:$0xff] %vm905_vm0, %v826_v36  ;;  %v738_v39 = vpop.f32.mrf.mxu0 }
 0x131   : > { %v739_v41 = vadd.f32 %v738_v39, %v1695_v58 }
 0x133   : > { %v865_v40 = vpop.f32.mrf.mxu3 }
 0x134   : > { %v866_v42 = vadd.f32 %v865_v40, %v777_v38  ;;  %v520_v38 = vpop.permute.xlu2 %519 }
 0x135   : > { %v827_v44 = vpop.f32.mrf.mxu1 }
 0x136   : > { %922 = vst.msk [vmem:[%s1775_s29 + $0x80] sm:$0xff] %vm905_vm0, %v866_v42  ;;  %v828_v45 = vadd.f32 %v827_v44, %v739_v41  ;;  %v778_v46 = vpop.f32.mrf.mxu2 }
 0x137   : > { %v779_v49 = vadd.f32 %v778_v46, %v495_v47  ;;  %v525_v47 = vpop.permute.xlu0 %524 }
 0x138   : > { %907 = vst.msk [vmem:[%s1775_s29 + $0x8] sm:$0xff] %vm905_vm0, %v828_v45  ;;  %v741_v48 = vpop.f32.mrf.mxu0 }
 0x139   : > { %v742_v50 = vadd.f32 %v741_v48, %v1693_v55 }
 0x13b   : > { %v867_v51 = vpop.f32.mrf.mxu3 }
 0x13c   : > { %v868_v52 = vadd.f32 %v867_v51, %v779_v49 }
 0x13d   : > { %v830_v53 = vpop.f32.mrf.mxu1 }
 0x13e   : > { %923 = vst.msk [vmem:[%s1775_s29 + $0x88] sm:$0xff] %vm905_vm0, %v868_v52  ;;  %v831_v54 = vadd.f32 %v830_v53, %v742_v50  ;;  %v781_v56 = vpop.f32.mrf.mxu2 }
 0x13f   : > { %v782_v58 = vadd.f32 %v781_v56, %v500_v57  ;;  %v530_v56 = vpop.permute.xlu1 %529 }
 0x140   : > { %908 = vst.msk [vmem:[%s1775_s29 + $0x10] sm:$0xff] %vm905_vm0, %v831_v54  ;;  %v743_v59 = vpop.f32.mrf.mxu0 }
 0x141   : > { %v744_v61 = vadd.f32 %v743_v59, %v1723_v9 }
 0x143   : > { %v870_v60 = vpop.f32.mrf.mxu3 }
 0x144   : > { %v871_v62 = vadd.f32 %v870_v60, %v782_v58 }
 0x145   : > { %v832_v63 = vpop.f32.mrf.mxu1 }
 0x146   : > { %924 = vst.msk [vmem:[%s1775_s29 + $0x90] sm:$0xff] %vm905_vm0, %v871_v62  ;;  %v833_v55 = vadd.f32 %v832_v63, %v744_v61  ;;  %v783_v1 = vpop.f32.mrf.mxu2 }
 0x147   : > { %v784_v4 = vadd.f32 %v783_v1, %v505_v3 }
 0x148   : > { %909 = vst.msk [vmem:[%s1775_s29 + $0x18] sm:$0xff] %vm905_vm0, %v833_v55  ;;  %v746_v2 = vpop.f32.mrf.mxu0  ;;  %v535_v55 = vpop.permute.xlu2 %534 }
 0x149   : > { %v747_v5 = vadd.f32 %v746_v2, %v1709_v0 }
 0x14b   : > { %v872_v6 = vpop.f32.mrf.mxu3 }
 0x14c   : > { %v873_v7 = vadd.f32 %v872_v6, %v784_v4 }
 0x14d   : > { %v835_v8 = vpop.f32.mrf.mxu1 }
 0x14e   : > { %925 = vst.msk [vmem:[%s1775_s29 + $0x98] sm:$0xff] %vm905_vm0, %v873_v7  ;;  %v836_v9 = vadd.f32 %v835_v8, %v747_v5  ;;  %v786_v12 = vpop.f32.mrf.mxu2  ;;  %v540_v8 = vpop.permute.xlu0 %539 }
 0x14f   : > { %v787_v14 = vadd.f32 %v786_v12, %v510_v13 }
 0x150   : > { %910 = vst.msk [vmem:[%s1775_s29 + $0x20] sm:$0xff] %vm905_vm0, %v836_v9  ;;  %v748_v15 = vpop.f32.mrf.mxu0 }
 0x151   : > { %v749_v18 = vadd.f32 %v748_v15, %v1725_v10 }
 0x153   : > { %v875_v17 = vpop.f32.mrf.mxu3 }
 0x154   : > { %v876_v20 = vadd.f32 %v875_v17, %v787_v14 }
 0x155   : > { %v837_v0 = vpop.f32.mrf.mxu1 }
 0x156   : > { %926 = vst.msk [vmem:[%s1775_s29 + $0xa0] sm:$0xff] %vm905_vm0, %v876_v20  ;;  %v838_v21 = vadd.f32 %v837_v0, %v749_v18  ;;  %v788_v22 = vpop.f32.mrf.mxu2  ;;  %v545_v20 = vpop.permute.xlu1 %544 }
 0x157   : > { %v789_v26 = vadd.f32 %v788_v22, %v515_v25 }
 0x158   : > { %911 = vst.msk [vmem:[%s1775_s29 + $0x28] sm:$0xff] %vm905_vm0, %v838_v21  ;;  %v751_v23 = vpop.f32.mrf.mxu0 }
 0x159   : > { %v752_v31 = vadd.f32 %v751_v23, %v1741_v16 }
 0x15b   : > { %v877_v30 = vpop.f32.mrf.mxu3 }
 0x15c   : > { %v878_v34 = vadd.f32 %v877_v30, %v789_v26 }
 0x15d   : > { %v840_v35 = vpop.f32.mrf.mxu1 }
 0x15e   : > { %927 = vst.msk [vmem:[%s1775_s29 + $0xa8] sm:$0xff] %vm905_vm0, %v878_v34  ;;  %v841_v10 = vadd.f32 %v840_v35, %v752_v31  ;;  %v791_v36 = vpop.f32.mrf.mxu2  ;;  %v550_v31 = vpop.permute.xlu2 %549 }
 0x15f   : > { %v792_v39 = vadd.f32 %v791_v36, %v520_v38 }
 0x160   : > { %912 = vst.msk [vmem:[%s1775_s29 + $0x30] sm:$0xff] %vm905_vm0, %v841_v10  ;;  %v753_v37 = vpop.f32.mrf.mxu0 }
 0x161   : > { %v754_v41 = vadd.f32 %v753_v37, %v1727_v11 }
 0x163   : > { %v880_v40 = vpop.f32.mrf.mxu3 }
 0x164   : > { %v881_v42 = vadd.f32 %v880_v40, %v792_v39  ;;  %v555_v40 = vpop.permute.xlu0 %554 }
 0x165   : > { %v842_v44 = vpop.f32.mrf.mxu1 }
 0x166   : > { %928 = vst.msk [vmem:[%s1775_s29 + $0xb0] sm:$0xff] %vm905_vm0, %v881_v42  ;;  %v843_v16 = vadd.f32 %v842_v44, %v754_v41  ;;  %v793_v45 = vpop.f32.mrf.mxu2 }
 0x167   : > { %v794_v48 = vadd.f32 %v793_v45, %v525_v47  ;;  %v560_v47 = vpop.permute.xlu1 %559 }
 0x168   : > { %913 = vst.msk [vmem:[%s1775_s29 + $0x38] sm:$0xff] %vm905_vm0, %v843_v16  ;;  %v756_v46 = vpop.f32.mrf.mxu0 }
 0x169   : > { %v757_v50 = vadd.f32 %v756_v46, %v1743_v19 }
 0x16b   : > { %v882_v49 = vpop.f32.mrf.mxu3 }
 0x16c   : > { %v883_v51 = vadd.f32 %v882_v49, %v794_v48 }
 0x16d   : > { %v845_v52 = vpop.f32.mrf.mxu1 }
 0x16e   : > { %929 = vst.msk [vmem:[%s1775_s29 + $0xb8] sm:$0xff] %vm905_vm0, %v883_v51  ;;  %v846_v11 = vadd.f32 %v845_v52, %v757_v50  ;;  %v796_v53 = vpop.f32.mrf.mxu2 }
 0x16f   : > { %v797_v57 = vadd.f32 %v796_v53, %v530_v56 }
 0x170   : > { %914 = vst.msk [vmem:[%s1775_s29 + $0x40] sm:$0xff] %vm905_vm0, %v846_v11  ;;  %v758_v54 = vpop.f32.mrf.mxu0 }
 0x171   : > { %v759_v59 = vadd.f32 %v758_v54, %v1761_v27  ;;  %v565_v54 = vpop.permute.xlu2 %564 }
 0x173   : > { %v885_v58 = vpop.f32.mrf.mxu3 }
 0x174   : > { %v886_v60 = vadd.f32 %v885_v58, %v797_v57 }
 0x175   : > { %v847_v61 = vpop.f32.mrf.mxu1 }
 0x176   : > { %930 = vst.msk [vmem:[%s1775_s29 + $0xc0] sm:$0xff] %vm905_vm0, %v886_v60  ;;  %v848_v19 = vadd.f32 %v847_v61, %v759_v59  ;;  %v798_v62 = vpop.f32.mrf.mxu2 }
 0x177   : > { %v799_v1 = vadd.f32 %v798_v62, %v535_v55 }
 0x178   : > { %915 = vst.msk [vmem:[%s1775_s29 + $0x48] sm:$0xff] %vm905_vm0, %v848_v19  ;;  %v761_v63 = vpop.f32.mrf.mxu0 }
 0x179   : > { %v762_v3 = vadd.f32 %v761_v63, %v1757_v24 }
 0x17b   : > { %v887_v2 = vpop.f32.mrf.mxu3 }
 0x17c   : > { %v888_v4 = vadd.f32 %v887_v2, %v799_v1 }
 0x17d   : > { %v850_v5 = vpop.f32.mrf.mxu1 }
 0x17e   : > { %931 = vst.msk [vmem:[%s1775_s29 + $0xc8] sm:$0xff] %vm905_vm0, %v888_v4  ;;  %v851_v27 = vadd.f32 %v850_v5, %v762_v3  ;;  %v801_v6 = vpop.f32.mrf.mxu2 }
 0x17f   : > { %v802_v9 = vadd.f32 %v801_v6, %v540_v8 }
 0x180   : > { %916 = vst.msk [vmem:[%s1775_s29 + $0x50] sm:$0xff] %vm905_vm0, %v851_v27  ;;  %v763_v7 = vpop.f32.mrf.mxu0 }
 0x181   : > { %v764_v13 = vadd.f32 %v763_v7, %v1763_v28 }
 0x183   : > { %v890_v12 = vpop.f32.mrf.mxu3 }
 0x184   : > { %v891_v14 = vadd.f32 %v890_v12, %v802_v9 }
 0x185   : > { %v852_v15 = vpop.f32.mrf.mxu1 }
 0x186   : > { %932 = vst.msk [vmem:[%s1775_s29 + $0xd0] sm:$0xff] %vm905_vm0, %v891_v14  ;;  %v853_v24 = vadd.f32 %v852_v15, %v764_v13  ;;  %v803_v17 = vpop.f32.mrf.mxu2 }
 0x187   : > { %v804_v0 = vadd.f32 %v803_v17, %v545_v20 }
 0x188   : > { %917 = vst.msk [vmem:[%s1775_s29 + $0x58] sm:$0xff] %vm905_vm0, %v853_v24  ;;  %v766_v18 = vpop.f32.mrf.mxu0 }
 0x189   : > { %v767_v22 = vadd.f32 %v766_v18, %v1768_v32 }
 0x18b   : > { %v892_v21 = vpop.f32.mrf.mxu3 }
 0x18c   : > { %v893_v23 = vadd.f32 %v892_v21, %v804_v0 }
 0x18d   : > { %v855_v25 = vpop.f32.mrf.mxu1 }
 0x18e   : > { %933 = vst.msk [vmem:[%s1775_s29 + $0xd8] sm:$0xff] %vm905_vm0, %v893_v23  ;;  %v856_v28 = vadd.f32 %v855_v25, %v767_v22  ;;  %v806_v26 = vpop.f32.mrf.mxu2 }
 0x18f   : > { %v807_v34 = vadd.f32 %v806_v26, %v550_v31 }
 0x190   : > { %918 = vst.msk [vmem:[%s1775_s29 + $0x60] sm:$0xff] %vm905_vm0, %v856_v28  ;;  %v768_v30 = vpop.f32.mrf.mxu0 }
 0x191   : > { %v769_v10 = vadd.f32 %v768_v30, %v1765_v29 }
 0x193   : > { %v895_v35 = vpop.f32.mrf.mxu3 }
 0x194   : > { %v896_v36 = vadd.f32 %v895_v35, %v807_v34 }
 0x195   : > { %v857_v37 = vpop.f32.mrf.mxu1 }
 0x196   : > { %934 = vst.msk [vmem:[%s1775_s29 + $0xe0] sm:$0xff] %vm905_vm0, %v896_v36  ;;  %v858_v32 = vadd.f32 %v857_v37, %v769_v10  ;;  %v808_v38 = vpop.f32.mrf.mxu2 }
 0x197   : > { %v809_v41 = vadd.f32 %v808_v38, %v555_v40 }
 0x198   : > { %919 = vst.msk [vmem:[%s1775_s29 + $0x68] sm:$0xff] %vm905_vm0, %v858_v32  ;;  %v771_v39 = vpop.f32.mrf.mxu0 }
 0x199   : > { %v772_v44 = vadd.f32 %v771_v39, %v1770_v33 }
 0x19b   : > { %v897_v42 = vpop.f32.mrf.mxu3 }
 0x19c   : > { %v898_v16 = vadd.f32 %v897_v42, %v809_v41 }
 0x19d   : > { %v860_v45 = vpop.f32.mrf.mxu1 }
 0x19e   : > { %935 = vst.msk [vmem:[%s1775_s29 + $0xe8] sm:$0xff] %vm905_vm0, %v898_v16  ;;  %v861_v29 = vadd.f32 %v860_v45, %v772_v44  ;;  %v811_v46 = vpop.f32.mrf.mxu2 }
 0x19f   : > { %v812_v49 = vadd.f32 %v811_v46, %v560_v47 }
 0x1a0   : > { %920 = vst.msk [vmem:[%s1775_s29 + $0x70] sm:$0xff] %vm905_vm0, %v861_v29  ;;  %v773_v48 = vpop.f32.mrf.mxu0 }
 0x1a1   : > { %v774_v51 = vadd.f32 %v773_v48, %v1780_v43 }
 0x1a3   : > { %v900_v50 = vpop.f32.mrf.mxu3 }
 0x1a4   : > { %v901_v52 = vadd.f32 %v900_v50, %v812_v49 }
 0x1a5   : > { %v862_v11 = vpop.f32.mrf.mxu1 }
 0x1a6   : > { %936 = vst.msk [vmem:[%s1775_s29 + $0xf0] sm:$0xff] %vm905_vm0, %v901_v52  ;;  %v863_v33 = vadd.f32 %v862_v11, %v774_v51  ;;  %v813_v53 = vpop.f32.mrf.mxu2 }
 0x1a7   : > { %v814_v56 = vadd.f32 %v813_v53, %v565_v54 }
 0x1a8   : > { %921 = vst.msk [vmem:[%s1775_s29 + $0x78] sm:$0xff] %vm905_vm0, %v863_v33 }
 0x1ab   : > { %v902_v57 = vpop.f32.mrf.mxu3 }
 0x1ac   : > { %v903_v58 = vadd.f32 %v902_v57, %v814_v56 }
 0x1ae   : > { %937 = vst.msk [vmem:[%s1775_s29 + $0xf8] sm:$0xff] %vm905_vm0, %v903_v58 }
 0x1af PF: > { %s14_s19 = sadd.s32 1, %s1350_s19   ;;  %s1878_s15 = smov %s1342_s17 }
 0x1b0   : > { %p11_p9 = scmp.ge.s32.totalorder %s14_s19, 10   ;;  %s1879_s16 = smov %s1346_s18 }
 0x1b1   : > { %s1880_s17 = smov %s1883_s20  ;;  %s1881_s18 = smov %s1887_s21 }
 0x1b2   :  { %13 = sbr.rel (!%p11_p9) target bundleno = 3 (0x3), region = 69 }

// kernel: sub.1
= control target key start
LH: loop header
LB: loop body
LE: loop exit
PB: predicated region body
PF: predicated region fallthrough
CT: control target
= control target key end

     0   :  { %3 = vsyncpa [#allocation1], 0  ;;  %s1579_s19 = smov 128   ;;  %s1580_s20 = smov 8   ;;  %s2367_s0 = inlined_call_operand.vmem [shape: f32[2,32,8,8,8], index: 0, kind: input, shape index: {}]   ;;  %s2368_s1 = inlined_call_operand.vmem [shape: f32[2,32,8,8,8], index: 1, kind: input, shape index: {}]   ;;  %s2369_s2 = inlined_call_operand.hbm [shape: f32[2,32,8,8,8], index: 2, kind: output, shape index: {}]  }
   0x1   :  { %v4_v0 = vld [vmem:[%s2367_s0] sm:$0xff]  ;;  %v1325_v46 = vld [vmem:[%s2367_s0 + $0x8] sm:$0xff]  ;;  %s1285_s2 = sshll.u32 %s2369_s2, 4  ;;  %s1286_s2 = int_to_ptr.hbm [resolvable:$true] %s1285_s2 }
   0x2   :  { %v5_v1 = vld [vmem:[%s2368_s1] sm:$0xff]  ;;  %v1326_v47 = vld [vmem:[%s2368_s1 + $0x8] sm:$0xff] }
   0x3   :  { %v8_v2 = vsub.f32 %v4_v0, %v5_v1  ;;  %v1295_v3 = vld [vmem:[%s2367_s0 + $0x200] sm:$0xff]  ;;  %v1327_v49 = vld [vmem:[%s2367_s0 + $0x208] sm:$0xff]  ;;  %v167_v54 = vsub.f32 %v1325_v46, %v1326_v47  ;;  %v1368_v46 = vld [vmem:[%s2368_s1 + $0x290] sm:$0xff] }
   0x4   :  { %v1296_v4 = vld [vmem:[%s2368_s1 + $0x200] sm:$0xff]  ;;  %v1328_v50 = vld [vmem:[%s2368_s1 + $0x208] sm:$0xff] }
   0x5   :  { %v1297_v5 = vld [vmem:[%s2367_s0 + $0x40] sm:$0xff]  ;;  %v17_v6 = vsub.f32 %v1295_v3, %v1296_v4  ;;  %10 = vst [vmem:[#allocation0] sm:$0xff] %v8_v2  ;;  %v1329_v52 = vld [vmem:[%s2367_s0 + $0x48] sm:$0xff]  ;;  %v177_v57 = vsub.f32 %v1327_v49, %v1328_v50  ;;  %v1370_v49 = vld [vmem:[%s2368_s1 + $0xd0] sm:$0xff] }
   0x6   :  { %v1298_v7 = vld [vmem:[%s2368_s1 + $0x40] sm:$0xff]  ;;  %v1330_v53 = vld [vmem:[%s2368_s1 + $0x48] sm:$0xff]  ;;  %170 = vst [vmem:[#allocation0 + $0x8] sm:$0xff] %v167_v54  ;;  %v1373_v54 = vld [vmem:[%s2367_s0 + $0x110] sm:$0xff] }
   0x7   :  { %v1299_v8 = vld [vmem:[%s2367_s0 + $0x240] sm:$0xff]  ;;  %v27_v10 = vsub.f32 %v1297_v5, %v1298_v7  ;;  %20 = vst [vmem:[#allocation0 + $0x200] sm:$0xff] %v17_v6  ;;  %v1331_v55 = vld [vmem:[%s2367_s0 + $0x248] sm:$0xff]  ;;  %v187_v60 = vsub.f32 %v1329_v52, %v1330_v53  ;;  %v1372_v52 = vld [vmem:[%s2368_s1 + $0x2d0] sm:$0xff] }
   0x8   :  { %v1300_v9 = vld [vmem:[%s2368_s1 + $0x240] sm:$0xff]  ;;  %v1332_v56 = vld [vmem:[%s2368_s1 + $0x248] sm:$0xff]  ;;  %180 = vst [vmem:[#allocation0 + $0x208] sm:$0xff] %v177_v57  ;;  %v1375_v57 = vld [vmem:[%s2367_s0 + $0x310] sm:$0xff] }
   0x9   :  { %v37_v11 = vsub.f32 %v1299_v8, %v1300_v9  ;;  %v1301_v12 = vld [vmem:[%s2367_s0 + $0x80] sm:$0xff]  ;;  %30 = vst [vmem:[#allocation0 + $0x40] sm:$0xff] %v27_v10  ;;  %v1333_v58 = vld [vmem:[%s2367_s0 + $0x88] sm:$0xff]  ;;  %v197_v63 = vsub.f32 %v1331_v55, %v1332_v56  ;;  %v1374_v55 = vld [vmem:[%s2368_s1 + $0x110] sm:$0xff] }
   0xa   :  { %v1302_v13 = vld [vmem:[%s2368_s1 + $0x80] sm:$0xff]  ;;  %v1334_v59 = vld [vmem:[%s2368_s1 + $0x88] sm:$0xff]  ;;  %190 = vst [vmem:[#allocation0 + $0x48] sm:$0xff] %v187_v60  ;;  %v1377_v60 = vld [vmem:[%s2367_s0 + $0x150] sm:$0xff] }
   0xb   :  { %v1303_v14 = vld [vmem:[%s2367_s0 + $0x280] sm:$0xff]  ;;  %v47_v15 = vsub.f32 %v1301_v12, %v1302_v13  ;;  %40 = vst [vmem:[#allocation0 + $0x240] sm:$0xff] %v37_v11  ;;  %v1335_v61 = vld [vmem:[%s2367_s0 + $0x288] sm:$0xff]  ;;  %v207_v2 = vsub.f32 %v1333_v58, %v1334_v59  ;;  %v1376_v58 = vld [vmem:[%s2368_s1 + $0x310] sm:$0xff] }
   0xc   :  { %v1304_v16 = vld [vmem:[%s2368_s1 + $0x280] sm:$0xff]  ;;  %v1336_v62 = vld [vmem:[%s2368_s1 + $0x288] sm:$0xff]  ;;  %200 = vst [vmem:[#allocation0 + $0x248] sm:$0xff] %v197_v63  ;;  %v1379_v63 = vld [vmem:[%s2367_s0 + $0x350] sm:$0xff] }
   0xd   :  { %v1305_v17 = vld [vmem:[%s2367_s0 + $0xc0] sm:$0xff]  ;;  %v57_v19 = vsub.f32 %v1303_v14, %v1304_v16  ;;  %50 = vst [vmem:[#allocation0 + $0x80] sm:$0xff] %v47_v15  ;;  %v1337_v0 = vld [vmem:[%s2367_s0 + $0xc8] sm:$0xff]  ;;  %v217_v5 = vsub.f32 %v1335_v61, %v1336_v62  ;;  %v1378_v61 = vld [vmem:[%s2368_s1 + $0x150] sm:$0xff]  ;;  %v407_v62 = vsub.f32 %v1373_v54, %v1374_v55 }
   0xe   :  { %v1306_v18 = vld [vmem:[%s2368_s1 + $0xc0] sm:$0xff]  ;;  %v1338_v1 = vld [vmem:[%s2368_s1 + $0xc8] sm:$0xff]  ;;  %210 = vst [vmem:[#allocation0 + $0x88] sm:$0xff] %v207_v2  ;;  %v1381_v2 = vld [vmem:[%s2367_s0 + $0x190] sm:$0xff] }
   0xf   :  { %v67_v20 = vsub.f32 %v1305_v17, %v1306_v18  ;;  %v1307_v21 = vld [vmem:[%s2367_s0 + $0x2c0] sm:$0xff]  ;;  %60 = vst [vmem:[#allocation0 + $0x280] sm:$0xff] %v57_v19  ;;  %v1339_v3 = vld [vmem:[%s2367_s0 + $0x2c8] sm:$0xff]  ;;  %v227_v8 = vsub.f32 %v1337_v0, %v1338_v1  ;;  %v1380_v0 = vld [vmem:[%s2368_s1 + $0x350] sm:$0xff]  ;;  %v417_v1 = vsub.f32 %v1375_v57, %v1376_v58 }
  0x10   :  { %v1308_v22 = vld [vmem:[%s2368_s1 + $0x2c0] sm:$0xff]  ;;  %v1340_v4 = vld [vmem:[%s2368_s1 + $0x2c8] sm:$0xff]  ;;  %220 = vst [vmem:[#allocation0 + $0x288] sm:$0xff] %v217_v5  ;;  %v1383_v5 = vld [vmem:[%s2367_s0 + $0x390] sm:$0xff] }
  0x11   :  { %v1309_v23 = vld [vmem:[%s2367_s0 + $0x100] sm:$0xff]  ;;  %v77_v24 = vsub.f32 %v1307_v21, %v1308_v22  ;;  %70 = vst [vmem:[#allocation0 + $0xc0] sm:$0xff] %v67_v20  ;;  %v1341_v6 = vld [vmem:[%s2367_s0 + $0x108] sm:$0xff]  ;;  %v237_v11 = vsub.f32 %v1339_v3, %v1340_v4  ;;  %v1382_v3 = vld [vmem:[%s2368_s1 + $0x190] sm:$0xff]  ;;  %v427_v4 = vsub.f32 %v1377_v60, %v1378_v61 }
  0x12   :  { %v1310_v25 = vld [vmem:[%s2368_s1 + $0x100] sm:$0xff]  ;;  %v1342_v7 = vld [vmem:[%s2368_s1 + $0x108] sm:$0xff]  ;;  %230 = vst [vmem:[#allocation0 + $0xc8] sm:$0xff] %v227_v8  ;;  %v1385_v8 = vld [vmem:[%s2367_s0 + $0x1d0] sm:$0xff] }
  0x13   :  { %v1311_v26 = vld [vmem:[%s2367_s0 + $0x300] sm:$0xff]  ;;  %v87_v28 = vsub.f32 %v1309_v23, %v1310_v25  ;;  %80 = vst [vmem:[#allocation0 + $0x2c0] sm:$0xff] %v77_v24  ;;  %v1343_v9 = vld [vmem:[%s2367_s0 + $0x308] sm:$0xff]  ;;  %v247_v14 = vsub.f32 %v1341_v6, %v1342_v7  ;;  %v1384_v6 = vld [vmem:[%s2368_s1 + $0x390] sm:$0xff]  ;;  %v437_v7 = vsub.f32 %v1379_v63, %v1380_v0 }
  0x14   :  { %v1312_v27 = vld [vmem:[%s2368_s1 + $0x300] sm:$0xff]  ;;  %v1344_v10 = vld [vmem:[%s2368_s1 + $0x308] sm:$0xff]  ;;  %240 = vst [vmem:[#allocation0 + $0x2c8] sm:$0xff] %v237_v11  ;;  %v1387_v11 = vld [vmem:[%s2367_s0 + $0x3d0] sm:$0xff] }
  0x15   :  { %v1313_v29 = vld [vmem:[%s2367_s0 + $0x140] sm:$0xff]  ;;  %v97_v32 = vsub.f32 %v1311_v26, %v1312_v27  ;;  %90 = vst [vmem:[#allocation0 + $0x100] sm:$0xff] %v87_v28  ;;  %v1345_v12 = vld [vmem:[%s2367_s0 + $0x148] sm:$0xff]  ;;  %v257_v17 = vsub.f32 %v1343_v9, %v1344_v10  ;;  %v1386_v9 = vld [vmem:[%s2368_s1 + $0x1d0] sm:$0xff]  ;;  %v447_v10 = vsub.f32 %v1381_v2, %v1382_v3 }
  0x16   :  { %v1314_v30 = vld [vmem:[%s2368_s1 + $0x140] sm:$0xff]  ;;  %v1346_v13 = vld [vmem:[%s2368_s1 + $0x148] sm:$0xff]  ;;  %250 = vst [vmem:[#allocation0 + $0x108] sm:$0xff] %v247_v14  ;;  %v1389_v14 = vld [vmem:[%s2367_s0 + $0x18] sm:$0xff] }
  0x17   :  { %v1315_v31 = vld [vmem:[%s2367_s0 + $0x340] sm:$0xff]  ;;  %v107_v36 = vsub.f32 %v1313_v29, %v1314_v30  ;;  %100 = vst [vmem:[#allocation0 + $0x300] sm:$0xff] %v97_v32  ;;  %v1347_v15 = vld [vmem:[%s2367_s0 + $0x348] sm:$0xff]  ;;  %v267_v20 = vsub.f32 %v1345_v12, %v1346_v13  ;;  %v1357_v30 = vld [vmem:[%s2367_s0 + $0x10] sm:$0xff]  ;;  %v457_v13 = vsub.f32 %v1383_v5, %v1384_v6 }
  0x18   :  { %v1316_v33 = vld [vmem:[%s2368_s1 + $0x340] sm:$0xff]  ;;  %v1348_v16 = vld [vmem:[%s2368_s1 + $0x348] sm:$0xff]  ;;  %260 = vst [vmem:[#allocation0 + $0x308] sm:$0xff] %v257_v17  ;;  %v1388_v12 = vld [vmem:[%s2368_s1 + $0x3d0] sm:$0xff] }
  0x19   :  { %v1317_v34 = vld [vmem:[%s2367_s0 + $0x180] sm:$0xff]  ;;  %v117_v39 = vsub.f32 %v1315_v31, %v1316_v33  ;;  %110 = vst [vmem:[#allocation0 + $0x140] sm:$0xff] %v107_v36  ;;  %v1349_v18 = vld [vmem:[%s2367_s0 + $0x188] sm:$0xff]  ;;  %v277_v23 = vsub.f32 %v1347_v15, %v1348_v16  ;;  %v1358_v31 = vld [vmem:[%s2368_s1 + $0x10] sm:$0xff]  ;;  %v467_v16 = vsub.f32 %v1385_v8, %v1386_v9 }
  0x1a   :  { %v1318_v35 = vld [vmem:[%s2368_s1 + $0x180] sm:$0xff]  ;;  %v1350_v19 = vld [vmem:[%s2368_s1 + $0x188] sm:$0xff]  ;;  %270 = vst [vmem:[#allocation0 + $0x148] sm:$0xff] %v267_v20  ;;  %v1359_v33 = vld [vmem:[%s2367_s0 + $0x210] sm:$0xff] }
  0x1b   :  { %v1319_v37 = vld [vmem:[%s2367_s0 + $0x380] sm:$0xff]  ;;  %v127_v42 = vsub.f32 %v1317_v34, %v1318_v35  ;;  %120 = vst [vmem:[#allocation0 + $0x340] sm:$0xff] %v117_v39  ;;  %v1351_v21 = vld [vmem:[%s2367_s0 + $0x388] sm:$0xff]  ;;  %v287_v26 = vsub.f32 %v1349_v18, %v1350_v19  ;;  %v1360_v34 = vld [vmem:[%s2368_s1 + $0x210] sm:$0xff]  ;;  %v477_v19 = vsub.f32 %v1387_v11, %v1388_v12 }
  0x1c   :  { %v1320_v38 = vld [vmem:[%s2368_s1 + $0x380] sm:$0xff]  ;;  %v1352_v22 = vld [vmem:[%s2368_s1 + $0x388] sm:$0xff]  ;;  %280 = vst [vmem:[#allocation0 + $0x348] sm:$0xff] %v277_v23  ;;  %v1361_v36 = vld [vmem:[%s2367_s0 + $0x50] sm:$0xff] }
  0x1d   :  { %v1321_v40 = vld [vmem:[%s2367_s0 + $0x1c0] sm:$0xff]  ;;  %v137_v45 = vsub.f32 %v1319_v37, %v1320_v38  ;;  %130 = vst [vmem:[#allocation0 + $0x180] sm:$0xff] %v127_v42  ;;  %v1353_v24 = vld [vmem:[%s2367_s0 + $0x1c8] sm:$0xff]  ;;  %v297_v29 = vsub.f32 %v1351_v21, %v1352_v22  ;;  %v1362_v37 = vld [vmem:[%s2368_s1 + $0x50] sm:$0xff]  ;;  %v327_v38 = vsub.f32 %v1357_v30, %v1358_v31 }
  0x1e   :  { %v1322_v41 = vld [vmem:[%s2368_s1 + $0x1c0] sm:$0xff]  ;;  %v1354_v25 = vld [vmem:[%s2368_s1 + $0x1c8] sm:$0xff]  ;;  %290 = vst [vmem:[#allocation0 + $0x188] sm:$0xff] %v287_v26  ;;  %v1363_v39 = vld [vmem:[%s2367_s0 + $0x250] sm:$0xff] }
  0x1f   :  { %v1323_v43 = vld [vmem:[%s2367_s0 + $0x3c0] sm:$0xff]  ;;  %v147_v48 = vsub.f32 %v1321_v40, %v1322_v41  ;;  %140 = vst [vmem:[#allocation0 + $0x380] sm:$0xff] %v137_v45  ;;  %v1355_v27 = vld [vmem:[%s2367_s0 + $0x3c8] sm:$0xff]  ;;  %v307_v32 = vsub.f32 %v1353_v24, %v1354_v25  ;;  %v1364_v40 = vld [vmem:[%s2368_s1 + $0x250] sm:$0xff]  ;;  %v337_v41 = vsub.f32 %v1359_v33, %v1360_v34 }
  0x20   :  { %v1324_v44 = vld [vmem:[%s2368_s1 + $0x3c0] sm:$0xff]  ;;  %v1356_v28 = vld [vmem:[%s2368_s1 + $0x3c8] sm:$0xff]  ;;  %300 = vst [vmem:[#allocation0 + $0x388] sm:$0xff] %v297_v29  ;;  %v1365_v42 = vld [vmem:[%s2367_s0 + $0x90] sm:$0xff]  ;;  %v357_v47 = vsub.f32 %v1363_v39, %v1364_v40 }
  0x21   :  { %v157_v51 = vsub.f32 %v1323_v43, %v1324_v44  ;;  %150 = vst [vmem:[#allocation0 + $0x1c0] sm:$0xff] %v147_v48  ;;  %v317_v35 = vsub.f32 %v1355_v27, %v1356_v28  ;;  %v1366_v43 = vld [vmem:[%s2368_s1 + $0x90] sm:$0xff]  ;;  %v347_v44 = vsub.f32 %v1361_v36, %v1362_v37  ;;  %v1390_v15 = vld [vmem:[%s2368_s1 + $0x18] sm:$0xff]  ;;  %v1422_v63 = vld [vmem:[%s2368_s1 + $0x20] sm:$0xff] }
  0x22   :  { %310 = vst [vmem:[#allocation0 + $0x1c8] sm:$0xff] %v307_v32  ;;  %v1367_v45 = vld [vmem:[%s2367_s0 + $0x290] sm:$0xff]  ;;  %v367_v50 = vsub.f32 %v1365_v42, %v1366_v43  ;;  %v1391_v17 = vld [vmem:[%s2367_s0 + $0x218] sm:$0xff]  ;;  %v487_v22 = vsub.f32 %v1389_v14, %v1390_v15  ;;  %v1424_v2 = vld [vmem:[%s2368_s1 + $0x220] sm:$0xff] }
  0x23   :  { %160 = vst [vmem:[#allocation0 + $0x3c0] sm:$0xff] %v157_v51  ;;  %v1369_v48 = vld [vmem:[%s2367_s0 + $0xd0] sm:$0xff]  ;;  %v377_v53 = vsub.f32 %v1367_v45, %v1368_v46  ;;  %v1392_v18 = vld [vmem:[%s2368_s1 + $0x218] sm:$0xff]  ;;  %v1426_v5 = vld [vmem:[%s2368_s1 + $0x60] sm:$0xff] }
  0x24   :  { %320 = vst [vmem:[#allocation0 + $0x3c8] sm:$0xff] %v317_v35  ;;  %v1371_v51 = vld [vmem:[%s2367_s0 + $0x2d0] sm:$0xff]  ;;  %v387_v56 = vsub.f32 %v1369_v48, %v1370_v49  ;;  %v1393_v20 = vld [vmem:[%s2367_s0 + $0x58] sm:$0xff]  ;;  %v497_v25 = vsub.f32 %v1391_v17, %v1392_v18  ;;  %v1428_v8 = vld [vmem:[%s2368_s1 + $0x260] sm:$0xff] }
  0x25   :  { %330 = vst [vmem:[#allocation0 + $0x10] sm:$0xff] %v327_v38  ;;  %v397_v59 = vsub.f32 %v1371_v51, %v1372_v52  ;;  %v1394_v21 = vld [vmem:[%s2368_s1 + $0x58] sm:$0xff]  ;;  %v1430_v11 = vld [vmem:[%s2368_s1 + $0xa0] sm:$0xff] }
  0x26   :  { %340 = vst [vmem:[#allocation0 + $0x210] sm:$0xff] %v337_v41  ;;  %v1395_v23 = vld [vmem:[%s2367_s0 + $0x258] sm:$0xff]  ;;  %v507_v28 = vsub.f32 %v1393_v20, %v1394_v21  ;;  %v1432_v14 = vld [vmem:[%s2368_s1 + $0x2a0] sm:$0xff] }
  0x27   :  { %350 = vst [vmem:[#allocation0 + $0x50] sm:$0xff] %v347_v44  ;;  %v1396_v24 = vld [vmem:[%s2368_s1 + $0x258] sm:$0xff]  ;;  %v1434_v17 = vld [vmem:[%s2368_s1 + $0xe0] sm:$0xff] }
  0x28   :  { %360 = vst [vmem:[#allocation0 + $0x250] sm:$0xff] %v357_v47  ;;  %v1397_v26 = vld [vmem:[%s2367_s0 + $0x98] sm:$0xff]  ;;  %v517_v31 = vsub.f32 %v1395_v23, %v1396_v24  ;;  %v1436_v20 = vld [vmem:[%s2368_s1 + $0x2e0] sm:$0xff] }
  0x29   :  { %370 = vst [vmem:[#allocation0 + $0x90] sm:$0xff] %v367_v50  ;;  %v1398_v27 = vld [vmem:[%s2368_s1 + $0x98] sm:$0xff]  ;;  %v1438_v23 = vld [vmem:[%s2368_s1 + $0x120] sm:$0xff] }
  0x2a   :  { %380 = vst [vmem:[#allocation0 + $0x290] sm:$0xff] %v377_v53  ;;  %v1399_v29 = vld [vmem:[%s2367_s0 + $0x298] sm:$0xff]  ;;  %v527_v34 = vsub.f32 %v1397_v26, %v1398_v27  ;;  %v1440_v26 = vld [vmem:[%s2368_s1 + $0x320] sm:$0xff] }
  0x2b   :  { %390 = vst [vmem:[#allocation0 + $0xd0] sm:$0xff] %v387_v56  ;;  %v1400_v30 = vld [vmem:[%s2368_s1 + $0x298] sm:$0xff] }
  0x2c   :  { %400 = vst [vmem:[#allocation0 + $0x2d0] sm:$0xff] %v397_v59  ;;  %v1401_v32 = vld [vmem:[%s2367_s0 + $0xd8] sm:$0xff]  ;;  %v537_v37 = vsub.f32 %v1399_v29, %v1400_v30  ;;  %v1442_v29 = vld [vmem:[%s2368_s1 + $0x160] sm:$0xff] }
  0x2d   :  { %410 = vst [vmem:[#allocation0 + $0x110] sm:$0xff] %v407_v62  ;;  %v1402_v33 = vld [vmem:[%s2368_s1 + $0xd8] sm:$0xff]  ;;  %v1421_v62 = vld [vmem:[%s2367_s0 + $0x20] sm:$0xff] }
  0x2e   :  { %420 = vst [vmem:[#allocation0 + $0x310] sm:$0xff] %v417_v1  ;;  %v1403_v35 = vld [vmem:[%s2367_s0 + $0x2d8] sm:$0xff]  ;;  %v547_v40 = vsub.f32 %v1401_v32, %v1402_v33  ;;  %v1423_v1 = vld [vmem:[%s2367_s0 + $0x220] sm:$0xff]  ;;  %v647_v6 = vsub.f32 %v1421_v62, %v1422_v63  ;;  %v1464_v62 = vld [vmem:[%s2368_s1 + $0x2a8] sm:$0xff] }
  0x2f   :  { %430 = vst [vmem:[#allocation0 + $0x150] sm:$0xff] %v427_v4  ;;  %v1404_v36 = vld [vmem:[%s2368_s1 + $0x2d8] sm:$0xff]  ;;  %v1425_v4 = vld [vmem:[%s2367_s0 + $0x60] sm:$0xff]  ;;  %v657_v9 = vsub.f32 %v1423_v1, %v1424_v2  ;;  %v1466_v1 = vld [vmem:[%s2368_s1 + $0xe8] sm:$0xff] }
  0x30   :  { %440 = vst [vmem:[#allocation0 + $0x350] sm:$0xff] %v437_v7  ;;  %v1405_v38 = vld [vmem:[%s2367_s0 + $0x118] sm:$0xff]  ;;  %v557_v43 = vsub.f32 %v1403_v35, %v1404_v36  ;;  %v1427_v7 = vld [vmem:[%s2367_s0 + $0x260] sm:$0xff]  ;;  %v667_v12 = vsub.f32 %v1425_v4, %v1426_v5  ;;  %v1468_v4 = vld [vmem:[%s2368_s1 + $0x2e8] sm:$0xff] }
  0x31   :  { %450 = vst [vmem:[#allocation0 + $0x190] sm:$0xff] %v447_v10  ;;  %v1406_v39 = vld [vmem:[%s2368_s1 + $0x118] sm:$0xff]  ;;  %v1429_v10 = vld [vmem:[%s2367_s0 + $0xa0] sm:$0xff]  ;;  %v677_v15 = vsub.f32 %v1427_v7, %v1428_v8  ;;  %v1470_v7 = vld [vmem:[%s2368_s1 + $0x128] sm:$0xff] }
  0x32   :  { %460 = vst [vmem:[#allocation0 + $0x390] sm:$0xff] %v457_v13  ;;  %v1407_v41 = vld [vmem:[%s2367_s0 + $0x318] sm:$0xff]  ;;  %v567_v46 = vsub.f32 %v1405_v38, %v1406_v39  ;;  %v1431_v13 = vld [vmem:[%s2367_s0 + $0x2a0] sm:$0xff]  ;;  %v687_v18 = vsub.f32 %v1429_v10, %v1430_v11  ;;  %v1472_v10 = vld [vmem:[%s2368_s1 + $0x328] sm:$0xff] }
  0x33   :  { %470 = vst [vmem:[#allocation0 + $0x1d0] sm:$0xff] %v467_v16  ;;  %v1408_v42 = vld [vmem:[%s2368_s1 + $0x318] sm:$0xff]  ;;  %v1433_v16 = vld [vmem:[%s2367_s0 + $0xe0] sm:$0xff]  ;;  %v697_v21 = vsub.f32 %v1431_v13, %v1432_v14  ;;  %v1474_v13 = vld [vmem:[%s2368_s1 + $0x168] sm:$0xff] }
  0x34   :  { %480 = vst [vmem:[#allocation0 + $0x3d0] sm:$0xff] %v477_v19  ;;  %v1409_v44 = vld [vmem:[%s2367_s0 + $0x158] sm:$0xff]  ;;  %v577_v49 = vsub.f32 %v1407_v41, %v1408_v42  ;;  %v1435_v19 = vld [vmem:[%s2367_s0 + $0x2e0] sm:$0xff]  ;;  %v707_v24 = vsub.f32 %v1433_v16, %v1434_v17  ;;  %v1476_v16 = vld [vmem:[%s2368_s1 + $0x368] sm:$0xff] }
  0x35   :  { %490 = vst [vmem:[#allocation0 + $0x18] sm:$0xff] %v487_v22  ;;  %v1410_v45 = vld [vmem:[%s2368_s1 + $0x158] sm:$0xff]  ;;  %v1437_v22 = vld [vmem:[%s2367_s0 + $0x120] sm:$0xff]  ;;  %v717_v27 = vsub.f32 %v1435_v19, %v1436_v20  ;;  %v1478_v19 = vld [vmem:[%s2368_s1 + $0x1a8] sm:$0xff] }
  0x36   :  { %500 = vst [vmem:[#allocation0 + $0x218] sm:$0xff] %v497_v25  ;;  %v1411_v47 = vld [vmem:[%s2367_s0 + $0x358] sm:$0xff]  ;;  %v587_v52 = vsub.f32 %v1409_v44, %v1410_v45  ;;  %v1439_v25 = vld [vmem:[%s2367_s0 + $0x320] sm:$0xff]  ;;  %v727_v30 = vsub.f32 %v1437_v22, %v1438_v23  ;;  %v1480_v22 = vld [vmem:[%s2368_s1 + $0x3a8] sm:$0xff] }
  0x37   :  { %510 = vst [vmem:[#allocation0 + $0x58] sm:$0xff] %v507_v28  ;;  %v1412_v48 = vld [vmem:[%s2368_s1 + $0x358] sm:$0xff]  ;;  %v1441_v28 = vld [vmem:[%s2367_s0 + $0x160] sm:$0xff]  ;;  %v737_v33 = vsub.f32 %v1439_v25, %v1440_v26  ;;  %v1482_v25 = vld [vmem:[%s2368_s1 + $0x1e8] sm:$0xff] }
  0x38   :  { %520 = vst [vmem:[#allocation0 + $0x258] sm:$0xff] %v517_v31  ;;  %v1413_v50 = vld [vmem:[%s2367_s0 + $0x198] sm:$0xff]  ;;  %v597_v55 = vsub.f32 %v1411_v47, %v1412_v48  ;;  %v1443_v31 = vld [vmem:[%s2367_s0 + $0x360] sm:$0xff]  ;;  %v747_v36 = vsub.f32 %v1441_v28, %v1442_v29  ;;  %v1454_v47 = vld [vmem:[%s2368_s1 + $0x28] sm:$0xff] }
  0x39   :  { %530 = vst [vmem:[#allocation0 + $0x98] sm:$0xff] %v527_v34  ;;  %v1414_v51 = vld [vmem:[%s2368_s1 + $0x198] sm:$0xff]  ;;  %v1444_v32 = vld [vmem:[%s2368_s1 + $0x360] sm:$0xff]  ;;  %v1484_v28 = vld [vmem:[%s2368_s1 + $0x3e8] sm:$0xff] }
  0x3a   :  { %540 = vst [vmem:[#allocation0 + $0x298] sm:$0xff] %v537_v37  ;;  %v1415_v53 = vld [vmem:[%s2367_s0 + $0x398] sm:$0xff]  ;;  %v607_v58 = vsub.f32 %v1413_v50, %v1414_v51  ;;  %v1445_v34 = vld [vmem:[%s2367_s0 + $0x1a0] sm:$0xff]  ;;  %v757_v39 = vsub.f32 %v1443_v31, %v1444_v32  ;;  %v1456_v50 = vld [vmem:[%s2368_s1 + $0x228] sm:$0xff] }
  0x3b   :  { %550 = vst [vmem:[#allocation0 + $0xd8] sm:$0xff] %v547_v40  ;;  %v1416_v54 = vld [vmem:[%s2368_s1 + $0x398] sm:$0xff]  ;;  %v1446_v35 = vld [vmem:[%s2368_s1 + $0x1a0] sm:$0xff]  ;;  %v1486_v31 = vld [vmem:[%s2368_s1 + $0x30] sm:$0xff] }
  0x3c   :  { %560 = vst [vmem:[#allocation0 + $0x2d8] sm:$0xff] %v557_v43  ;;  %v1417_v56 = vld [vmem:[%s2367_s0 + $0x1d8] sm:$0xff]  ;;  %v617_v61 = vsub.f32 %v1415_v53, %v1416_v54  ;;  %v1447_v37 = vld [vmem:[%s2367_s0 + $0x3a0] sm:$0xff]  ;;  %v767_v42 = vsub.f32 %v1445_v34, %v1446_v35  ;;  %v1458_v53 = vld [vmem:[%s2368_s1 + $0x68] sm:$0xff] }
  0x3d   :  { %v1418_v57 = vld [vmem:[%s2368_s1 + $0x1d8] sm:$0xff]  ;;  %570 = vst [vmem:[#allocation0 + $0x118] sm:$0xff] %v567_v46  ;;  %v1448_v38 = vld [vmem:[%s2368_s1 + $0x3a0] sm:$0xff]  ;;  %v1453_v46 = vld [vmem:[%s2367_s0 + $0x28] sm:$0xff] }
  0x3e   :  { %v1419_v59 = vld [vmem:[%s2367_s0 + $0x3d8] sm:$0xff]  ;;  %580 = vst [vmem:[#allocation0 + $0x318] sm:$0xff] %v577_v49  ;;  %v627_v0 = vsub.f32 %v1417_v56, %v1418_v57  ;;  %v1449_v40 = vld [vmem:[%s2367_s0 + $0x1e0] sm:$0xff]  ;;  %v777_v45 = vsub.f32 %v1447_v37, %v1448_v38  ;;  %v1455_v49 = vld [vmem:[%s2367_s0 + $0x228] sm:$0xff]  ;;  %v807_v54 = vsub.f32 %v1453_v46, %v1454_v47 }
  0x3f   :  { %v1420_v60 = vld [vmem:[%s2368_s1 + $0x3d8] sm:$0xff]  ;;  %590 = vst [vmem:[#allocation0 + $0x158] sm:$0xff] %v587_v52  ;;  %v1450_v41 = vld [vmem:[%s2368_s1 + $0x1e0] sm:$0xff]  ;;  %v1457_v52 = vld [vmem:[%s2367_s0 + $0x68] sm:$0xff]  ;;  %v817_v57 = vsub.f32 %v1455_v49, %v1456_v50 }
  0x40   :  { %600 = vst [vmem:[#allocation0 + $0x358] sm:$0xff] %v597_v55  ;;  %v637_v3 = vsub.f32 %v1419_v59, %v1420_v60  ;;  %v1451_v43 = vld [vmem:[%s2367_s0 + $0x3e0] sm:$0xff]  ;;  %v787_v48 = vsub.f32 %v1449_v40, %v1450_v41  ;;  %v1459_v55 = vld [vmem:[%s2367_s0 + $0x268] sm:$0xff]  ;;  %v827_v60 = vsub.f32 %v1457_v52, %v1458_v53  ;;  %v1488_v34 = vld [vmem:[%s2368_s1 + $0x230] sm:$0xff] }
  0x41   :  { %610 = vst [vmem:[#allocation0 + $0x198] sm:$0xff] %v607_v58  ;;  %v1452_v44 = vld [vmem:[%s2368_s1 + $0x3e0] sm:$0xff]  ;;  %v1460_v56 = vld [vmem:[%s2368_s1 + $0x268] sm:$0xff]  ;;  %v1490_v37 = vld [vmem:[%s2368_s1 + $0x70] sm:$0xff] }
  0x42   :  { %620 = vst [vmem:[#allocation0 + $0x398] sm:$0xff] %v617_v61  ;;  %v797_v51 = vsub.f32 %v1451_v43, %v1452_v44  ;;  %v1461_v58 = vld [vmem:[%s2367_s0 + $0xa8] sm:$0xff]  ;;  %v837_v63 = vsub.f32 %v1459_v55, %v1460_v56  ;;  %v1492_v40 = vld [vmem:[%s2368_s1 + $0x270] sm:$0xff] }
  0x43   :  { %630 = vst [vmem:[#allocation0 + $0x1d8] sm:$0xff] %v627_v0  ;;  %v1462_v59 = vld [vmem:[%s2368_s1 + $0xa8] sm:$0xff]  ;;  %v1494_v43 = vld [vmem:[%s2368_s1 + $0xb0] sm:$0xff] }
  0x44   :  { %640 = vst [vmem:[#allocation0 + $0x3d8] sm:$0xff] %v637_v3  ;;  %v1463_v61 = vld [vmem:[%s2367_s0 + $0x2a8] sm:$0xff]  ;;  %v847_v2 = vsub.f32 %v1461_v58, %v1462_v59  ;;  %v1496_v46 = vld [vmem:[%s2368_s1 + $0x2b0] sm:$0xff] }
  0x45   :  { %650 = vst [vmem:[#allocation0 + $0x20] sm:$0xff] %v647_v6  ;;  %v1465_v0 = vld [vmem:[%s2367_s0 + $0xe8] sm:$0xff]  ;;  %v857_v5 = vsub.f32 %v1463_v61, %v1464_v62  ;;  %v1498_v49 = vld [vmem:[%s2368_s1 + $0xf0] sm:$0xff] }
  0x46   :  { %660 = vst [vmem:[#allocation0 + $0x220] sm:$0xff] %v657_v9  ;;  %v1467_v3 = vld [vmem:[%s2367_s0 + $0x2e8] sm:$0xff]  ;;  %v867_v8 = vsub.f32 %v1465_v0, %v1466_v1  ;;  %v1500_v52 = vld [vmem:[%s2368_s1 + $0x2f0] sm:$0xff] }
  0x47   :  { %670 = vst [vmem:[#allocation0 + $0x60] sm:$0xff] %v667_v12  ;;  %v1469_v6 = vld [vmem:[%s2367_s0 + $0x128] sm:$0xff]  ;;  %v877_v11 = vsub.f32 %v1467_v3, %v1468_v4  ;;  %v1502_v55 = vld [vmem:[%s2368_s1 + $0x130] sm:$0xff] }
  0x48   :  { %680 = vst [vmem:[#allocation0 + $0x260] sm:$0xff] %v677_v15  ;;  %v1471_v9 = vld [vmem:[%s2367_s0 + $0x328] sm:$0xff]  ;;  %v887_v14 = vsub.f32 %v1469_v6, %v1470_v7  ;;  %v1504_v58 = vld [vmem:[%s2368_s1 + $0x330] sm:$0xff] }
  0x49   :  { %690 = vst [vmem:[#allocation0 + $0xa0] sm:$0xff] %v687_v18  ;;  %v1473_v12 = vld [vmem:[%s2367_s0 + $0x168] sm:$0xff]  ;;  %v897_v17 = vsub.f32 %v1471_v9, %v1472_v10  ;;  %v1506_v61 = vld [vmem:[%s2368_s1 + $0x170] sm:$0xff] }
  0x4a   :  { %700 = vst [vmem:[#allocation0 + $0x2a0] sm:$0xff] %v697_v21  ;;  %v1475_v15 = vld [vmem:[%s2367_s0 + $0x368] sm:$0xff]  ;;  %v907_v20 = vsub.f32 %v1473_v12, %v1474_v13  ;;  %v1508_v0 = vld [vmem:[%s2368_s1 + $0x370] sm:$0xff] }
  0x4b   :  { %710 = vst [vmem:[#allocation0 + $0xe0] sm:$0xff] %v707_v24  ;;  %v1477_v18 = vld [vmem:[%s2367_s0 + $0x1a8] sm:$0xff]  ;;  %v917_v23 = vsub.f32 %v1475_v15, %v1476_v16  ;;  %v1510_v3 = vld [vmem:[%s2368_s1 + $0x1b0] sm:$0xff]  ;;  %v1518_v15 = vld [vmem:[%s2368_s1 + $0x38] sm:$0xff] }
  0x4c   :  { %720 = vst [vmem:[#allocation0 + $0x2e0] sm:$0xff] %v717_v27  ;;  %v1479_v21 = vld [vmem:[%s2367_s0 + $0x3a8] sm:$0xff]  ;;  %v927_v26 = vsub.f32 %v1477_v18, %v1478_v19  ;;  %v1512_v6 = vld [vmem:[%s2368_s1 + $0x3b0] sm:$0xff]  ;;  %v1520_v18 = vld [vmem:[%s2368_s1 + $0x238] sm:$0xff] }
  0x4d   :  { %730 = vst [vmem:[#allocation0 + $0x120] sm:$0xff] %v727_v30  ;;  %v1481_v24 = vld [vmem:[%s2367_s0 + $0x1e8] sm:$0xff]  ;;  %v937_v29 = vsub.f32 %v1479_v21, %v1480_v22  ;;  %v1485_v30 = vld [vmem:[%s2367_s0 + $0x30] sm:$0xff]  ;;  %v1522_v21 = vld [vmem:[%s2368_s1 + $0x78] sm:$0xff] }
  0x4e   :  { %740 = vst [vmem:[#allocation0 + $0x320] sm:$0xff] %v737_v33  ;;  %v1483_v27 = vld [vmem:[%s2367_s0 + $0x3e8] sm:$0xff]  ;;  %v947_v32 = vsub.f32 %v1481_v24, %v1482_v25  ;;  %v1487_v33 = vld [vmem:[%s2367_s0 + $0x230] sm:$0xff]  ;;  %v967_v38 = vsub.f32 %v1485_v30, %v1486_v31  ;;  %v1524_v24 = vld [vmem:[%s2368_s1 + $0x278] sm:$0xff] }
  0x4f   :  { %750 = vst [vmem:[#allocation0 + $0x160] sm:$0xff] %v747_v36  ;;  %v957_v35 = vsub.f32 %v1483_v27, %v1484_v28  ;;  %v1489_v36 = vld [vmem:[%s2367_s0 + $0x70] sm:$0xff]  ;;  %v977_v41 = vsub.f32 %v1487_v33, %v1488_v34  ;;  %v1526_v27 = vld [vmem:[%s2368_s1 + $0xb8] sm:$0xff] }
  0x50   :  { %760 = vst [vmem:[#allocation0 + $0x360] sm:$0xff] %v757_v39  ;;  %v1491_v39 = vld [vmem:[%s2367_s0 + $0x270] sm:$0xff]  ;;  %v987_v44 = vsub.f32 %v1489_v36, %v1490_v37  ;;  %v1528_v30 = vld [vmem:[%s2368_s1 + $0x2b8] sm:$0xff] }
  0x51   :  { %770 = vst [vmem:[#allocation0 + $0x1a0] sm:$0xff] %v767_v42  ;;  %v1493_v42 = vld [vmem:[%s2367_s0 + $0xb0] sm:$0xff]  ;;  %v997_v47 = vsub.f32 %v1491_v39, %v1492_v40  ;;  %v1530_v33 = vld [vmem:[%s2368_s1 + $0xf8] sm:$0xff] }
  0x52   :  { %780 = vst [vmem:[#allocation0 + $0x3a0] sm:$0xff] %v777_v45  ;;  %v1495_v45 = vld [vmem:[%s2367_s0 + $0x2b0] sm:$0xff]  ;;  %v1007_v50 = vsub.f32 %v1493_v42, %v1494_v43  ;;  %v1532_v36 = vld [vmem:[%s2368_s1 + $0x2f8] sm:$0xff] }
  0x53   :  { %790 = vst [vmem:[#allocation0 + $0x1e0] sm:$0xff] %v787_v48  ;;  %v1497_v48 = vld [vmem:[%s2367_s0 + $0xf0] sm:$0xff]  ;;  %v1017_v53 = vsub.f32 %v1495_v45, %v1496_v46  ;;  %v1534_v39 = vld [vmem:[%s2368_s1 + $0x138] sm:$0xff] }
  0x54   :  { %800 = vst [vmem:[#allocation0 + $0x3e0] sm:$0xff] %v797_v51  ;;  %v1499_v51 = vld [vmem:[%s2367_s0 + $0x2f0] sm:$0xff]  ;;  %v1027_v56 = vsub.f32 %v1497_v48, %v1498_v49  ;;  %v1536_v42 = vld [vmem:[%s2368_s1 + $0x338] sm:$0xff] }
  0x55   :  { %810 = vst [vmem:[#allocation0 + $0x28] sm:$0xff] %v807_v54  ;;  %v1501_v54 = vld [vmem:[%s2367_s0 + $0x130] sm:$0xff]  ;;  %v1037_v59 = vsub.f32 %v1499_v51, %v1500_v52  ;;  %v1538_v45 = vld [vmem:[%s2368_s1 + $0x178] sm:$0xff] }
  0x56   :  { %820 = vst [vmem:[#allocation0 + $0x228] sm:$0xff] %v817_v57  ;;  %v1503_v57 = vld [vmem:[%s2367_s0 + $0x330] sm:$0xff]  ;;  %v1047_v62 = vsub.f32 %v1501_v54, %v1502_v55  ;;  %v1540_v48 = vld [vmem:[%s2368_s1 + $0x378] sm:$0xff] }
  0x57   :  { %830 = vst [vmem:[#allocation0 + $0x68] sm:$0xff] %v827_v60  ;;  %v1505_v60 = vld [vmem:[%s2367_s0 + $0x170] sm:$0xff]  ;;  %v1057_v1 = vsub.f32 %v1503_v57, %v1504_v58  ;;  %v1542_v51 = vld [vmem:[%s2368_s1 + $0x1b8] sm:$0xff] }
  0x58   :  { %840 = vst [vmem:[#allocation0 + $0x268] sm:$0xff] %v837_v63  ;;  %v1507_v63 = vld [vmem:[%s2367_s0 + $0x370] sm:$0xff]  ;;  %v1067_v4 = vsub.f32 %v1505_v60, %v1506_v61  ;;  %v1544_v54 = vld [vmem:[%s2368_s1 + $0x3b8] sm:$0xff] }
  0x59   :  { %850 = vst [vmem:[#allocation0 + $0xa8] sm:$0xff] %v847_v2  ;;  %v1509_v2 = vld [vmem:[%s2367_s0 + $0x1b0] sm:$0xff]  ;;  %v1077_v7 = vsub.f32 %v1507_v63, %v1508_v0  ;;  %v1546_v57 = vld [vmem:[%s2368_s1 + $0x1f8] sm:$0xff] }
  0x5a   :  { %860 = vst [vmem:[#allocation0 + $0x2a8] sm:$0xff] %v857_v5  ;;  %v1511_v5 = vld [vmem:[%s2367_s0 + $0x3b0] sm:$0xff]  ;;  %v1087_v10 = vsub.f32 %v1509_v2, %v1510_v3  ;;  %v1548_v60 = vld [vmem:[%s2368_s1 + $0x3f8] sm:$0xff] }
  0x5b   :  { %870 = vst [vmem:[#allocation0 + $0xe8] sm:$0xff] %v867_v8  ;;  %v1513_v8 = vld [vmem:[%s2367_s0 + $0x1f0] sm:$0xff]  ;;  %v1097_v13 = vsub.f32 %v1511_v5, %v1512_v6 }
  0x5c   :  { %880 = vst [vmem:[#allocation0 + $0x2e8] sm:$0xff] %v877_v11  ;;  %v1514_v9 = vld [vmem:[%s2368_s1 + $0x1f0] sm:$0xff] }
  0x5d   :  { %890 = vst [vmem:[#allocation0 + $0x128] sm:$0xff] %v887_v14  ;;  %v1515_v11 = vld [vmem:[%s2367_s0 + $0x3f0] sm:$0xff]  ;;  %v1517_v14 = vld [vmem:[%s2367_s0 + $0x38] sm:$0xff]  ;;  %v1107_v16 = vsub.f32 %v1513_v8, %v1514_v9 }
  0x5e   :  { %900 = vst [vmem:[#allocation0 + $0x328] sm:$0xff] %v897_v17  ;;  %v1516_v12 = vld [vmem:[%s2368_s1 + $0x3f0] sm:$0xff]  ;;  %v1519_v17 = vld [vmem:[%s2367_s0 + $0x238] sm:$0xff]  ;;  %v1127_v22 = vsub.f32 %v1517_v14, %v1518_v15  ;;  %s1578_s1 = smov [#allocation0]  }
  0x5f   :  { %910 = vst [vmem:[#allocation0 + $0x168] sm:$0xff] %v907_v20  ;;  %v1117_v19 = vsub.f32 %v1515_v11, %v1516_v12  ;;  %v1521_v20 = vld [vmem:[%s2367_s0 + $0x78] sm:$0xff]  ;;  %v1137_v25 = vsub.f32 %v1519_v17, %v1520_v18  ;;  %s1283_s16 = sshll.u32 %s1578_s1, 4  ;;  %s1284_s16 = int_to_ptr.vmem [resolvable:$true] %s1283_s16 }
  0x60   :  { %920 = vst [vmem:[#allocation0 + $0x368] sm:$0xff] %v917_v23  ;;  %v1523_v23 = vld [vmem:[%s2367_s0 + $0x278] sm:$0xff]  ;;  %v1147_v28 = vsub.f32 %v1521_v20, %v1522_v21 }
  0x61   :  { %930 = vst [vmem:[#allocation0 + $0x1a8] sm:$0xff] %v927_v26  ;;  %v1525_v26 = vld [vmem:[%s2367_s0 + $0xb8] sm:$0xff]  ;;  %v1157_v31 = vsub.f32 %v1523_v23, %v1524_v24 }
  0x62   :  { %940 = vst [vmem:[#allocation0 + $0x3a8] sm:$0xff] %v937_v29  ;;  %v1527_v29 = vld [vmem:[%s2367_s0 + $0x2b8] sm:$0xff]  ;;  %v1167_v34 = vsub.f32 %v1525_v26, %v1526_v27 }
  0x63   :  { %950 = vst [vmem:[#allocation0 + $0x1e8] sm:$0xff] %v947_v32  ;;  %v1529_v32 = vld [vmem:[%s2367_s0 + $0xf8] sm:$0xff]  ;;  %v1177_v37 = vsub.f32 %v1527_v29, %v1528_v30 }
  0x64   :  { %960 = vst [vmem:[#allocation0 + $0x3e8] sm:$0xff] %v957_v35  ;;  %v1531_v35 = vld [vmem:[%s2367_s0 + $0x2f8] sm:$0xff]  ;;  %v1187_v40 = vsub.f32 %v1529_v32, %v1530_v33 }
  0x65   :  { %970 = vst [vmem:[#allocation0 + $0x30] sm:$0xff] %v967_v38  ;;  %v1533_v38 = vld [vmem:[%s2367_s0 + $0x138] sm:$0xff]  ;;  %v1197_v43 = vsub.f32 %v1531_v35, %v1532_v36 }
  0x66   :  { %980 = vst [vmem:[#allocation0 + $0x230] sm:$0xff] %v977_v41  ;;  %v1535_v41 = vld [vmem:[%s2367_s0 + $0x338] sm:$0xff]  ;;  %v1207_v46 = vsub.f32 %v1533_v38, %v1534_v39 }
  0x67   :  { %990 = vst [vmem:[#allocation0 + $0x70] sm:$0xff] %v987_v44  ;;  %v1537_v44 = vld [vmem:[%s2367_s0 + $0x178] sm:$0xff]  ;;  %v1217_v49 = vsub.f32 %v1535_v41, %v1536_v42 }
  0x68   :  { %1000 = vst [vmem:[#allocation0 + $0x270] sm:$0xff] %v997_v47  ;;  %v1539_v47 = vld [vmem:[%s2367_s0 + $0x378] sm:$0xff]  ;;  %v1227_v52 = vsub.f32 %v1537_v44, %v1538_v45 }
  0x69   :  { %1010 = vst [vmem:[#allocation0 + $0xb0] sm:$0xff] %v1007_v50  ;;  %v1541_v50 = vld [vmem:[%s2367_s0 + $0x1b8] sm:$0xff]  ;;  %v1237_v55 = vsub.f32 %v1539_v47, %v1540_v48 }
  0x6a   :  { %1020 = vst [vmem:[#allocation0 + $0x2b0] sm:$0xff] %v1017_v53  ;;  %v1543_v53 = vld [vmem:[%s2367_s0 + $0x3b8] sm:$0xff]  ;;  %v1247_v58 = vsub.f32 %v1541_v50, %v1542_v51 }
  0x6b   :  { %1030 = vst [vmem:[#allocation0 + $0xf0] sm:$0xff] %v1027_v56  ;;  %v1545_v56 = vld [vmem:[%s2367_s0 + $0x1f8] sm:$0xff]  ;;  %v1257_v61 = vsub.f32 %v1543_v53, %v1544_v54 }
  0x6c   :  { %1040 = vst [vmem:[#allocation0 + $0x2f0] sm:$0xff] %v1037_v59  ;;  %v1547_v59 = vld [vmem:[%s2367_s0 + $0x3f8] sm:$0xff] }
  0x6d   :  { %1050 = vst [vmem:[#allocation0 + $0x130] sm:$0xff] %v1047_v62  ;;  %v1267_v62 = vsub.f32 %v1545_v56, %v1546_v57  ;;  %v1277_v63 = vsub.f32 %v1547_v59, %v1548_v60 }
  0x6e   :  { %1060 = vst [vmem:[#allocation0 + $0x330] sm:$0xff] %v1057_v1 }
  0x6f   :  { %1070 = vst [vmem:[#allocation0 + $0x170] sm:$0xff] %v1067_v4 }
  0x70   :  { %1080 = vst [vmem:[#allocation0 + $0x370] sm:$0xff] %v1077_v7 }
  0x71   :  { %1090 = vst [vmem:[#allocation0 + $0x1b0] sm:$0xff] %v1087_v10 }
  0x72   :  { %1100 = vst [vmem:[#allocation0 + $0x3b0] sm:$0xff] %v1097_v13 }
  0x73   :  { %1110 = vst [vmem:[#allocation0 + $0x1f0] sm:$0xff] %v1107_v16 }
  0x74   :  { %1120 = vst [vmem:[#allocation0 + $0x3f0] sm:$0xff] %v1117_v19 }
  0x75   :  { %1130 = vst [vmem:[#allocation0 + $0x38] sm:$0xff] %v1127_v22 }
  0x76   :  { %1140 = vst [vmem:[#allocation0 + $0x238] sm:$0xff] %v1137_v25 }
  0x77   :  { %1150 = vst [vmem:[#allocation0 + $0x78] sm:$0xff] %v1147_v28 }
  0x78   :  { %1160 = vst [vmem:[#allocation0 + $0x278] sm:$0xff] %v1157_v31 }
  0x79   :  { %1170 = vst [vmem:[#allocation0 + $0xb8] sm:$0xff] %v1167_v34 }
  0x7a   :  { %1180 = vst [vmem:[#allocation0 + $0x2b8] sm:$0xff] %v1177_v37 }
  0x7b   :  { %1190 = vst [vmem:[#allocation0 + $0xf8] sm:$0xff] %v1187_v40 }
  0x7c   :  { %1200 = vst [vmem:[#allocation0 + $0x2f8] sm:$0xff] %v1197_v43 }
  0x7d   :  { %1210 = vst [vmem:[#allocation0 + $0x138] sm:$0xff] %v1207_v46 }
  0x7e   :  { %1220 = vst [vmem:[#allocation0 + $0x338] sm:$0xff] %v1217_v49 }
  0x7f   :  { %1230 = vst [vmem:[#allocation0 + $0x178] sm:$0xff] %v1227_v52 }
  0x80   :  { %1240 = vst [vmem:[#allocation0 + $0x378] sm:$0xff] %v1237_v55 }
  0x81   :  { %1250 = vst [vmem:[#allocation0 + $0x1b8] sm:$0xff] %v1247_v58 }
  0x82   :  { %1260 = vst [vmem:[#allocation0 + $0x3b8] sm:$0xff] %v1257_v61 }
  0x83   :  { %1270 = vst [vmem:[#allocation0 + $0x1f8] sm:$0xff] %v1267_v62 }
  0x84   :  { %1280 = vst [vmem:[#allocation0 + $0x3f8] sm:$0xff] %v1277_v63 }
  0x85   :  { %1291 = dma.vmem_to_hbm [thread:$0]  %s1284_s16, 16384, %s1286_s2, [#allocation1], %s1579_s19, %s1579_s19, %s1580_s20  }
  0x86   :  { %1576 = dma.done.wait [#allocation1], 16384  }
  0x87   :  { %1577 = vsyncadd [#allocation1], 4294950912 }
  0x88   :  { %1294 = vsyncpa [#allocation1], 1 }

</bundles_post_ra>
